<compile_context>
chip_gen: v7x
topology: tpu7x:2x2x1
jax: 0.10.0
libtpu: 0.0.40
codegen_flags: <defaults>
</compile_context>

<pallas_src>
import functools

import numpy as np

import jax
import jax.numpy as jnp
from jax.experimental import pallas as pl
from jax.experimental.pallas import tpu as pltpu

EPS = 1e-5
_MIB = 1024 * 1024


# ---------------------------------------------------------------------------
# Generation-aware scoped-VMEM budget (review item 2).
# ---------------------------------------------------------------------------
def _vmem_limit_bytes():
    cap = None
    try:
        cap = int(pltpu.get_tpu_info().vmem_capacity_bytes)
    except Exception:
        cap = None
    if not cap or cap <= 0:
        cap = 64 * _MIB
    if cap >= 96 * _MIB:            # v5e / v6e: 128 MiB physical
        limit = cap - 16 * _MIB     # ~112 MiB scoped
    else:                           # v7x: 64 MiB physical (shared by 2 TCs)
        limit = (cap * 3) // 4      # ~48 MiB, leave pipelining headroom
    return int(min(max(limit, 32 * _MIB), 128 * _MIB))


# ---------------------------------------------------------------------------
# Depth-tile picker (review item 11): divisor of `do`, multiple of 8 (or == do)
# for (8,128) store legality, close to the M target, under the VMEM budget,
# with a no-cliff fallback (e.g. prime depths pick the whole depth).
# ---------------------------------------------------------------------------
def _pick_depth_tile(do, target, per_row_bytes, budget_bytes):
    cands = [t for t in range(1, do + 1)
             if do % t == 0 and (t == do or t % 8 == 0)]
    cap = max(1, budget_bytes // max(per_row_bytes, 1))
    ok = [t for t in cands if t <= cap] or cands[:1]
    below = [t for t in ok if t <= target]
    above = [t for t in ok if t > target]
    if below and (not above or below[-1] >= max(8, target // 4)):
        return below[-1]
    return above[0] if above else ok[-1]


# ---------------------------------------------------------------------------
# pl.Buffered(1) capability probe (review items 3/10): single-buffer the
# never-changing / per-n operands, falling back silently if this JAX build
# does not support pipeline_mode.
# ---------------------------------------------------------------------------
_SINGLE_BUFFER_OK = None


def _probe_kernel(x_ref, o_ref):
    o_ref[...] = x_ref[...] + 1.0


def _single_buffer_supported():
    global _SINGLE_BUFFER_OK
    if _SINGLE_BUFFER_OK is not None:
        return _SINGLE_BUFFER_OK
    try:
        fn = pl.pallas_call(
            _probe_kernel,
            out_shape=jax.ShapeDtypeStruct((16, 128), jnp.float32),
            grid=(2,),
            in_specs=[pl.BlockSpec((8, 128), lambda i: (i, 0),
                                   pipeline_mode=pl.Buffered(1))],
            out_specs=pl.BlockSpec((8, 128), lambda i: (i, 0)),
        )
        jax.block_until_ready(fn(jnp.zeros((16, 128), jnp.float32)))
        _SINGLE_BUFFER_OK = True
    except Exception:
        _SINGLE_BUFFER_OK = False
    return _SINGLE_BUFFER_OK


def _bspec(shape, index_map, single_buffer=False):
    if single_buffer and _single_buffer_supported():
        return pl.BlockSpec(shape, index_map, pipeline_mode=pl.Buffered(1))
    return pl.BlockSpec(shape, index_map)


# ---------------------------------------------------------------------------
# Host-side banded weight: (Kd, Kh, Kw, Cin, Cout) -> (Kd, H*W*Cin, Ho*Wo*Cout)
# The kh/kw taps and the H/W zero padding are absorbed into the weight, so one
# (td, H*W*Cin) @ (H*W*Cin, Ho*Wo*Cout) matmul per kd tap yields the conv
# output directly in lane-dense (Ho, Wo, Cout) order.
# TODO(synk): this densification grows as (H*W)^2; switch to a W-tiled
# (block-banded) variant before the band outgrows VMEM at large spatial sizes.
# ---------------------------------------------------------------------------
def _make_band_weight(w, h_in, w_in, padding):
    w = np.asarray(w, dtype=np.float32)
    kd_sz, kh_sz, kw_sz, cin, cout = w.shape
    ho = h_in + 2 * padding - kh_sz + 1
    wo = w_in + 2 * padding - kw_sz + 1
    band = np.zeros((kd_sz, h_in * w_in * cin, ho * wo * cout), np.float32)
    for kd in range(kd_sz):
        for kh in range(kh_sz):
            for kw in range(kw_sz):
                for oh in range(ho):
                    ih = oh + kh - padding
                    if ih < 0 or ih >= h_in:
                        continue
                    for ow in range(wo):
                        iw = ow + kw - padding
                        if iw < 0 or iw >= w_in:
                            continue
                        r = (ih * w_in + iw) * cin
                        c = (oh * wo + ow) * cout
                        band[kd, r:r + cin, c:c + cout] = w[kd, kh, kw]
    return jnp.asarray(band)


# ---------------------------------------------------------------------------
# Conv kernel: depth-halo staging (+ fused previous-block BN+ReLU) -> ksize
# banded matmuls -> lane-dense output tile + resident per-n partial BN stats.
# ---------------------------------------------------------------------------
def _conv_kernel(x_ref, band_ref, scale_ref, shift_ref,
                 y_ref, sum_ref, ssq_ref, slab_ref,
                 *, td, ksize, pad, d_in, n_dt, fuse_input_bnrelu):
    # x_ref     : (1, D, H*W*Cin)          lane-folded, unpadded input volume
    # band_ref  : (ksize, H*W*Cin, Ho*Wo*Cout)  banded weights (kh/kw + H/W pad)
    # scale/shift_ref : (1, H*W*Cin)       previous block's BN affine (fused)
    # y_ref     : (1, td, Ho*Wo*Cout)      lane-dense conv output tile
    # sum/ssq_ref : (1, 1, Ho*Wo*Cout)     per-n partial stats (resident)
    # slab_ref  : (td + ksize - 1, H*W*Cin)  depth-haloed staging slab
    t = pl.program_id(1)
    rows = td + ksize - 1
    k_lanes = slab_ref.shape[-1]
    nout = y_ref.shape[-1]

    def pre(v):
        if fuse_input_bnrelu:
            return jnp.maximum(v * scale_ref[...] + shift_ref[...], 0.0)
        return v

    def zrows(r):
        return jnp.zeros((r, k_lanes), jnp.float32)

    # ---- stage the depth halo; D zero-padding + fused BN/ReLU applied here.
    # The slab is rebuilt every step (no cross-tile scratch dependence).
    if pad == 0:
        slab_ref[...] = pre(x_ref[0, pl.ds(t * td, rows), :])
    elif n_dt == 1:
        slab_ref[0:pad, :] = zrows(pad)
        slab_ref[pad:pad + d_in, :] = pre(x_ref[0])
        if rows - pad - d_in > 0:
            slab_ref[pad + d_in:, :] = zrows(rows - pad - d_in)
    else:
        @pl.when(t == 0)
        def _():
            slab_ref[0:pad, :] = zrows(pad)
            slab_ref[pad:, :] = pre(x_ref[0, pl.ds(0, rows - pad), :])

        if n_dt > 2:
            @pl.when(jnp.logical_and(t > 0, t < n_dt - 1))
            def _():
                slab_ref[...] = pre(x_ref[0, pl.ds(t * td - pad, rows), :])

        @pl.when(t == n_dt - 1)
        def _():
            d0 = (n_dt - 1) * td                    # static
            avail = d_in - (d0 - pad)               # static, < rows
            slab_ref[0:avail, :] = pre(x_ref[0, pl.ds(d0 - pad, avail), :])
            if rows - avail > 0:
                slab_ref[avail:, :] = zrows(rows - avail)

    # ---- ksize banded matmuls on the MXU:
    #      (td, H*W*Cin) @ (H*W*Cin, Ho*Wo*Cout), K ~ 256-640, N ~ 512.
    acc = jnp.zeros((td, nout), jnp.float32)
    for kd in range(ksize):
        acc = acc + jnp.dot(slab_ref[pl.ds(kd, td), :], band_ref[kd],
                            preferred_element_type=jnp.float32)

    y_ref[...] = acc.reshape(1, td, nout)

    # ---- per-n partial batch stats accumulated across depth tiles (emitted
    # once per n when the resident output block changes).
    @pl.when(t == 0)
    def _():
        sum_ref[...] = jnp.zeros_like(sum_ref)
        ssq_ref[...] = jnp.zeros_like(ssq_ref)
    sum_ref[...] += jnp.sum(acc, axis=0).reshape(1, 1, nout)
    ssq_ref[...] += jnp.sum(acc * acc, axis=0).reshape(1, 1, nout)


def _conv_block(x, band, *, h_in, w_in, cin, cout, ksize, padding,
                m_target, vmem_limit, in_scale=None, in_shift=None):
    """Conv3d (stride 1, no bias) over lane-folded x: (N, D, H*W*Cin).

    Returns (y, psum, pssq, (Do, Ho, Wo)); y is (N, Do, Ho*Wo*Cout).
    If in_scale / in_shift (per input lane) are given, the previous block's
    BatchNorm + ReLU is fused into the input staging path.
    """
    n, d_in, k_lanes = x.shape
    assert k_lanes == h_in * w_in * cin, (k_lanes, h_in, w_in, cin)
    # TODO(synk): stride != 1 not supported (Up3d's blocks use stride=1).
    do = d_in + 2 * padding - ksize + 1
    ho = h_in + 2 * padding - ksize + 1
    wo = w_in + 2 * padding - ksize + 1
    nout = ho * wo * cout
    assert band.shape == (ksize, k_lanes, nout), band.shape

    # Per-output-depth-row VMEM cost (slab row + double-buffered y row) and
    # fixed cost (input volume, band, stats); derive the depth tile from the
    # budget, targeting M = td rows per matmul.
    per_row = (k_lanes + 2 * nout) * 4
    fixed = (2 * d_in * k_lanes + 2 * ksize * k_lanes * nout
             + 4 * nout + 2 * k_lanes) * 4
    budget = max(per_row, int(vmem_limit * 0.8) - fixed)
    td = _pick_depth_tile(do, m_target, per_row, budget)
    n_dt = do // td
    # TODO(synk): for tiny D (td == do small) fold several batch elements into
    # one grid step to push M past 128/256 rows per matmul.

    fuse = in_scale is not None
    scale = in_scale if fuse else jnp.ones((k_lanes,), jnp.float32)
    shift = in_shift if fuse else jnp.zeros((k_lanes,), jnp.float32)
    scale = scale.reshape(1, k_lanes).astype(jnp.float32)
    shift = shift.reshape(1, k_lanes).astype(jnp.float32)

    kernel = functools.partial(
        _conv_kernel, td=td, ksize=ksize, pad=padding, d_in=d_in, n_dt=n_dt,
        fuse_input_bnrelu=fuse)

    y, psum, pssq = pl.pallas_call(
        kernel,
        out_shape=(
            jax.ShapeDtypeStruct((n, do, nout), jnp.float32),
            jax.ShapeDtypeStruct((n, 1, nout), jnp.float32),
            jax.ShapeDtypeStruct((n, 1, nout), jnp.float32),
        ),
        grid_spec=pltpu.PrefetchScalarGridSpec(
            num_scalar_prefetch=0,
            grid=(n, n_dt),
            in_specs=[
                # Per-n input volume: fetched once per n; single-buffered
                # when the running JAX supports pl.Buffered(1).
                _bspec((1, d_in, k_lanes), lambda i, t: (i, 0, 0),
                       single_buffer=True),
                # Never-changing operands: single resident copy in VMEM.
                _bspec((ksize, k_lanes, nout), lambda i, t: (0, 0, 0),
                       single_buffer=True),
                _bspec((1, k_lanes), lambda i, t: (0, 0), single_buffer=True),
                _bspec((1, k_lanes), lambda i, t: (0, 0), single_buffer=True),
            ],
            out_specs=[
                pl.BlockSpec((1, td, nout), lambda i, t: (i, t, 0)),
                pl.BlockSpec((1, 1, nout), lambda i, t: (i, 0, 0)),
                pl.BlockSpec((1, 1, nout), lambda i, t: (i, 0, 0)),
            ],
            scratch_shapes=[
                pltpu.VMEM((td + ksize - 1, k_lanes), jnp.float32)],
        ),
        compiler_params=pltpu.CompilerParams(
            # Depth stays "arbitrary": the per-n stat accumulators are
            # resident across depth tiles.  (On v7x with tiny N one could
            # trade back to per-tile stat outputs and mark depth "parallel".)
            dimension_semantics=("parallel", "arbitrary"),
            vmem_limit_bytes=vmem_limit),
    )(x, band, scale, shift)
    return y, psum, pssq, (do, ho, wo)


def _bn_finish(psum, pssq, count, howo, cout, gamma, beta):
    """Per-n partial (sum, sumsq) over lanes -> BatchNorm scale/shift (glue)."""
    s = jnp.sum(psum, axis=(0, 1)).reshape(howo, cout).sum(axis=0)
    q = jnp.sum(pssq, axis=(0, 1)).reshape(howo, cout).sum(axis=0)
    # NOTE: E[x^2]-E[x]^2 in f32; the clamp guards roundoff at these sizes.
    mean = s / count
    var = jnp.maximum(q / count - mean * mean, 0.0)       # biased (train mode)
    scale = gamma * jax.lax.rsqrt(var + EPS)
    shift = beta - mean * scale
    return scale, shift


# ---------------------------------------------------------------------------
# Up3d forward: concat channels, then DoubleConv3d (two Conv3d+BN+ReLU).
# x1, x2 are NCDHW (PyTorch convention); result is NCDHW.
# ---------------------------------------------------------------------------
def up3d_forward(x1, x2, params, *, ksize, padding, m_target=256):
    n, c1, d, h, w = x1.shape
    c2 = x2.shape[1]
    cin = c1 + c2

    # Channel concat + fold (H, W, C) into the lane dim: one fused XLA copy.
    # TODO(synk): fold this concat/transpose into conv1's input staging
    # (strided DMA from NCDHW) to drop one HBM round trip over the input.
    x = jnp.concatenate([x2, x1], axis=1)
    x = jnp.transpose(x, (0, 2, 3, 4, 1)).reshape(n, d, h * w * cin)

    p1, p2 = params["conv1"], params["conv2"]
    cmid = p1["gamma"].shape[0]
    cout = p2["gamma"].shape[0]
    vlim = _vmem_limit_bytes()

    # Block 1: conv + per-n partial stats (BN1+ReLU is fused into block 2's
    # input staging, so y1 is stored pre-normalization and read only once).
    y1, s1, q1, (do1, ho1, wo1) = _conv_block(
        x, p1["band"], h_in=h, w_in=w, cin=cin, cout=cmid, ksize=ksize,
        padding=padding, m_target=m_target, vmem_limit=vlim)
    scale1, shift1 = _bn_finish(s1, q1, float(n * do1 * ho1 * wo1),
                                ho1 * wo1, cmid, p1["gamma"], p1["beta"])

    # Block 2: conv with BN1+ReLU applied on the fly to its input.
    y2, s2, q2, (do2, ho2, wo2) = _conv_block(
        y1, p2["band"], h_in=ho1, w_in=wo1, cin=cmid, cout=cout, ksize=ksize,
        padding=padding, m_target=m_target, vmem_limit=vlim,
        in_scale=jnp.tile(scale1, ho1 * wo1),
        in_shift=jnp.tile(shift1, ho1 * wo1))
    scale2, shift2 = _bn_finish(s2, q2, float(n * do2 * ho2 * wo2),
                                ho2 * wo2, cout, p2["gamma"], p2["beta"])

    # Final BN2 + ReLU fused into the (required) lane-fold -> NCDHW transpose
    # as a single XLA pass; writing NCDHW (last dim = W) from a kernel would
    # force 8-lane masked stores, so this pass is deliberately left to XLA.
    out = jnp.maximum(y2 * jnp.tile(scale2, ho2 * wo2)
                      + jnp.tile(shift2, ho2 * wo2), 0.0)
    out = out.reshape(n, do2, ho2, wo2, cout)
    return jnp.transpose(out, (0, 4, 1, 2, 3))


# ---------------------------------------------------------------------------
# Parameter init (PyTorch-equivalent) and pure-JAX reference for validation.
# ---------------------------------------------------------------------------
def _init_conv(key, cin, cout, k):
    # Conv3d default init bounds.  Bias omitted: a conv bias followed by
    # train-mode BatchNorm is a no-op on the forward output.
    fan_in = cin * k * k * k
    bound = 1.0 / float(np.sqrt(fan_in))
    w = jax.random.uniform(key, (k, k, k, cin, cout),
                           minval=-bound, maxval=bound, dtype=jnp.float32)
    gamma = jnp.ones((cout,), jnp.float32)     # BatchNorm3d default affine
    beta = jnp.zeros((cout,), jnp.float32)
    return w, gamma, beta


def _ref_forward(x1, x2, w1, g1, b1, w2, g2, b2, *, padding):
    """Pure-JAX reference (NCDHW), train-mode BatchNorm forward."""
    def block(x, w, gamma, beta):
        y = jax.lax.conv_general_dilated(
            x, w, window_strides=(1, 1, 1),
            padding=[(padding, padding)] * 3,
            dimension_numbers=("NCDHW", "DHWIO", "NCDHW"))
        mean = y.mean(axis=(0, 2, 3, 4), keepdims=True)
        var = y.var(axis=(0, 2, 3, 4), keepdims=True)        # biased
        yn = (y - mean) * jax.lax.rsqrt(var + EPS)
        yn = gamma.reshape(1, -1, 1, 1, 1) * yn + beta.reshape(1, -1, 1, 1, 1)
        return jnp.maximum(yn, 0.0)
    x = jnp.concatenate([x2, x1], axis=1)
    return block(block(x, w1, g1, b1), w2, g2, b2)


def _run_case(name, key, *, n, c1, c2, cmid, cout, d, h, w,
              ksize, padding, m_target):
    _single_buffer_supported()     # run the capability probe outside tracing
    kx1, kx2, kw1, kw2 = jax.random.split(key, 4)
    x1 = jax.random.normal(kx1, (n, c1, d, h, w), dtype=jnp.float32)
    x2 = jax.random.normal(kx2, (n, c2, d, h, w), dtype=jnp.float32)
    w1, g1, b1 = _init_conv(kw1, c1 + c2, cmid, ksize)
    w2, g2, b2 = _init_conv(kw2, cmid, cout, ksize)
    ho1 = h + 2 * padding - ksize + 1
    wo1 = w + 2 * padding - ksize + 1
    params = {
        "conv1": {"band": _make_band_weight(w1, h, w, padding),
                  "gamma": g1, "beta": b1},
        "conv2": {"band": _make_band_weight(w2, ho1, wo1, padding),
                  "gamma": g2, "beta": b2},
    }
    fwd = jax.jit(functools.partial(up3d_forward, ksize=ksize,
                                    padding=padding, m_target=m_target))
    out = fwd(x1, x2, params)
    jax.block_until_ready(out)
    ref = _ref_forward(x1, x2, w1, g1, b1, w2, g2, b2, padding=padding)
    assert out.shape == ref.shape, (name, out.shape, ref.shape)
    err = float(jnp.max(jnp.abs(out - ref)))
    assert err < 2e-3, f"{name}: max abs err vs reference = {err}"
    return out


if __name__ == "__main__":
    root = jax.random.PRNGKey(0)
    k_a, k_b = jax.random.split(root)

    # Primary case: Up3d(in_channels=4, out_channels=8, kernel_size=3,
    # stride=1, padding=1) on 8^3 volumes, batch 2 (single depth tile).
    _run_case("up3d_8cube", k_a, n=2, c1=2, c2=2, cmid=8, cout=8,
              d=8, h=8, w=8, ksize=3, padding=1, m_target=256)

    # Secondary case: deeper volume with a deliberately small depth-tile
    # target so the multi-tile (first / interior / last) depth-halo paths and
    # non-uniform channel counts are also validated against the reference.
    _run_case("up3d_deep", k_b, n=1, c1=1, c2=2, cmid=5, cout=3,
              d=24, h=8, w=8, ksize=3, padding=1, m_target=8)

    print("KERNEL_OK")
</pallas_src>

<mosaic_0001>
module attributes {stable_mosaic.version = 11 : i64} {
  func.func @_probe_kernel(%arg0: i32, %arg1: memref<8x128xf32, #tpu.memory_space<vmem>>, %arg2: memref<8x128xf32, #tpu.memory_space<vmem>>) attributes {dimension_semantics = [#tpu.dimension_semantics<arbitrary>], iteration_bounds = array<i64: 2>, scalar_prefetch = 0 : i64, scratch_operands = 0 : i64, tpu.core_type = #tpu.core_type<tc>, window_params = [{pipeline_mode = #tpu.pipeline_mode<synchronous>, transform_indices = @transform_0, window_bounds = array<i64: 8, 128>}, {transform_indices = @transform_1, window_bounds = array<i64: 8, 128>}]} {
    %c0 = arith.constant 0 : index
    %c0_0 = arith.constant 0 : index
    %0 = vector.load %arg1[%c0, %c0_0] : memref<8x128xf32, #tpu.memory_space<vmem>>, vector<8x128xf32>
    %cst = arith.constant 1.000000e+00 : f32
    %1 = vector.broadcast %cst : f32 to vector<8x128xf32>
    %2 = arith.addf %0, %1 : vector<8x128xf32>
    %c0_1 = arith.constant 0 : index
    %c0_2 = arith.constant 0 : index
    %3 = vector.load %arg2[%c0_1, %c0_2] : memref<8x128xf32, #tpu.memory_space<vmem>>, vector<8x128xf32>
    tpu.vector_store %arg2[%c0_1, %c0_2], %2 {strides = array<i32>} : memref<8x128xf32, #tpu.memory_space<vmem>>, vector<8x128xf32>,
    return
  }
  func.func @transform_0(%arg0: i32) -> (i32, i32) {
    %c0_i32 = arith.constant 0 : i32
    %c0_i32_0 = arith.constant 0 : i32
    return %arg0, %c0_i32 : i32, i32
  }
  func.func @transform_1(%arg0: i32) -> (i32, i32) {
    %c0_i32 = arith.constant 0 : i32
    %c0_i32_0 = arith.constant 0 : i32
    return %arg0, %c0_i32 : i32, i32
  }
}

module attributes {stable_mosaic.version = 11 : i64} {
  func.func @_conv_kernel(%arg0: i32, %arg1: i32, %arg2: memref<1x8x256xf32, #tpu.memory_space<vmem>>, %arg3: memref<3x256x512xf32, #tpu.memory_space<vmem>>, %arg4: memref<1x256xf32, #tpu.memory_space<vmem>>, %arg5: memref<1x256xf32, #tpu.memory_space<vmem>>, %arg6: memref<1x8x512xf32, #tpu.memory_space<vmem>>, %arg7: memref<1x1x512xf32, #tpu.memory_space<vmem>>, %arg8: memref<1x1x512xf32, #tpu.memory_space<vmem>>, %arg9: memref<10x256xf32, #tpu.memory_space<vmem>>) attributes {dimension_semantics = [#tpu.dimension_semantics<parallel>, #tpu.dimension_semantics<arbitrary>], iteration_bounds = array<i64: 2, 1>, scalar_prefetch = 0 : i64, scratch_operands = 1 : i64, tpu.core_type = #tpu.core_type<tc>, window_params = [{transform_indices = @transform_0, window_bounds = array<i64: 1, 8, 256>}, {pipeline_mode = #tpu.pipeline_mode<synchronous>, transform_indices = @transform_1, window_bounds = array<i64: 3, 256, 512>}, {pipeline_mode = #tpu.pipeline_mode<synchronous>, transform_indices = @transform_2, window_bounds = array<i64: 1, 256>}, {pipeline_mode = #tpu.pipeline_mode<synchronous>, transform_indices = @transform_3, window_bounds = array<i64: 1, 256>}, {transform_indices = @transform_4, window_bounds = array<i64: 1, 8, 512>}, {transform_indices = @transform_5, window_bounds = array<i64: 1, 1, 512>}, {transform_indices = @transform_6, window_bounds = array<i64: 1, 1, 512>}]} {
    %cst = arith.constant 0.000000e+00 : f32
    %0 = vector.broadcast %cst : f32 to vector<1x256xf32>
    %c0 = arith.constant 0 : index
    %c0_0 = arith.constant 0 : index
    %1 = vector.load %arg9[%c0, %c0_0] : memref<10x256xf32, #tpu.memory_space<vmem>>, vector<1x256xf32>
    tpu.vector_store %arg9[%c0, %c0_0], %0 {strides = array<i32>} : memref<10x256xf32, #tpu.memory_space<vmem>>, vector<1x256xf32>,
    %c0_1 = arith.constant 0 : index
    %c0_2 = arith.constant 0 : index
    %c0_3 = arith.constant 0 : index
    %2 = vector.load %arg2[%c0_1, %c0_2, %c0_3] : memref<1x8x256xf32, #tpu.memory_space<vmem>>, vector<1x8x256xf32>
    %3 = vector.shape_cast %2 : vector<1x8x256xf32> to vector<8x256xf32>
    %c1 = arith.constant 1 : index
    %c0_4 = arith.constant 0 : index
    %4 = vector.load %arg9[%c1, %c0_4] : memref<10x256xf32, #tpu.memory_space<vmem>>, vector<8x256xf32>
    tpu.vector_store %arg9[%c1, %c0_4], %3 {strides = array<i32>} : memref<10x256xf32, #tpu.memory_space<vmem>>, vector<8x256xf32>,
    %cst_5 = arith.constant 0.000000e+00 : f32
    %5 = vector.broadcast %cst_5 : f32 to vector<1x256xf32>
    %c9 = arith.constant 9 : index
    %c0_6 = arith.constant 0 : index
    %6 = vector.load %arg9[%c9, %c0_6] : memref<10x256xf32, #tpu.memory_space<vmem>>, vector<1x256xf32>
    tpu.vector_store %arg9[%c9, %c0_6], %5 {strides = array<i32>} : memref<10x256xf32, #tpu.memory_space<vmem>>, vector<1x256xf32>,
    %cst_7 = arith.constant 0.000000e+00 : f32
    %7 = vector.broadcast %cst_7 : f32 to vector<8x512xf32>
    %c0_8 = arith.constant 0 : index
    %c0_9 = arith.constant 0 : index
    %8 = vector.load %arg9[%c0_8, %c0_9] : memref<10x256xf32, #tpu.memory_space<vmem>>, vector<8x256xf32>
    %c0_10 = arith.constant 0 : index
    %c0_11 = arith.constant 0 : index
    %c0_12 = arith.constant 0 : index
    %9 = vector.load %arg3[%c0_10, %c0_11, %c0_12] : memref<3x256x512xf32, #tpu.memory_space<vmem>>, vector<1x256x512xf32>
    %10 = vector.shape_cast %9 : vector<1x256x512xf32> to vector<256x512xf32>
    %cst_13 = arith.constant dense<0.000000e+00> : vector<8x512xf32>
    %11 = tpu.matmul %8, %10, %cst_13 {dimension_numbers = #tpu.dot_dimension_numbers<[1], [0], [0], [1], [0, 0, 1, 1], [], []>} : vector<8x256xf32>, vector<256x512xf32>, vector<8x512xf32> -> vector<8x512xf32>
    %12 = arith.addf %7, %11 : vector<8x512xf32>
    %c1_14 = arith.constant 1 : index
    %c0_15 = arith.constant 0 : index
    %13 = vector.load %arg9[%c1_14, %c0_15] : memref<10x256xf32, #tpu.memory_space<vmem>>, vector<8x256xf32>
    %c1_16 = arith.constant 1 : index
    %c0_17 = arith.constant 0 : index
    %c0_18 = arith.constant 0 : index
    %14 = vector.load %arg3[%c1_16, %c0_17, %c0_18] : memref<3x256x512xf32, #tpu.memory_space<vmem>>, vector<1x256x512xf32>
    %15 = vector.shape_cast %14 : vector<1x256x512xf32> to vector<256x512xf32>
    %cst_19 = arith.constant dense<0.000000e+00> : vector<8x512xf32>
    %16 = tpu.matmul %13, %15, %cst_19 {dimension_numbers = #tpu.dot_dimension_numbers<[1], [0], [0], [1], [0, 0, 1, 1], [], []>} : vector<8x256xf32>, vector<256x512xf32>, vector<8x512xf32> -> vector<8x512xf32>
    %17 = arith.addf %12, %16 : vector<8x512xf32>
    %c2 = arith.constant 2 : index
    %c0_20 = arith.constant 0 : index
    %18 = vector.load %arg9[%c2, %c0_20] : memref<10x256xf32, #tpu.memory_space<vmem>>, vector<8x256xf32>
    %c2_21 = arith.constant 2 : index
    %c0_22 = arith.constant 0 : index
    %c0_23 = arith.constant 0 : index
    %19 = vector.load %arg3[%c2_21, %c0_22, %c0_23] : memref<3x256x512xf32, #tpu.memory_space<vmem>>, vector<1x256x512xf32>
    %20 = vector.shape_cast %19 : vector<1x256x512xf32> to vector<256x512xf32>
    %cst_24 = arith.constant dense<0.000000e+00> : vector<8x512xf32>
    %21 = tpu.matmul %18, %20, %cst_24 {dimension_numbers = #tpu.dot_dimension_numbers<[1], [0], [0], [1], [0, 0, 1, 1], [], []>} : vector<8x256xf32>, vector<256x512xf32>, vector<8x512xf32> -> vector<8x512xf32>
    %22 = arith.addf %17, %21 : vector<8x512xf32>
    %23 = vector.shape_cast %22 : vector<8x512xf32> to vector<1x8x512xf32>
    %c0_25 = arith.constant 0 : index
    %c0_26 = arith.constant 0 : index
    %c0_27 = arith.constant 0 : index
    %24 = vector.load %arg6[%c0_25, %c0_26, %c0_27] : memref<1x8x512xf32, #tpu.memory_space<vmem>>, vector<1x8x512xf32>
    tpu.vector_store %arg6[%c0_25, %c0_26, %c0_27], %23 {strides = array<i32>} : memref<1x8x512xf32, #tpu.memory_space<vmem>>, vector<1x8x512xf32>,
    %c0_i32 = arith.constant 0 : i32
    %25 = arith.cmpi eq, %arg1, %c0_i32 : i32
    %26 = arith.extui %25 : i1 to i32
    %c0_i32_28 = arith.constant 0 : i32
    %27 = arith.cmpi ne, %26, %c0_i32_28 : i32
    scf.if %27 {
      %cst_43 = arith.constant 0.000000e+00 : f32
      %39 = vector.broadcast %cst_43 : f32 to vector<1x1x512xf32>
      %c0_44 = arith.constant 0 : index
      %c0_45 = arith.constant 0 : index
      %c0_46 = arith.constant 0 : index
      %40 = vector.load %arg7[%c0_44, %c0_45, %c0_46] : memref<1x1x512xf32, #tpu.memory_space<vmem>>, vector<1x1x512xf32>
      tpu.vector_store %arg7[%c0_44, %c0_45, %c0_46], %39 {strides = array<i32>} : memref<1x1x512xf32, #tpu.memory_space<vmem>>, vector<1x1x512xf32>,
      %cst_47 = arith.constant 0.000000e+00 : f32
      %41 = vector.broadcast %cst_47 : f32 to vector<1x1x512xf32>
      %c0_48 = arith.constant 0 : index
      %c0_49 = arith.constant 0 : index
      %c0_50 = arith.constant 0 : index
      %42 = vector.load %arg8[%c0_48, %c0_49, %c0_50] : memref<1x1x512xf32, #tpu.memory_space<vmem>>, vector<1x1x512xf32>
      tpu.vector_store %arg8[%c0_48, %c0_49, %c0_50], %41 {strides = array<i32>} : memref<1x1x512xf32, #tpu.memory_space<vmem>>, vector<1x1x512xf32>,
    } else {
    }
    %c0_29 = arith.constant 0 : index
    %c0_30 = arith.constant 0 : index
    %c0_31 = arith.constant 0 : index
    %28 = vector.load %arg7[%c0_29, %c0_30, %c0_31] : memref<1x1x512xf32, #tpu.memory_space<vmem>>, vector<1x1x512xf32>
    %cst_32 = arith.constant dense<0.000000e+00> : vector<512xf32>
    %29 = vector.multi_reduction <add>, %22, %cst_32 [0] : vector<8x512xf32> to vector<512xf32>
    %30 = vector.shape_cast %29 : vector<512xf32> to vector<1x1x512xf32>
    %31 = arith.addf %28, %30 : vector<1x1x512xf32>
    %c0_33 = arith.constant 0 : index
    %c0_34 = arith.constant 0 : index
    %c0_35 = arith.constant 0 : index
    %32 = vector.load %arg7[%c0_33, %c0_34, %c0_35] : memref<1x1x512xf32, #tpu.memory_space<vmem>>, vector<1x1x512xf32>
    tpu.vector_store %arg7[%c0_33, %c0_34, %c0_35], %31 {strides = array<i32>} : memref<1x1x512xf32, #tpu.memory_space<vmem>>, vector<1x1x512xf32>,
    %c0_36 = arith.constant 0 : index
    %c0_37 = arith.constant 0 : index
    %c0_38 = arith.constant 0 : index
    %33 = vector.load %arg8[%c0_36, %c0_37, %c0_38] : memref<1x1x512xf32, #tpu.memory_space<vmem>>, vector<1x1x512xf32>
    %34 = arith.mulf %22, %22 : vector<8x512xf32>
    %cst_39 = arith.constant dense<0.000000e+00> : vector<512xf32>
    %35 = vector.multi_reduction <add>, %34, %cst_39 [0] : vector<8x512xf32> to vector<512xf32>
    %36 = vector.shape_cast %35 : vector<512xf32> to vector<1x1x512xf32>
    %37 = arith.addf %33, %36 : vector<1x1x512xf32>
    %c0_40 = arith.constant 0 : index
    %c0_41 = arith.constant 0 : index
    %c0_42 = arith.constant 0 : index
    %38 = vector.load %arg8[%c0_40, %c0_41, %c0_42] : memref<1x1x512xf32, #tpu.memory_space<vmem>>, vector<1x1x512xf32>
    tpu.vector_store %arg8[%c0_40, %c0_41, %c0_42], %37 {strides = array<i32>} : memref<1x1x512xf32, #tpu.memory_space<vmem>>, vector<1x1x512xf32>,
    return
  }
  func.func @transform_0(%arg0: i32, %arg1: i32) -> (i32, i32, i32) {
    %c0_i32 = arith.constant 0 : i32
    %c0_i32_0 = arith.constant 0 : i32
    %c0_i32_1 = arith.constant 0 : i32
    return %arg0, %c0_i32, %c0_i32_0 : i32, i32, i32
  }
  func.func @transform_1(%arg0: i32, %arg1: i32) -> (i32, i32, i32) {
    %c0_i32 = arith.constant 0 : i32
    %c0_i32_0 = arith.constant 0 : i32
    %c0_i32_1 = arith.constant 0 : i32
    %c0_i32_2 = arith.constant 0 : i32
    return %c0_i32, %c0_i32_0, %c0_i32_1 : i32, i32, i32
  }
  func.func @transform_2(%arg0: i32, %arg1: i32) -> (i32, i32) {
    %c0_i32 = arith.constant 0 : i32
    %c0_i32_0 = arith.constant 0 : i32
    %c0_i32_1 = arith.constant 0 : i32
    return %c0_i32, %c0_i32_0 : i32, i32
  }
  func.func @transform_3(%arg0: i32, %arg1: i32) -> (i32, i32) {
    %c0_i32 = arith.constant 0 : i32
    %c0_i32_0 = arith.constant 0 : i32
    %c0_i32_1 = arith.constant 0 : i32
    return %c0_i32, %c0_i32_0 : i32, i32
  }
  func.func @transform_4(%arg0: i32, %arg1: i32) -> (i32, i32, i32) {
    %c0_i32 = arith.constant 0 : i32
    %c0_i32_0 = arith.constant 0 : i32
    return %arg0, %arg1, %c0_i32 : i32, i32, i32
  }
  func.func @transform_5(%arg0: i32, %arg1: i32) -> (i32, i32, i32) {
    %c0_i32 = arith.constant 0 : i32
    %c0_i32_0 = arith.constant 0 : i32
    %c0_i32_1 = arith.constant 0 : i32
    return %arg0, %c0_i32, %c0_i32_0 : i32, i32, i32
  }
  func.func @transform_6(%arg0: i32, %arg1: i32) -> (i32, i32, i32) {
    %c0_i32 = arith.constant 0 : i32
    %c0_i32_0 = arith.constant 0 : i32
    %c0_i32_1 = arith.constant 0 : i32
    return %arg0, %c0_i32, %c0_i32_0 : i32, i32, i32
  }
}

module attributes {stable_mosaic.version = 11 : i64} {
  func.func @_conv_kernel(%arg0: i32, %arg1: i32, %arg2: memref<1x8x512xf32, #tpu.memory_space<vmem>>, %arg3: memref<3x512x512xf32, #tpu.memory_space<vmem>>, %arg4: memref<1x512xf32, #tpu.memory_space<vmem>>, %arg5: memref<1x512xf32, #tpu.memory_space<vmem>>, %arg6: memref<1x8x512xf32, #tpu.memory_space<vmem>>, %arg7: memref<1x1x512xf32, #tpu.memory_space<vmem>>, %arg8: memref<1x1x512xf32, #tpu.memory_space<vmem>>, %arg9: memref<10x512xf32, #tpu.memory_space<vmem>>) attributes {dimension_semantics = [#tpu.dimension_semantics<parallel>, #tpu.dimension_semantics<arbitrary>], iteration_bounds = array<i64: 2, 1>, scalar_prefetch = 0 : i64, scratch_operands = 1 : i64, tpu.core_type = #tpu.core_type<tc>, window_params = [{transform_indices = @transform_0, window_bounds = array<i64: 1, 8, 512>}, {pipeline_mode = #tpu.pipeline_mode<synchronous>, transform_indices = @transform_1, window_bounds = array<i64: 3, 512, 512>}, {pipeline_mode = #tpu.pipeline_mode<synchronous>, transform_indices = @transform_2, window_bounds = array<i64: 1, 512>}, {pipeline_mode = #tpu.pipeline_mode<synchronous>, transform_indices = @transform_3, window_bounds = array<i64: 1, 512>}, {transform_indices = @transform_4, window_bounds = array<i64: 1, 8, 512>}, {transform_indices = @transform_5, window_bounds = array<i64: 1, 1, 512>}, {transform_indices = @transform_6, window_bounds = array<i64: 1, 1, 512>}]} {
    %cst = arith.constant 0.000000e+00 : f32
    %0 = vector.broadcast %cst : f32 to vector<1x512xf32>
    %c0 = arith.constant 0 : index
    %c0_0 = arith.constant 0 : index
    %1 = vector.load %arg9[%c0, %c0_0] : memref<10x512xf32, #tpu.memory_space<vmem>>, vector<1x512xf32>
    tpu.vector_store %arg9[%c0, %c0_0], %0 {strides = array<i32>} : memref<10x512xf32, #tpu.memory_space<vmem>>, vector<1x512xf32>,
    %c0_1 = arith.constant 0 : index
    %c0_2 = arith.constant 0 : index
    %c0_3 = arith.constant 0 : index
    %2 = vector.load %arg2[%c0_1, %c0_2, %c0_3] : memref<1x8x512xf32, #tpu.memory_space<vmem>>, vector<1x8x512xf32>
    %3 = vector.shape_cast %2 : vector<1x8x512xf32> to vector<8x512xf32>
    %c0_4 = arith.constant 0 : index
    %c0_5 = arith.constant 0 : index
    %4 = vector.load %arg4[%c0_4, %c0_5] : memref<1x512xf32, #tpu.memory_space<vmem>>, vector<1x512xf32>
    %5 = vector.broadcast %4 : vector<1x512xf32> to vector<8x512xf32>
    %6 = arith.mulf %3, %5 : vector<8x512xf32>
    %c0_6 = arith.constant 0 : index
    %c0_7 = arith.constant 0 : index
    %7 = vector.load %arg5[%c0_6, %c0_7] : memref<1x512xf32, #tpu.memory_space<vmem>>, vector<1x512xf32>
    %8 = vector.broadcast %7 : vector<1x512xf32> to vector<8x512xf32>
    %9 = arith.addf %6, %8 : vector<8x512xf32>
    %cst_8 = arith.constant 0.000000e+00 : f32
    %10 = vector.broadcast %cst_8 : f32 to vector<8x512xf32>
    %11 = arith.maximumf %9, %10 : vector<8x512xf32>
    %c1 = arith.constant 1 : index
    %c0_9 = arith.constant 0 : index
    %12 = vector.load %arg9[%c1, %c0_9] : memref<10x512xf32, #tpu.memory_space<vmem>>, vector<8x512xf32>
    tpu.vector_store %arg9[%c1, %c0_9], %11 {strides = array<i32>} : memref<10x512xf32, #tpu.memory_space<vmem>>, vector<8x512xf32>,
    %cst_10 = arith.constant 0.000000e+00 : f32
    %13 = vector.broadcast %cst_10 : f32 to vector<1x512xf32>
    %c9 = arith.constant 9 : index
    %c0_11 = arith.constant 0 : index
    %14 = vector.load %arg9[%c9, %c0_11] : memref<10x512xf32, #tpu.memory_space<vmem>>, vector<1x512xf32>
    tpu.vector_store %arg9[%c9, %c0_11], %13 {strides = array<i32>} : memref<10x512xf32, #tpu.memory_space<vmem>>, vector<1x512xf32>,
    %cst_12 = arith.constant 0.000000e+00 : f32
    %15 = vector.broadcast %cst_12 : f32 to vector<8x512xf32>
    %c0_13 = arith.constant 0 : index
    %c0_14 = arith.constant 0 : index
    %16 = vector.load %arg9[%c0_13, %c0_14] : memref<10x512xf32, #tpu.memory_space<vmem>>, vector<8x512xf32>
    %c0_15 = arith.constant 0 : index
    %c0_16 = arith.constant 0 : index
    %c0_17 = arith.constant 0 : index
    %17 = vector.load %arg3[%c0_15, %c0_16, %c0_17] : memref<3x512x512xf32, #tpu.memory_space<vmem>>, vector<1x512x512xf32>
    %18 = vector.shape_cast %17 : vector<1x512x512xf32> to vector<512x512xf32>
    %cst_18 = arith.constant dense<0.000000e+00> : vector<8x512xf32>
    %19 = tpu.matmul %16, %18, %cst_18 {dimension_numbers = #tpu.dot_dimension_numbers<[1], [0], [0], [1], [0, 0, 1, 1], [], []>} : vector<8x512xf32>, vector<512x512xf32>, vector<8x512xf32> -> vector<8x512xf32>
    %20 = arith.addf %15, %19 : vector<8x512xf32>
    %c1_19 = arith.constant 1 : index
    %c0_20 = arith.constant 0 : index
    %21 = vector.load %arg9[%c1_19, %c0_20] : memref<10x512xf32, #tpu.memory_space<vmem>>, vector<8x512xf32>
    %c1_21 = arith.constant 1 : index
    %c0_22 = arith.constant 0 : index
    %c0_23 = arith.constant 0 : index
    %22 = vector.load %arg3[%c1_21, %c0_22, %c0_23] : memref<3x512x512xf32, #tpu.memory_space<vmem>>, vector<1x512x512xf32>
    %23 = vector.shape_cast %22 : vector<1x512x512xf32> to vector<512x512xf32>
    %cst_24 = arith.constant dense<0.000000e+00> : vector<8x512xf32>
    %24 = tpu.matmul %21, %23, %cst_24 {dimension_numbers = #tpu.dot_dimension_numbers<[1], [0], [0], [1], [0, 0, 1, 1], [], []>} : vector<8x512xf32>, vector<512x512xf32>, vector<8x512xf32> -> vector<8x512xf32>
    %25 = arith.addf %20, %24 : vector<8x512xf32>
    %c2 = arith.constant 2 : index
    %c0_25 = arith.constant 0 : index
    %26 = vector.load %arg9[%c2, %c0_25] : memref<10x512xf32, #tpu.memory_space<vmem>>, vector<8x512xf32>
    %c2_26 = arith.constant 2 : index
    %c0_27 = arith.constant 0 : index
    %c0_28 = arith.constant 0 : index
    %27 = vector.load %arg3[%c2_26, %c0_27, %c0_28] : memref<3x512x512xf32, #tpu.memory_space<vmem>>, vector<1x512x512xf32>
    %28 = vector.shape_cast %27 : vector<1x512x512xf32> to vector<512x512xf32>
    %cst_29 = arith.constant dense<0.000000e+00> : vector<8x512xf32>
    %29 = tpu.matmul %26, %28, %cst_29 {dimension_numbers = #tpu.dot_dimension_numbers<[1], [0], [0], [1], [0, 0, 1, 1], [], []>} : vector<8x512xf32>, vector<512x512xf32>, vector<8x512xf32> -> vector<8x512xf32>
    %30 = arith.addf %25, %29 : vector<8x512xf32>
    %31 = vector.shape_cast %30 : vector<8x512xf32> to vector<1x8x512xf32>
    %c0_30 = arith.constant 0 : index
    %c0_31 = arith.constant 0 : index
    %c0_32 = arith.constant 0 : index
    %32 = vector.load %arg6[%c0_30, %c0_31, %c0_32] : memref<1x8x512xf32, #tpu.memory_space<vmem>>, vector<1x8x512xf32>
    tpu.vector_store %arg6[%c0_30, %c0_31, %c0_32], %31 {strides = array<i32>} : memref<1x8x512xf32, #tpu.memory_space<vmem>>, vector<1x8x512xf32>,
    %c0_i32 = arith.constant 0 : i32
    %33 = arith.cmpi eq, %arg1, %c0_i32 : i32
    %34 = arith.extui %33 : i1 to i32
    %c0_i32_33 = arith.constant 0 : i32
    %35 = arith.cmpi ne, %34, %c0_i32_33 : i32
    scf.if %35 {
      %cst_48 = arith.constant 0.000000e+00 : f32
      %47 = vector.broadcast %cst_48 : f32 to vector<1x1x512xf32>
      %c0_49 = arith.constant 0 : index
      %c0_50 = arith.constant 0 : index
      %c0_51 = arith.constant 0 : index
      %48 = vector.load %arg7[%c0_49, %c0_50, %c0_51] : memref<1x1x512xf32, #tpu.memory_space<vmem>>, vector<1x1x512xf32>
      tpu.vector_store %arg7[%c0_49, %c0_50, %c0_51], %47 {strides = array<i32>} : memref<1x1x512xf32, #tpu.memory_space<vmem>>, vector<1x1x512xf32>,
      %cst_52 = arith.constant 0.000000e+00 : f32
      %49 = vector.broadcast %cst_52 : f32 to vector<1x1x512xf32>
      %c0_53 = arith.constant 0 : index
      %c0_54 = arith.constant 0 : index
      %c0_55 = arith.constant 0 : index
      %50 = vector.load %arg8[%c0_53, %c0_54, %c0_55] : memref<1x1x512xf32, #tpu.memory_space<vmem>>, vector<1x1x512xf32>
      tpu.vector_store %arg8[%c0_53, %c0_54, %c0_55], %49 {strides = array<i32>} : memref<1x1x512xf32, #tpu.memory_space<vmem>>, vector<1x1x512xf32>,
    } else {
    }
    %c0_34 = arith.constant 0 : index
    %c0_35 = arith.constant 0 : index
    %c0_36 = arith.constant 0 : index
    %36 = vector.load %arg7[%c0_34, %c0_35, %c0_36] : memref<1x1x512xf32, #tpu.memory_space<vmem>>, vector<1x1x512xf32>
    %cst_37 = arith.constant dense<0.000000e+00> : vector<512xf32>
    %37 = vector.multi_reduction <add>, %30, %cst_37 [0] : vector<8x512xf32> to vector<512xf32>
    %38 = vector.shape_cast %37 : vector<512xf32> to vector<1x1x512xf32>
    %39 = arith.addf %36, %38 : vector<1x1x512xf32>
    %c0_38 = arith.constant 0 : index
    %c0_39 = arith.constant 0 : index
    %c0_40 = arith.constant 0 : index
    %40 = vector.load %arg7[%c0_38, %c0_39, %c0_40] : memref<1x1x512xf32, #tpu.memory_space<vmem>>, vector<1x1x512xf32>
    tpu.vector_store %arg7[%c0_38, %c0_39, %c0_40], %39 {strides = array<i32>} : memref<1x1x512xf32, #tpu.memory_space<vmem>>, vector<1x1x512xf32>,
    %c0_41 = arith.constant 0 : index
    %c0_42 = arith.constant 0 : index
    %c0_43 = arith.constant 0 : index
    %41 = vector.load %arg8[%c0_41, %c0_42, %c0_43] : memref<1x1x512xf32, #tpu.memory_space<vmem>>, vector<1x1x512xf32>
    %42 = arith.mulf %30, %30 : vector<8x512xf32>
    %cst_44 = arith.constant dense<0.000000e+00> : vector<512xf32>
    %43 = vector.multi_reduction <add>, %42, %cst_44 [0] : vector<8x512xf32> to vector<512xf32>
    %44 = vector.shape_cast %43 : vector<512xf32> to vector<1x1x512xf32>
    %45 = arith.addf %41, %44 : vector<1x1x512xf32>
    %c0_45 = arith.constant 0 : index
    %c0_46 = arith.constant 0 : index
    %c0_47 = arith.constant 0 : index
    %46 = vector.load %arg8[%c0_45, %c0_46, %c0_47] : memref<1x1x512xf32, #tpu.memory_space<vmem>>, vector<1x1x512xf32>
    tpu.vector_store %arg8[%c0_45, %c0_46, %c0_47], %45 {strides = array<i32>} : memref<1x1x512xf32, #tpu.memory_space<vmem>>, vector<1x1x512xf32>,
    return
  }
  func.func @transform_0(%arg0: i32, %arg1: i32) -> (i32, i32, i32) {
    %c0_i32 = arith.constant 0 : i32
    %c0_i32_0 = arith.constant 0 : i32
    %c0_i32_1 = arith.constant 0 : i32
    return %arg0, %c0_i32, %c0_i32_0 : i32, i32, i32
  }
  func.func @transform_1(%arg0: i32, %arg1: i32) -> (i32, i32, i32) {
    %c0_i32 = arith.constant 0 : i32
    %c0_i32_0 = arith.constant 0 : i32
    %c0_i32_1 = arith.constant 0 : i32
    %c0_i32_2 = arith.constant 0 : i32
    return %c0_i32, %c0_i32_0, %c0_i32_1 : i32, i32, i32
  }
  func.func @transform_2(%arg0: i32, %arg1: i32) -> (i32, i32) {
    %c0_i32 = arith.constant 0 : i32
    %c0_i32_0 = arith.constant 0 : i32
    %c0_i32_1 = arith.constant 0 : i32
    return %c0_i32, %c0_i32_0 : i32, i32
  }
  func.func @transform_3(%arg0: i32, %arg1: i32) -> (i32, i32) {
    %c0_i32 = arith.constant 0 : i32
    %c0_i32_0 = arith.constant 0 : i32
    %c0_i32_1 = arith.constant 0 : i32
    return %c0_i32, %c0_i32_0 : i32, i32
  }
  func.func @transform_4(%arg0: i32, %arg1: i32) -> (i32, i32, i32) {
    %c0_i32 = arith.constant 0 : i32
    %c0_i32_0 = arith.constant 0 : i32
    return %arg0, %arg1, %c0_i32 : i32, i32, i32
  }
  func.func @transform_5(%arg0: i32, %arg1: i32) -> (i32, i32, i32) {
    %c0_i32 = arith.constant 0 : i32
    %c0_i32_0 = arith.constant 0 : i32
    %c0_i32_1 = arith.constant 0 : i32
    return %arg0, %c0_i32, %c0_i32_0 : i32, i32, i32
  }
  func.func @transform_6(%arg0: i32, %arg1: i32) -> (i32, i32, i32) {
    %c0_i32 = arith.constant 0 : i32
    %c0_i32_0 = arith.constant 0 : i32
    %c0_i32_1 = arith.constant 0 : i32
    return %arg0, %c0_i32, %c0_i32_0 : i32, i32, i32
  }
}

</mosaic_0001>

<bundles_post_ra>
// kernel: tpu_custom_call.1
= control target key start
LH: loop header
LB: loop body
LE: loop exit
PB: predicated region body
PF: predicated region fallthrough
CT: control target
= control target key end

     0   :  { %6 = vsyncpa [#allocation3], 0  ;;  %s499_s0 = inlined_call_operand.hbm [shape: f32[16,128], index: 0, kind: input, shape index: {}]   ;;  %s500_s1 = inlined_call_operand.hbm [shape: f32[16,128], index: 1, kind: output, shape index: {}]  }
   0x1   :  { %7 = vsyncpa [#allocation4], 0 }
   0x2   :  { %9 = vsyncpa [#allocation4 + $0x1], 0  ;;  %s358_s6 = smov 0   ;;  %s360_s7 = smov 0  }
   0x3   :  { %s362_s8 = smov 0   ;;  %s364_s9 = smov 0  }
   0x4 LB: > { %s379_s10 = sadd.s32 4294967295, %s344_s9   ;;  %s193_s11 = sadd.s32 4294967294, %s344_s9   ;;  %s344_s9 = sphi %s364_s9, %s517_s9   ;;  %s340_s8 = sphi %s362_s8, %s516_s8   ;;  %s336_s7 = sphi %s360_s7, %s515_s7   ;;  %s332_s6 = sphi %s358_s6, %s514_s6  }
   0x5   : > { %s383_s12 = sadd.s32 1, %s344_s9   ;;  %s22_s13 = sadd.s32 1, %s340_s8 }
   0x6   : > { %s19_s14 = ssub.s32 %s344_s9, %s383_s12  ;;  %p35_p0 = scmp.ne.s32.totalorder %s336_s7, %s332_s6 }
   0x7   : > { %p20_p1 = scmp.eq.s32.totalorder %s19_s14, 0  ;;  %p36_p2 = scmp.eq.s32.totalorder %s379_s10, 0 }
   0x8   : > { %p58_p3 = scmp.ne.s32.totalorder %s340_s8, %s336_s7  ;;  %p59_p4 = scmp.eq.s32.totalorder %s379_s10, 1 }
   0x9   : > { %s395_s15 = scalar_select %p20_p1, %s340_s8, %s22_s13  }
   0xa   : > { %p397_p5 = por %p59_p4, %p58_p3  ;;  %p65_p6 = scmp.eq.s32.totalorder %s193_s11, 1 }
   0xb   : > { %p194_p7 = scmp.ge.s32.totalorder %s344_s9, 1  ;;  %p402_p8 = por %p36_p2, %p35_p0 }
   0xc   : > { %s505_s16 = scalar_select %p397_p5, 1, 0 }
   0xd   : > { %s506_s17 = scalar_select %p402_p8, 1, 0 }
   0xe   : > { %p72_p9 = scmp.lt.s32.totalorder %s344_s9, 3  ;;  %p407_p10 = por %p65_p6, %p35_p0 }
   0xf   : > { %s195_s19 = sshll.u32 %s379_s10, 7  ;;  %s346_s21 = smov [#allocation2]  }
  0x10   : > { %s507_s18 = scalar_select %p407_p10, 1, 0 }
  0x11   : > { %p412_p11 = pnand %p194_p7, %p72_p9  ;;  %s87_s22 = sshll.u32 %s346_s21, 4  ;;  %s88_s22 = int_to_ptr.vmem [resolvable:$true] %s87_s22 }
  0x12   : > { %s85_s25 = scalar_lea.hbm %s499_s0, %s195_s19  ;;  %s253_s30 = scalar_lea.hbm %s499_s0, 256 }
  0x13   : > { %s508_s20 = scalar_select %p412_p11, 1, 0 }
  0x14   : > { %p206_p12 = pneg %p412_p11  ;;  %s248_s27 = scalar_lea.hbm %s85_s25, 128 }
  0x15   : > { %p249_p0 = scmp.ne.s32.totalorder %s85_s25, %s248_s27  ;;  %p254_p4 = scmp.lt.u32.totalorder %s85_s25, %s499_s0 }
  0x16   : > { %p425_p13 = pnand %p206_p12, %p402_p8  ;;  %p255_p6 = scmp.lt.u32.totalorder %s253_s30, %s248_s27 }
  0x17   : > { %p257_p9 = scmp.lt.u32.totalorder %s248_s27, %s85_s25 }
  0x18   : > { %p250_p1 = pneg %p425_p13  ;;  %p256_p7 = por %p255_p6, %p254_p4 }
  0x1a   : > { %p251_p2 = pnand %p250_p1, %p249_p0  ;;  %p258_p12 = por %p257_p9, %p256_p7 }
  0x1c   : > { %p252_p3 = pneg %p251_p2 }
  0x1e   : > { %p259_p10 = pnand %p258_p12, %p252_p3 }
  0x20   : > { %262 = shalt.err (!%p259_p10)
}
  0x21   : > { %s263_s4 = scalar_lea.vmem %s88_s22, 128  ;;  %p271_p8 = scmp.lt.s32.totalorder %s88_s22, %s88_s22 }
  0x22   : > { %p264_p5 = scmp.ne.s32.totalorder %s88_s22, %s263_s4  ;;  %p272_p11 = scmp.lt.s32.totalorder %s263_s4, %s263_s4 }
  0x24   : > { %p266_p0 = pnand %p264_p5, %p250_p1  ;;  %p273_p4 = por %p272_p11, %p271_p8 }
  0x26   : > { %p267_p2 = pneg %p266_p0 }
  0x28   : > { %p274_p6 = pnand %p273_p4, %p267_p2 }
  0x2a   : > { %277 = shalt.err (!%p274_p6)
}
  0x2b   : > { %209 = dma.hbm_to_vmem [thread:$0]  (!%p425_p13), %s85_s25, 128, %s88_s22, [#allocation3]  }
  0x2c   : > { %p510_p7 = scmp.ne.s32.totalorder %s508_s20, 0 }
  0x2d   : > { %p511_p10 = scmp.ne.s32.totalorder (!%p510_p7), %s506_s17, 0 }
  0x2e   : > { %100 = sbr.rel (%p510_p7) target bundleno = 80 (0x50), region = 24 }
  0x35   : > { %323 = dma.done.wait (%p511_p10), [#allocation3], 128  }
  0x36   : > { %325 = vsyncadd (%p511_p10), [#allocation3], 4294967168  ;;  %s112_s5 = sand.u32 1, %s336_s7   ;;  %v115_v0 = vld [vmem:[#allocation2] sm:$0xff]  ;;  %s457_s20 = scalar_lea.hbm %s500_s1, %s195_s19 }
  0x37   : > { %s197_s11 = sshll.u32 %s112_s5, 3  ;;  %v116_v1 = vadd.f32 1.0, %v115_v0  ;;  %s119_s17 = scalar_lea.sflag [#allocation4], %s112_s5 }
  0x38   : > { %s114_s13 = scalar_lea.vmem [#allocation5], %s197_s11  ;;  %p512_p8 = scmp.ne.s32.totalorder %s505_s16, 0 }
  0x39   : > { %s132_s14 = sshll.u32 %s114_s13, 4  ;;  %117 = vst [vmem:[%s114_s13] sm:$0xff] %v116_v1  ;;  %s347_s24 = smov [#allocation5]   ;;  %s459_s14 = int_to_ptr.vmem [resolvable:$true] %s132_s14 }
  0x3a   : > { %s278_s23 = scalar_lea.vmem %s459_s14, 128  ;;  %s282_s10 = sshll.u32 %s347_s24, 4  ;;  %s283_s10 = int_to_ptr.vmem [resolvable:$false] %s282_s10 }
  0x3b   : > { %p279_p5 = scmp.ne.s32.totalorder %s459_s14, %s278_s23  ;;  %s284_s25 = scalar_lea.vmem %s283_s10, 256 }
  0x3c   : > { %p285_p1 = scmp.lt.s32.totalorder %s459_s14, %s283_s10  ;;  %p286_p3 = scmp.lt.s32.totalorder %s284_s25, %s278_s23 }
  0x3d   : > { %p280_p11 = pnand %p279_p5, %p512_p8 }
  0x3e   : > { %p287_p9 = por %p286_p3, %p285_p1 }
  0x3f   : > { %p281_p13 = pneg %p280_p11 }
  0x41   : > { %p288_p12 = pnand %p287_p9, %p281_p13 }
  0x43   : > { %291 = shalt.err (!%p288_p12)
}
  0x44   : > { %s292_s19 = scalar_lea.hbm %s457_s20, 128  ;;  %s296_s28 = scalar_lea.hbm %s500_s1, 256 }
  0x45   : > { %p293_p0 = scmp.ne.s32.totalorder %s457_s20, %s292_s19  ;;  %p297_p6 = scmp.lt.u32.totalorder %s457_s20, %s500_s1 }
  0x46   : > { %p298_p7 = scmp.lt.u32.totalorder %s296_s28, %s292_s19  ;;  %p300_p5 = scmp.lt.u32.totalorder %s292_s19, %s457_s20 }
  0x47   : > { %p294_p2 = pnand %p293_p0, %p512_p8 }
  0x48   : > { %p299_p10 = por %p298_p7, %p297_p6 }
  0x49   : > { %p295_p4 = pneg %p294_p2 }
  0x4a   : > { %p301_p11 = por %p300_p5, %p299_p10 }
  0x4c   : > { %p302_p13 = pnand %p301_p11, %p295_p4 }
  0x4e   : > { %305 = shalt.err (!%p302_p13)
}
  0x4f   : > { %204 = dma.vmem_to_hbm [thread:$0]  (%p512_p8), %s459_s14, 128, %s457_s20, %s119_s17  }
  0x50 PF: > { %p214_p1 = scmp.ge.s32.totalorder %s344_s9, 2  ;;  %s144_s2 = sand.u32 1, %s332_s6  }
  0x51   : > { %p513_p3 = scmp.ne.s32.totalorder %s507_s18, 0  ;;  %s145_s3 = scalar_lea.sflag [#allocation4], %s144_s2 }
  0x53   : > { %p211_p9 = pnand %p214_p1, %p513_p3 }
  0x55   : > { %327 = dma.done.wait (!%p211_p9), %s145_s3, 128  }
  0x56   : > { %329 = vsyncadd (!%p211_p9), %s145_s3, 4294967168  ;;  %p12_p12 = scmp.ge.s32.totalorder %s383_s12, 4   ;;  %s514_s6 = smov %s336_s7 }
  0x57   : > { %s515_s7 = smov %s340_s8  ;;  %s516_s8 = smov %s395_s15 }
  0x58   : > { %s517_s9 = smov %s383_s12  ;;  %14 = sbr.rel (!%p12_p12) target bundleno = 4 (0x4), region = 62 }
  0x5f   :  { %150 = vsyncpa [#allocation3], 1 }
  0x60   :  { %152 = vsyncpa [#allocation3 + $0x1], 1 }
  0x61   :  { %153 = vsyncpa [#allocation4], 1 }
  0x62   :  { %155 = vsyncpa [#allocation4 + $0x1], 1 }

// kernel: tile.27
= control target key start
LH: loop header
LB: loop body
LE: loop exit
PB: predicated region body
PF: predicated region fallthrough
CT: control target
= control target key end

     0   :  { %s64_s0 = inlined_call_operand.vmem [shape: f32[8], index: 0, kind: input, shape index: {}]   ;;  %s65_s1 = inlined_call_operand.vmem [shape: f32[64,8], index: 1, kind: output, shape index: {}]  }
   0x1   :  { %v4_v0 = vld [vmem:[%s64_s0] ss:$0 sm:$0xff] }
   0x2   :  { %5 = vst [vmem:[%s65_s1] sm:$0xff] %v4_v0  ;;  %20 = vst [vmem:[%s65_s1 + $0x8] sm:$0xff] %v4_v0 }
   0x3   :  { %21 = vst [vmem:[%s65_s1 + $0x10] sm:$0xff] %v4_v0  ;;  %22 = vst [vmem:[%s65_s1 + $0x18] sm:$0xff] %v4_v0 }
   0x4   :  { %23 = vst [vmem:[%s65_s1 + $0x20] sm:$0xff] %v4_v0  ;;  %24 = vst [vmem:[%s65_s1 + $0x28] sm:$0xff] %v4_v0 }
   0x5   :  { %25 = vst [vmem:[%s65_s1 + $0x30] sm:$0xff] %v4_v0  ;;  %26 = vst [vmem:[%s65_s1 + $0x38] sm:$0xff] %v4_v0 }

// kernel: tile.29
= control target key start
LH: loop header
LB: loop body
LE: loop exit
PB: predicated region body
PF: predicated region fallthrough
CT: control target
= control target key end

     0   :  { %vm6_vm0 = vcmask 1043458   ;;  %s11_s6 = smov 3  ;;  %s14_s7 = smov 12  ;;  %vm8_vm1 = vcmask 64512   ;;  %vm20_vm2 = vcmask 1048512   ;;  %vm32_vm3 = vcmask 982912   ;;  %s412_s0 = inlined_call_operand.vmem [shape: f32[64,8], index: 0, kind: input, shape index: {}]   ;;  %s413_s1 = inlined_call_operand.vmem [shape: f32[1,512], index: 1, kind: output, shape index: {}]  }
   0x1   :  { %v215_v0 = vld [vmem:[%s412_s0 + $0xf] ss:$16 sm:%s11_s6]   ;;  %s35_s12 = smov 3  ;;  %s38_s15 = smov 12  ;;  %vm44_vm4 = vcmask 917312   ;;  %vm56_vm5 = vcmask 851712  }
   0x2   :  { %v216_v1 = vld [vmem:[%s412_s0 + $0xf] ss:$16 sm:%s14_s7]   ;;  %v219_v3 = vld [vmem:[%s412_s0 + $0xd] ss:$16 sm:%s35_s12]   ;;  %s263_s16 = smov 120   ;;  %s23_s19 = smov 3 }
   0x3   :  { %v17_v2 = vsel %vm6_vm0, %v216_v1, %v215_v0  ;;  %v220_v4 = vld [vmem:[%s412_s0 + $0xd] ss:$16 sm:%s38_s15]   ;;  %s26_s20 = smov 12  ;;  %v217_v6 = vld [vmem:[%s412_s0 + $0xe] ss:$16 sm:%s23_s19]   ;;  %s47_s25 = smov 3 }
   0x4   :  { %18 = vrot.lane.b32.xlu0 %v17_v2, %s263_s16  ;;  %v41_v5 = vsel %vm6_vm0, %v220_v4, %v219_v3  ;;  %v218_v7 = vld [vmem:[%s412_s0 + $0xe] ss:$16 sm:%s26_s20]   ;;  %s264_s26 = smov 104   ;;  %s50_s29 = smov 12  ;;  %vm68_vm6 = vcmask 786112   ;;  %vm80_vm7 = vcmask 720512  }
   0x5   :  { %42 = vrot.lane.b32.xlu1 %v41_v5, %s264_s26  ;;  %v29_v8 = vsel %vm6_vm0, %v218_v7, %v217_v6  ;;  %v221_v9 = vld [vmem:[%s412_s0 + $0xc] ss:$16 sm:%s47_s25]   ;;  %s59_s3 = smov 3  ;;  %s62_s4 = smov 12  ;;  %vm92_vm8 = vcmask 654912   ;;  %vm104_vm9 = vcmask 589312  }
   0x6   :  { %v222_v10 = vld [vmem:[%s412_s0 + $0xc] ss:$16 sm:%s50_s29]   ;;  %s265_s5 = smov 112   ;;  %v223_v12 = vld [vmem:[%s412_s0 + $0xb] ss:$16 sm:%s59_s3]   ;;  %s71_s8 = smov 3 }
   0x7   :  { %v53_v11 = vsel %vm6_vm0, %v222_v10, %v221_v9  ;;  %v224_v13 = vld [vmem:[%s412_s0 + $0xb] ss:$16 sm:%s62_s4]   ;;  %v225_v14 = vld [vmem:[%s412_s0 + $0xa] ss:$16 sm:%s71_s8]   ;;  %s74_s13 = smov 12  ;;  %s266_s14 = smov 96  }
   0x8   :  { %30 = vrot.lane.b32.xlu0 %v29_v8, %s265_s5  ;;  %v65_v15 = vsel %vm6_vm0, %v224_v13, %v223_v12  ;;  %v226_v16 = vld [vmem:[%s412_s0 + $0xa] ss:$16 sm:%s74_s13]   ;;  %s83_s17 = smov 3  ;;  %s86_s18 = smov 12  ;;  %vm116_vm10 = vcmask 523712   ;;  %vm128_vm11 = vcmask 458112  }
   0x9   :  { %54 = vrot.lane.b32.xlu1 %v53_v11, %s266_s14  ;;  %v77_v17 = vsel %vm6_vm0, %v226_v16, %v225_v14  ;;  %v227_v18 = vld [vmem:[%s412_s0 + $0x9] ss:$16 sm:%s83_s17]   ;;  %s95_s23 = smov 3  ;;  %s267_s24 = smov 88   ;;  %vm140_vm12 = vcmask 392512   ;;  %vm152_vm13 = vcmask 326912  }
   0xa   :  { %v228_v19 = vld [vmem:[%s412_s0 + $0x9] ss:$16 sm:%s86_s18]   ;;  %v229_v20 = vld [vmem:[%s412_s0 + $0x8] ss:$16 sm:%s95_s23]   ;;  %s98_s27 = smov 12  ;;  %s107_s30 = smov 3 }
   0xb   :  { %v89_v21 = vsel %vm6_vm0, %v228_v19, %v227_v18  ;;  %v230_v22 = vld [vmem:[%s412_s0 + $0x8] ss:$16 sm:%s98_s27]   ;;  %s110_s2 = smov 12  ;;  %s268_s3 = smov 80   ;;  %v231_v23 = vld [vmem:[%s412_s0 + $0x7] ss:$16 sm:%s107_s30]  }
   0xc   :  { %66 = vrot.lane.b32.xlu0 %v65_v15, %s267_s24  ;;  %s119_s6 = smov 3  ;;  %v101_v24 = vsel %vm6_vm0, %v230_v22, %v229_v20  ;;  %v232_v25 = vld [vmem:[%s412_s0 + $0x7] ss:$16 sm:%s110_s2]   ;;  %s122_s11 = smov 12  ;;  %vm164_vm14 = vcmask 261312   ;;  %vm176_vm15 = vcmask 195712  }
   0xd   :  { %78 = vrot.lane.b32.xlu1 %v77_v17, %s268_s3  ;;  %v233_v26 = vld [vmem:[%s412_s0 + $0x6] ss:$16 sm:%s119_s6]   ;;  %s269_s12 = smov 72   ;;  %s131_s15 = smov 3  ;;  %v113_v28 = vsel %vm6_vm0, %v232_v25, %v231_v23 }
   0xe   :  { %v234_v27 = vld [vmem:[%s412_s0 + $0x6] ss:$16 sm:%s122_s11]   ;;  %s134_s16 = smov 12  ;;  %v235_v29 = vld [vmem:[%s412_s0 + $0x5] ss:$16 sm:%s131_s15]   ;;  %s143_s19 = smov 3 }
   0xf   :  { %s270_s20 = smov 64   ;;  %v236_v30 = vld [vmem:[%s412_s0 + $0x5] ss:$16 sm:%s134_s16]   ;;  %s146_s23 = smov 12  ;;  %v125_v31 = vsel %vm6_vm0, %v234_v27, %v233_v26  ;;  %v237_v32 = vld [vmem:[%s412_s0 + $0x4] ss:$16 sm:%s143_s19]  }
  0x10   :  { %90 = vrot.lane.b32.xlu0 %v89_v21, %s269_s12  ;;  %s155_s26 = smov 3  ;;  %s158_s27 = smov 12  ;;  %v238_v33 = vld [vmem:[%s412_s0 + $0x4] ss:$16 sm:%s146_s23]   ;;  %v137_v34 = vsel %vm6_vm0, %v236_v30, %v235_v29 }
  0x11   :  { %102 = vrot.lane.b32.xlu1 %v101_v24, %s270_s20  ;;  %s271_s28 = smov 56   ;;  %s167_s2 = smov 3  ;;  %v239_v35 = vld [vmem:[%s412_s0 + $0x3] ss:$16 sm:%s155_s26]   ;;  %v149_v37 = vsel %vm6_vm0, %v238_v33, %v237_v32 }
  0x12   :  { %s170_s5 = smov 12  ;;  %s272_s6 = smov 48   ;;  %v240_v36 = vld [vmem:[%s412_s0 + $0x3] ss:$16 sm:%s158_s27]   ;;  %v241_v38 = vld [vmem:[%s412_s0 + $0x2] ss:$16 sm:%s167_s2]  }
  0x13   :  { %s179_s9 = smov 3  ;;  %v242_v39 = vld [vmem:[%s412_s0 + $0x2] ss:$16 sm:%s170_s5]   ;;  %s182_s14 = smov 12  ;;  %v161_v41 = vsel %vm6_vm0, %v240_v36, %v239_v35 }
  0x14   :  { %114 = vrot.lane.b32.xlu0 %v113_v28, %s271_s28  ;;  %s2_s15 = smov 3  ;;  %s273_s16 = smov 40   ;;  %v243_v42 = vld [vmem:[%s412_s0 + $0x1] ss:$16 sm:%s179_s9]   ;;  %v173_v46 = vsel %vm6_vm0, %v242_v39, %v241_v38 }
  0x15   :  { %126 = vrot.lane.b32.xlu1 %v125_v31, %s272_s6  ;;  %v3_v40 = vld [vmem:[%s412_s0] ss:$16 sm:%s2_s15]   ;;  %s4_s19 = smov 12  ;;  %s274_s24 = smov 32  }
  0x16   :  { %v5_v43 = vld [vmem:[%s412_s0] ss:$16 sm:%s4_s19]   ;;  %v244_v44 = vld [vmem:[%s412_s0 + $0x1] ss:$16 sm:%s182_s14]   ;;  %s275_s0 = smov 24   ;;  %s276_s27 = smov 16  }
  0x17   :  { %v7_v45 = vsel %vm6_vm0, %v5_v43, %v3_v40  ;;  %v185_v47 = vsel %vm6_vm0, %v244_v44, %v243_v42  ;;  %s277_s28 = smov 8   ;;  %vm188_vm0 = vcmask 130112  }
  0x18   :  { %138 = vrot.lane.b32.xlu0 %v137_v34, %s273_s16  ;;  %9 = vst.msk [vmem:[#allocation0] ss:$8 sm:$0xf] %vm8_vm1, %v7_v45  }
  0x19   :  { %150 = vrot.lane.b32.xlu1 %v149_v37, %s274_s24 }
  0x1c   :  { %162 = vrot.lane.b32.xlu0 %v161_v41, %s275_s0 }
  0x1d   :  { %174 = vrot.lane.b32.xlu1 %v173_v46, %s276_s27 }
  0x20   :  { %186 = vrot.lane.b32.xlu0 %v185_v47, %s277_s28 }
  0x76   :  { %v19_v48 = vpop.permute.xlu0 %18  }
  0x77   :  { %21 = vst.msk [vmem:[#allocation0] ss:$8 sm:$0xf] %vm20_vm2, %v19_v48   ;;  %v43_v49 = vpop.permute.xlu1 %42  }
  0x7a   :  { %v31_v50 = vpop.permute.xlu0 %30  }
  0x7b   :  { %33 = vst.msk [vmem:[#allocation0] ss:$8 sm:$0xf] %vm32_vm3, %v31_v50   ;;  %v55_v51 = vpop.permute.xlu1 %54  }
  0x7c   :  { %45 = vst.msk [vmem:[#allocation0] ss:$8 sm:$0xf] %vm44_vm4, %v43_v49  }
  0x7d   :  { %57 = vst.msk [vmem:[#allocation0] ss:$8 sm:$0xf] %vm56_vm5, %v55_v51  }
  0x7e   :  { %v67_v52 = vpop.permute.xlu0 %66  }
  0x7f   :  { %69 = vst.msk [vmem:[#allocation0] ss:$8 sm:$0xf] %vm68_vm6, %v67_v52   ;;  %v79_v53 = vpop.permute.xlu1 %78  }
  0x80   :  { %81 = vst.msk [vmem:[#allocation0] ss:$8 sm:$0xf] %vm80_vm7, %v79_v53  }
  0x82   :  { %v91_v54 = vpop.permute.xlu0 %90  }
  0x83   :  { %93 = vst.msk [vmem:[#allocation0] ss:$8 sm:$0xf] %vm92_vm8, %v91_v54   ;;  %v103_v55 = vpop.permute.xlu1 %102  }
  0x84   :  { %105 = vst.msk [vmem:[#allocation0] ss:$8 sm:$0xf] %vm104_vm9, %v103_v55  }
  0x86   :  { %v115_v56 = vpop.permute.xlu0 %114  }
  0x87   :  { %117 = vst.msk [vmem:[#allocation0] ss:$8 sm:$0xf] %vm116_vm10, %v115_v56   ;;  %v127_v57 = vpop.permute.xlu1 %126  }
  0x88   :  { %129 = vst.msk [vmem:[#allocation0] ss:$8 sm:$0xf] %vm128_vm11, %v127_v57  }
  0x8a   :  { %v139_v58 = vpop.permute.xlu0 %138  }
  0x8b   :  { %141 = vst.msk [vmem:[#allocation0] ss:$8 sm:$0xf] %vm140_vm12, %v139_v58   ;;  %v151_v59 = vpop.permute.xlu1 %150  }
  0x8c   :  { %153 = vst.msk [vmem:[#allocation0] ss:$8 sm:$0xf] %vm152_vm13, %v151_v59  }
  0x8e   :  { %v163_v60 = vpop.permute.xlu0 %162  }
  0x8f   :  { %165 = vst.msk [vmem:[#allocation0] ss:$8 sm:$0xf] %vm164_vm14, %v163_v60   ;;  %v175_v61 = vpop.permute.xlu1 %174  }
  0x90   :  { %177 = vst.msk [vmem:[#allocation0] ss:$8 sm:$0xf] %vm176_vm15, %v175_v61  }
  0x92   :  { %v187_v62 = vpop.permute.xlu0 %186  }
  0x93   :  { %189 = vst.msk [vmem:[#allocation0] ss:$8 sm:$0xf] %vm188_vm0, %v187_v62  }
  0x9a   :  { %v193_v63 = vld [vmem:[#allocation0] sm:$0x1]  ;;  %v197_v0 = vld [vmem:[#allocation0 + $0x8] sm:$0x1]  ;;  %v202_v1 = vld [vmem:[#allocation0 + $0x10] sm:$0x1] }
  0x9b   :  { %195 = vst [vmem:[%s413_s1] sm:$0x1] %v193_v63  ;;  %245 = vst [vmem:[%s413_s1 + $0x1] sm:$0x1] %v197_v0  ;;  %v208_v2 = vld [vmem:[#allocation0 + $0x18] sm:$0x1] }
  0x9c   :  { %246 = vst [vmem:[%s413_s1 + $0x2] sm:$0x1] %v202_v1  ;;  %247 = vst [vmem:[%s413_s1 + $0x3] sm:$0x1] %v208_v2 }

// kernel: up3d_forward.2
= control target key start
LH: loop header
LB: loop body
LE: loop exit
PB: predicated region body
PF: predicated region fallthrough
CT: control target
= control target key end

     0   :  { %12 = vsyncpa [#allocation4], 0  ;;  %s2015_s21 = smov 0   ;;  %s2017_s22 = smov 0   ;;  %s2145_s0 = inlined_call_operand.vmem [shape: f32[2,8,256], index: 0, kind: input, shape index: {}]   ;;  %s2146_s1 = inlined_call_operand.hbm [shape: f32[3,256,512], index: 1, kind: input, shape index: {}]   ;;  %s2147_s2 = inlined_call_operand.vmem [shape: f32[1,256], index: 2, kind: input, shape index: {}]   ;;  %s2148_s3 = inlined_call_operand.vmem [shape: f32[1,256], index: 3, kind: input, shape index: {}]   ;;  %s2149_s4 = inlined_call_operand.vmem [shape: f32[2,8,512], index: 4, kind: output, shape index: {0}]   ;;  %s2150_s5 = inlined_call_operand.vmem [shape: f32[2,1,512], index: 5, kind: output, shape index: {1}]   ;;  %s2151_s6 = inlined_call_operand.vmem [shape: f32[2,1,512], index: 6, kind: output, shape index: {2}]  }
   0x1   :  { %s2019_s23 = smov 0  }
   0x2 LB: > { %s1471_s2 = sadd.s32 4294967295, %s1973_s23   ;;  %s30_s3 = sadd.s32 1, %s1969_s22  ;;  %s1973_s23 = sphi %s2019_s23, %s18_s23   ;;  %s1969_s22 = sphi %s2017_s22, %s2163_s22   ;;  %s1965_s21 = sphi %s2015_s21, %s2162_s21  }
   0x3   : > { %p32_p0 = scmp.ge.s32.totalorder %s30_s3, 2  ;;  %p1473_p1 = scmp.ge.s32.totalorder %s1973_s23, 1 }
   0x4   : > { %p204_p2 = scmp.lt.s32.totalorder %s1973_s23, 3  ;;  %p2040_p4 = scmp.eq.s32.totalorder %s1471_s2, 0 }
   0x5   : > { %s2165_s3 = smov (%p32_p0, %s30_s3), 0  ;;  %s1975_s26 = smov [#allocation3]  }
   0x6   : > { %p2036_p3 = pnand %p1473_p1, %p204_p2  ;;  %s216_s27 = sshll.u32 %s1975_s26, 4  ;;  %s217_s27 = int_to_ptr.vmem [resolvable:$true] %s216_s27 }
   0x7   : > { %s2156_s25 = scalar_select %p2040_p4, 1, 0 }
   0x8   : > { %s2155_s24 = scalar_select %p2036_p3, 1, 0 }
   0x9   : > { %p1884_p5 = pneg %p2036_p3  ;;  %s1919_s7 = scalar_lea.hbm %s2146_s1, 49152 }
   0xa   : > { %p1920_p7 = scmp.ne.s32.totalorder %s2146_s1, %s1919_s7  ;;  %p1926_p11 = scmp.lt.u32.totalorder %s1919_s7, %s2146_s1 }
   0xb   : > { %p2048_p6 = pnand %p2040_p4, %p1884_p5 }
   0xd   : > { %p1921_p8 = pneg %p2048_p6 }
   0xf   : > { %p1922_p9 = pnand %p1921_p8, %p1920_p7 }
  0x11   : > { %p1923_p10 = pneg %p1922_p9 }
  0x13   : > { %p1928_p12 = pnand %p1926_p11, %p1923_p10 }
  0x15   : > { %1931 = shalt.err (!%p1928_p12)
}
  0x16   : > { %s1932_s12 = scalar_lea.vmem %s217_s27, 49152  ;;  %p1940_p2 = scmp.lt.s32.totalorder %s217_s27, %s217_s27 }
  0x17   : > { %p1933_p13 = scmp.ne.s32.totalorder %s217_s27, %s1932_s12  ;;  %p1941_p5 = scmp.lt.s32.totalorder %s1932_s12, %s1932_s12 }
  0x19   : > { %p1935_p0 = pnand %p1933_p13, %p1921_p8  ;;  %p1942_p4 = por %p1941_p5, %p1940_p2 }
  0x1b   : > { %p1936_p1 = pneg %p1935_p0 }
  0x1d   : > { %p1943_p3 = pnand %p1942_p4, %p1936_p1 }
  0x1f   : > { %1946 = shalt.err (!%p1943_p3)
}
  0x20   : > { %s1976_s13 = smov 512   ;;  %s1977_s14 = smov 32  }
  0x21   : > { %1887 = dma.hbm_to_vmem [thread:$0]  (!%p2048_p6), %s2146_s1, 49152, %s217_s27, [#allocation4], %s1976_s13, %s1976_s13, %s1977_s14  }
  0x22   : > { %p2158_p7 = scmp.ne.s32.totalorder %s2155_s24, 0 }
  0x23   : > { %p2159_p9 = scmp.ne.s32.totalorder (!%p2158_p7), %s2156_s25, 0 }
  0x24   : > { %246 = sbr.rel (%p2158_p7) target bundleno = 480 (0x1e0), region = 36 }
  0x2b   : > { %1960 = dma.done.wait (%p2159_p9), [#allocation4], 49152  }
  0x2c   : > { %1962 = vsyncadd (%p2159_p9), [#allocation4], 4294918144  ;;  %v310_v0 = vlaneseq  ;;  %v1978_v1 = vmov 0.0   ;;  %v467_v2 = vld [vmem:[#allocation3 + $0x408] sm:$0xff]  ;;  %v469_v4 = vld [vmem:[#allocation3 + $0x418] sm:$0xff]  ;;  %p288_p3 = scmp.lt.s32.totalorder %s1965_s21, 1 }
  0x2d   : > { %v471_v3 = vld [vmem:[#allocation3 + $0x428] sm:$0xff]  ;;  %v473_v6 = vld [vmem:[#allocation3 + $0x438] sm:$0xff]  ;;  %v466_v7 = vld [vmem:[#allocation3 + $0x400] sm:$0xff]  ;;  %vm598_vm1 = vcmask 1046528   ;;  %vm1028_vm2 = vcmask 1045504  }
  0x2e   : > { %vm312_vm0 = vcmp.lt.s32.totalorder %v310_v0, 256  ;;  %v1488_v5 = vpack.c.bf16 %v471_v3, %v467_v2  ;;  %v470_v8 = vld [vmem:[#allocation3 + $0x420] sm:$0xff]  ;;  %v1552_v9 = vpack.c.bf16 %v473_v6, %v469_v4  ;;  %v468_v11 = vld [vmem:[#allocation3 + $0x410] sm:$0xff]  ;;  %v475_v13 = vld [vmem:[#allocation3 + $0x448] sm:$0xff]  ;;  %s2167_s21 = smov (!%p288_p3, %s1965_s21), 1  ;;  %vm2098_vm3 = vcmp.lt.s32.totalorder %v310_v0, 512 }
  0x2f   : > { %314 = vst.msk [vmem:[#allocation2] ss:$8 sm:$0x3] %vm312_vm0, %v1978_v1  ;;  %329 = vst.msk [vmem:[#allocation2 + $0x11] ss:$8 sm:$0x3] %vm312_vm0, %v1978_v1  ;;  %v1490_v10 = vpack.c.bf16 %v470_v8, %v466_v7 }
  0x30   : > { %v472_v12 = vld [vmem:[#allocation3 + $0x430] sm:$0xff]  ;;  %1489 = vmatprep.subr.bf16.mxu0 %v1488_v5  ;;  %v479_v15 = vld [vmem:[#allocation3 + $0x468] sm:$0xff]  ;;  %v477_v16 = vld [vmem:[#allocation3 + $0x458] sm:$0xff]  ;;  %1553 = vmatprep.subr.bf16.mxu1 %v1552_v9  ;;  %s1486_s17 = sshll.u32 %s2167_s21, 4  ;;  %s1482_s2 = sshll.u32 %s2167_s21, 2 }
  0x31   : > { %v1554_v14 = vpack.c.bf16 %v472_v12, %v468_v11  ;;  %v481_v17 = vld [vmem:[#allocation3 + $0x478] sm:$0xff]  ;;  %1491 = vmatpush1.bf16.msra.mxu0 %v1490_v10  ;;  %v1492_v18 = vpack.c.bf16 %v479_v15, %v475_v13  ;;  %v474_v20 = vld [vmem:[#allocation3 + $0x440] sm:$0xff]  ;;  %v476_v22 = vld [vmem:[#allocation3 + $0x450] sm:$0xff]  ;;  %s292_s20 = scalar_lea.vmem %s2145_s0, %s1486_s17  ;;  %s2095_s26 = scalar_lea.vmem %s2150_s5, %s1482_s2 }
  0x32   : > { %v1556_v19 = vpack.c.bf16 %v481_v17, %v477_v16  ;;  %v478_v21 = vld [vmem:[#allocation3 + $0x460] sm:$0xff]  ;;  %v480_v24 = vld [vmem:[#allocation3 + $0x470] sm:$0xff]  ;;  %v483_v25 = vld [vmem:[#allocation3 + $0x488] sm:$0xff]  ;;  %1193 = vst.msk [vmem:[%s2095_s26] sm:$0xf] %vm2098_vm3, %v1978_v1  ;;  %s2109_s29 = scalar_lea.vmem %s2151_s6, %s1482_s2  ;;  %s1487_s30 = sshll.u32 %s2167_s21, 5 }
  0x33   : > { %1555 = vmatpush1.bf16.msra.mxu1 %v1554_v14  ;;  %v1494_v23 = vpack.c.bf16 %v478_v21, %v474_v20  ;;  %v487_v26 = vld [vmem:[#allocation3 + $0x4a8] sm:$0xff]  ;;  %1493 = vmatprep.subr.bf16.mxu0 %v1492_v18  ;;  %v1558_v27 = vpack.c.bf16 %v480_v24, %v476_v22  ;;  %v485_v29 = vld [vmem:[#allocation3 + $0x498] sm:$0xff]  ;;  %v482_v31 = vld [vmem:[#allocation3 + $0x480] sm:$0xff]  ;;  %1194 = vst.msk [vmem:[%s2109_s29] sm:$0xf] %vm2098_vm3, %v1978_v1  ;;  %s301_s9 = scalar_lea.vmem %s2149_s4, %s1487_s30 }
  0x34   : > { %1557 = vmatprep.subr.bf16.mxu1 %v1556_v19  ;;  %v1496_v28 = vpack.c.bf16 %v487_v26, %v483_v25  ;;  %v489_v30 = vld [vmem:[#allocation3 + $0x4b8] sm:$0xff]  ;;  %v486_v33 = vld [vmem:[#allocation3 + $0x4a0] sm:$0xff]  ;;  %v484_v34 = vld [vmem:[#allocation3 + $0x490] sm:$0xff] }
  0x35   : > { %v1560_v32 = vpack.c.bf16 %v489_v30, %v485_v29  ;;  %v488_v35 = vld [vmem:[#allocation3 + $0x4b0] sm:$0xff]  ;;  %1495 = vmatpush1.bf16.msra.mxu0 %v1494_v23  ;;  %v1498_v36 = vpack.c.bf16 %v486_v33, %v482_v31  ;;  %v491_v37 = vld [vmem:[#allocation3 + $0x4c8] sm:$0xff]  ;;  %v493_v39 = vld [vmem:[#allocation3 + $0x4d8] sm:$0xff] }
  0x36   : > { %v495_v38 = vld [vmem:[#allocation3 + $0x4e8] sm:$0xff]  ;;  %1497 = vmatprep.subr.bf16.mxu0 %v1496_v28  ;;  %v1562_v40 = vpack.c.bf16 %v488_v35, %v484_v34  ;;  %v497_v42 = vld [vmem:[#allocation3 + $0x4f8] sm:$0xff]  ;;  %v490_v43 = vld [vmem:[#allocation3 + $0x4c0] sm:$0xff] }
  0x37   : > { %1559 = vmatpush1.bf16.msra.mxu1 %v1558_v27  ;;  %v1500_v41 = vpack.c.bf16 %v495_v38, %v491_v37  ;;  %v494_v44 = vld [vmem:[#allocation3 + $0x4e0] sm:$0xff]  ;;  %v1564_v45 = vpack.c.bf16 %v497_v42, %v493_v39  ;;  %v492_v46 = vld [vmem:[#allocation3 + $0x4d0] sm:$0xff]  ;;  %v499_v48 = vld [vmem:[#allocation3 + $0x508] sm:$0xff] }
  0x38   : > { %1561 = vmatprep.subr.bf16.mxu1 %v1560_v32  ;;  %v496_v47 = vld [vmem:[#allocation3 + $0x4f0] sm:$0xff]  ;;  %v503_v49 = vld [vmem:[#allocation3 + $0x528] sm:$0xff]  ;;  %v501_v50 = vld [vmem:[#allocation3 + $0x518] sm:$0xff]  ;;  %v1502_v52 = vpack.c.bf16 %v494_v44, %v490_v43 }
  0x39   : > { %v505_v51 = vld [vmem:[#allocation3 + $0x538] sm:$0xff]  ;;  %1499 = vmatpush1.bf16.msra.mxu0 %v1498_v36  ;;  %v1566_v53 = vpack.c.bf16 %v496_v47, %v492_v46  ;;  %v1504_v54 = vpack.c.bf16 %v503_v49, %v499_v48  ;;  %v498_v55 = vld [vmem:[#allocation3 + $0x500] sm:$0xff]  ;;  %v500_v57 = vld [vmem:[#allocation3 + $0x510] sm:$0xff] }
  0x3a   : > { %1501 = vmatprep.subr.bf16.mxu0 %v1500_v41  ;;  %v502_v56 = vld [vmem:[#allocation3 + $0x520] sm:$0xff]  ;;  %v1568_v58 = vpack.c.bf16 %v505_v51, %v501_v50  ;;  %v504_v59 = vld [vmem:[#allocation3 + $0x530] sm:$0xff]  ;;  %v507_v60 = vld [vmem:[#allocation3 + $0x548] sm:$0xff] }
  0x3b   : > { %1563 = vmatpush1.bf16.msra.mxu1 %v1562_v40  ;;  %v511_v61 = vld [vmem:[#allocation3 + $0x568] sm:$0xff]  ;;  %v509_v62 = vld [vmem:[#allocation3 + $0x558] sm:$0xff]  ;;  %v1506_v2 = vpack.c.bf16 %v502_v56, %v498_v55  ;;  %v1570_v3 = vpack.c.bf16 %v504_v59, %v500_v57  ;;  %v506_v5 = vld [vmem:[#allocation3 + $0x540] sm:$0xff] }
  0x3c   : > { %1565 = vmatprep.subr.bf16.mxu1 %v1564_v45  ;;  %v513_v63 = vld [vmem:[#allocation3 + $0x578] sm:$0xff]  ;;  %v1508_v4 = vpack.c.bf16 %v511_v61, %v507_v60  ;;  %v510_v6 = vld [vmem:[#allocation3 + $0x560] sm:$0xff]  ;;  %v508_v7 = vld [vmem:[#allocation3 + $0x550] sm:$0xff] }
  0x3d   : > { %1503 = vmatpush1.bf16.msra.mxu0 %v1502_v52  ;;  %v1572_v8 = vpack.c.bf16 %v513_v63, %v509_v62  ;;  %v512_v9 = vld [vmem:[#allocation3 + $0x570] sm:$0xff]  ;;  %v515_v10 = vld [vmem:[#allocation3 + $0x588] sm:$0xff]  ;;  %v517_v12 = vld [vmem:[#allocation3 + $0x598] sm:$0xff]  ;;  %v1510_v14 = vpack.c.bf16 %v510_v6, %v506_v5 }
  0x3e   : > { %1505 = vmatprep.subr.bf16.mxu0 %v1504_v54  ;;  %v519_v11 = vld [vmem:[#allocation3 + $0x5a8] sm:$0xff]  ;;  %v521_v13 = vld [vmem:[#allocation3 + $0x5b8] sm:$0xff]  ;;  %v1574_v15 = vpack.c.bf16 %v512_v9, %v508_v7  ;;  %v514_v17 = vld [vmem:[#allocation3 + $0x580] sm:$0xff] }
  0x3f   : > { %1567 = vmatpush1.bf16.msra.mxu1 %v1566_v53  ;;  %v1512_v16 = vpack.c.bf16 %v519_v11, %v515_v10  ;;  %v518_v18 = vld [vmem:[#allocation3 + $0x5a0] sm:$0xff]  ;;  %v516_v19 = vld [vmem:[#allocation3 + $0x590] sm:$0xff]  ;;  %v1576_v20 = vpack.c.bf16 %v521_v13, %v517_v12  ;;  %v523_v22 = vld [vmem:[#allocation3 + $0x5c8] sm:$0xff] }
  0x40   : > { %1569 = vmatprep.subr.bf16.mxu1 %v1568_v58  ;;  %v520_v21 = vld [vmem:[#allocation3 + $0x5b0] sm:$0xff]  ;;  %v527_v23 = vld [vmem:[#allocation3 + $0x5e8] sm:$0xff]  ;;  %v525_v24 = vld [vmem:[#allocation3 + $0x5d8] sm:$0xff]  ;;  %v1514_v26 = vpack.c.bf16 %v518_v18, %v514_v17 }
  0x41   : > { %1507 = vmatpush1.bf16.msra.mxu0 %v1506_v2  ;;  %v529_v25 = vld [vmem:[#allocation3 + $0x5f8] sm:$0xff]  ;;  %v1578_v27 = vpack.c.bf16 %v520_v21, %v516_v19  ;;  %v1516_v28 = vpack.c.bf16 %v527_v23, %v523_v22  ;;  %v522_v29 = vld [vmem:[#allocation3 + $0x5c0] sm:$0xff]  ;;  %v524_v31 = vld [vmem:[#allocation3 + $0x5d0] sm:$0xff] }
  0x42   : > { %1509 = vmatprep.subr.bf16.mxu0 %v1508_v4  ;;  %v526_v30 = vld [vmem:[#allocation3 + $0x5e0] sm:$0xff]  ;;  %v1580_v32 = vpack.c.bf16 %v529_v25, %v525_v24  ;;  %v528_v33 = vld [vmem:[#allocation3 + $0x5f0] sm:$0xff]  ;;  %v531_v34 = vld [vmem:[#allocation3 + $0x608] sm:$0xff] }
  0x43   : > { %1571 = vmatpush1.bf16.msra.mxu1 %v1570_v3  ;;  %v535_v35 = vld [vmem:[#allocation3 + $0x628] sm:$0xff]  ;;  %v533_v36 = vld [vmem:[#allocation3 + $0x618] sm:$0xff]  ;;  %v1518_v38 = vpack.c.bf16 %v526_v30, %v522_v29  ;;  %v1582_v39 = vpack.c.bf16 %v528_v33, %v524_v31  ;;  %v530_v41 = vld [vmem:[#allocation3 + $0x600] sm:$0xff] }
  0x44   : > { %1573 = vmatprep.subr.bf16.mxu1 %v1572_v8  ;;  %v537_v37 = vld [vmem:[#allocation3 + $0x638] sm:$0xff]  ;;  %v1520_v40 = vpack.c.bf16 %v535_v35, %v531_v34  ;;  %v534_v42 = vld [vmem:[#allocation3 + $0x620] sm:$0xff]  ;;  %v532_v43 = vld [vmem:[#allocation3 + $0x610] sm:$0xff] }
  0x45   : > { %1511 = vmatpush1.bf16.msra.mxu0 %v1510_v14  ;;  %v1584_v44 = vpack.c.bf16 %v537_v37, %v533_v36  ;;  %v536_v45 = vld [vmem:[#allocation3 + $0x630] sm:$0xff]  ;;  %v539_v46 = vld [vmem:[#allocation3 + $0x648] sm:$0xff]  ;;  %v541_v48 = vld [vmem:[#allocation3 + $0x658] sm:$0xff]  ;;  %v1522_v50 = vpack.c.bf16 %v534_v42, %v530_v41 }
  0x46   : > { %1513 = vmatprep.subr.bf16.mxu0 %v1512_v16  ;;  %v543_v47 = vld [vmem:[#allocation3 + $0x668] sm:$0xff]  ;;  %v545_v49 = vld [vmem:[#allocation3 + $0x678] sm:$0xff]  ;;  %v1586_v51 = vpack.c.bf16 %v536_v45, %v532_v43  ;;  %v538_v53 = vld [vmem:[#allocation3 + $0x640] sm:$0xff] }
  0x47   : > { %1575 = vmatpush1.bf16.msra.mxu1 %v1574_v15  ;;  %v1524_v52 = vpack.c.bf16 %v543_v47, %v539_v46  ;;  %v542_v54 = vld [vmem:[#allocation3 + $0x660] sm:$0xff]  ;;  %v540_v55 = vld [vmem:[#allocation3 + $0x650] sm:$0xff]  ;;  %v1588_v56 = vpack.c.bf16 %v545_v49, %v541_v48  ;;  %v547_v58 = vld [vmem:[#allocation3 + $0x688] sm:$0xff] }
  0x48   : > { %1577 = vmatprep.subr.bf16.mxu1 %v1576_v20  ;;  %v544_v57 = vld [vmem:[#allocation3 + $0x670] sm:$0xff]  ;;  %v551_v59 = vld [vmem:[#allocation3 + $0x6a8] sm:$0xff]  ;;  %v549_v60 = vld [vmem:[#allocation3 + $0x698] sm:$0xff]  ;;  %v1526_v62 = vpack.c.bf16 %v542_v54, %v538_v53 }
  0x49   : > { %1515 = vmatpush1.bf16.msra.mxu0 %v1514_v26  ;;  %v553_v61 = vld [vmem:[#allocation3 + $0x6b8] sm:$0xff]  ;;  %v1590_v63 = vpack.c.bf16 %v544_v57, %v540_v55  ;;  %v1528_v2 = vpack.c.bf16 %v551_v59, %v547_v58  ;;  %v546_v3 = vld [vmem:[#allocation3 + $0x680] sm:$0xff]  ;;  %v548_v5 = vld [vmem:[#allocation3 + $0x690] sm:$0xff] }
  0x4a   : > { %1517 = vmatprep.subr.bf16.mxu0 %v1516_v28  ;;  %v550_v4 = vld [vmem:[#allocation3 + $0x6a0] sm:$0xff]  ;;  %v1592_v6 = vpack.c.bf16 %v553_v61, %v549_v60  ;;  %v552_v7 = vld [vmem:[#allocation3 + $0x6b0] sm:$0xff]  ;;  %v555_v8 = vld [vmem:[#allocation3 + $0x6c8] sm:$0xff] }
  0x4b   : > { %1579 = vmatpush1.bf16.msra.mxu1 %v1578_v27  ;;  %v559_v9 = vld [vmem:[#allocation3 + $0x6e8] sm:$0xff]  ;;  %v557_v10 = vld [vmem:[#allocation3 + $0x6d8] sm:$0xff]  ;;  %v1530_v12 = vpack.c.bf16 %v550_v4, %v546_v3  ;;  %v554_v13 = vld [vmem:[#allocation3 + $0x6c0] sm:$0xff]  ;;  %v1594_v14 = vpack.c.bf16 %v552_v7, %v548_v5 }
  0x4c   : > { %1581 = vmatprep.subr.bf16.mxu1 %v1580_v32  ;;  %v561_v11 = vld [vmem:[#allocation3 + $0x6f8] sm:$0xff]  ;;  %v1532_v15 = vpack.c.bf16 %v559_v9, %v555_v8  ;;  %v558_v16 = vld [vmem:[#allocation3 + $0x6e0] sm:$0xff]  ;;  %v556_v17 = vld [vmem:[#allocation3 + $0x6d0] sm:$0xff] }
  0x4d   : > { %1519 = vmatpush1.bf16.msra.mxu0 %v1518_v38  ;;  %v560_v18 = vld [vmem:[#allocation3 + $0x6f0] sm:$0xff]  ;;  %v1596_v19 = vpack.c.bf16 %v561_v11, %v557_v10  ;;  %v563_v20 = vld [vmem:[#allocation3 + $0x708] sm:$0xff]  ;;  %v565_v23 = vld [vmem:[#allocation3 + $0x718] sm:$0xff]  ;;  %v1534_v26 = vpack.c.bf16 %v558_v16, %v554_v13 }
  0x4e   : > { %1521 = vmatprep.subr.bf16.mxu0 %v1520_v40  ;;  %v567_v21 = vld [vmem:[#allocation3 + $0x728] sm:$0xff]  ;;  %v569_v24 = vld [vmem:[#allocation3 + $0x738] sm:$0xff]  ;;  %v316_v27 = vld [vmem:[%s292_s20] sm:$0xff]  ;;  %v1598_v28 = vpack.c.bf16 %v560_v18, %v556_v17 }
  0x4f   : > { %1583 = vmatpush1.bf16.msra.mxu1 %v1582_v39  ;;  %v317_v22 = vld [vmem:[%s292_s20 + $0x8] sm:$0xff]  ;;  %v1536_v29 = vpack.c.bf16 %v567_v21, %v563_v20  ;;  %v562_v30 = vld [vmem:[#allocation3 + $0x700] sm:$0xff]  ;;  %v564_v32 = vld [vmem:[#allocation3 + $0x710] sm:$0xff]  ;;  %v320_v33 = vrot.slane %v316_v27, 7  ;;  %v1600_v34 = vpack.c.bf16 %v569_v24, %v565_v23 }
  0x50   : > { %1585 = vmatprep.subr.bf16.mxu1 %v1584_v44  ;;  %v321_v25 = vrot.slane %v317_v22, 7  ;;  %v566_v31 = vld [vmem:[#allocation3 + $0x720] sm:$0xff]  ;;  %v568_v35 = vld [vmem:[#allocation3 + $0x730] sm:$0xff]  ;;  %v571_v36 = vld [vmem:[#allocation3 + $0x748] sm:$0xff] }
  0x51   : > { %1523 = vmatpush1.bf16.msra.mxu0 %v1522_v50  ;;  %v575_v37 = vld [vmem:[#allocation3 + $0x768] sm:$0xff]  ;;  %v573_v38 = vld [vmem:[#allocation3 + $0x758] sm:$0xff]  ;;  %324 = vst [vmem:[#allocation2] sm:$0xfe] %v320_v33  ;;  %326 = vst [vmem:[#allocation2 + $0x10] sm:$0x1] %v320_v33  ;;  %v1538_v40 = vpack.c.bf16 %v566_v31, %v562_v30  ;;  %v1602_v41 = vpack.c.bf16 %v568_v35, %v564_v32 }
  0x52   : > { %1525 = vmatprep.subr.bf16.mxu0 %v1524_v52  ;;  %325 = vst [vmem:[#allocation2 + $0x8] sm:$0xfe] %v321_v25  ;;  %327 = vst [vmem:[#allocation2 + $0x18] sm:$0x1] %v321_v25  ;;  %v577_v39 = vld [vmem:[#allocation3 + $0x778] sm:$0xff]  ;;  %v1540_v42 = vpack.c.bf16 %v575_v37, %v571_v36  ;;  %v570_v43 = vld [vmem:[#allocation3 + $0x740] sm:$0xff] }
  0x53   : > { %1587 = vmatpush1.bf16.msra.mxu1 %v1586_v51  ;;  %v574_v44 = vld [vmem:[#allocation3 + $0x760] sm:$0xff]  ;;  %v572_v45 = vld [vmem:[#allocation3 + $0x750] sm:$0xff]  ;;  %v1604_v46 = vpack.c.bf16 %v577_v39, %v573_v38  ;;  %v579_v48 = vld [vmem:[#allocation3 + $0x788] sm:$0xff] }
  0x54   : > { %1589 = vmatprep.subr.bf16.mxu1 %v1588_v56  ;;  %v576_v47 = vld [vmem:[#allocation3 + $0x770] sm:$0xff]  ;;  %v583_v49 = vld [vmem:[#allocation3 + $0x7a8] sm:$0xff]  ;;  %v581_v50 = vld [vmem:[#allocation3 + $0x798] sm:$0xff]  ;;  %v1542_v52 = vpack.c.bf16 %v574_v44, %v570_v43 }
  0x55   : > { %1527 = vmatpush1.bf16.msra.mxu0 %v1526_v62  ;;  %v585_v51 = vld [vmem:[#allocation3 + $0x7b8] sm:$0xff]  ;;  %v1606_v55 = vpack.c.bf16 %v576_v47, %v572_v45  ;;  %v1544_v56 = vpack.c.bf16 %v583_v49, %v579_v48  ;;  %v578_v57 = vld [vmem:[#allocation3 + $0x780] sm:$0xff]  ;;  %v580_v59 = vld [vmem:[#allocation3 + $0x790] sm:$0xff] }
  0x56   : > { %1529 = vmatprep.subr.bf16.mxu0 %v1528_v2  ;;  %v582_v58 = vld [vmem:[#allocation3 + $0x7a0] sm:$0xff]  ;;  %v1608_v62 = vpack.c.bf16 %v585_v51, %v581_v50  ;;  %v587_v2 = vld [vmem:[#allocation3 + $0x7c8] sm:$0xff]  ;;  %v589_v4 = vld [vmem:[#allocation3 + $0x7d8] sm:$0xff] }
  0x57   : > { %1591 = vmatpush1.bf16.msra.mxu1 %v1590_v63  ;;  %v584_v63 = vld [vmem:[#allocation3 + $0x7b0] sm:$0xff]  ;;  %v591_v3 = vld [vmem:[#allocation3 + $0x7e8] sm:$0xff]  ;;  %v593_v5 = vld [vmem:[#allocation3 + $0x7f8] sm:$0xff]  ;;  %v1546_v7 = vpack.c.bf16 %v582_v58, %v578_v57 }
  0x58   : > { %1593 = vmatprep.subr.bf16.mxu1 %v1592_v6  ;;  %v586_v8 = vld [vmem:[#allocation3 + $0x7c0] sm:$0xff]  ;;  %v1610_v10 = vpack.c.bf16 %v584_v63, %v580_v59  ;;  %v1548_v11 = vpack.c.bf16 %v591_v3, %v587_v2  ;;  %v592_v16 = vld [vmem:[#allocation3 + $0x7f0] sm:$0xff]  ;;  %v334_v17 = vld [vmem:[#allocation3 + $0x8] sm:$0xff] }
  0x59   : > { %1531 = vmatpush1.bf16.msra.mxu0 %v1530_v12  ;;  %v462_v53 = vld [vmem:[#allocation2 + $0x8] sm:$0xfe]  ;;  %v464_v54 = vld [vmem:[#allocation2 + $0x18] sm:$0x1]  ;;  %v590_v9 = vld [vmem:[#allocation3 + $0x7e0] sm:$0xff] }
  0x5a   : > { %1533 = vmatprep.subr.bf16.mxu0 %v1532_v15  ;;  %v602_v60 = vrot.slane %v462_v53, 1  ;;  %v603_v61 = vrot.slane %v464_v54, 1  ;;  %v588_v12 = vld [vmem:[#allocation3 + $0x7d0] sm:$0xff]  ;;  %v461_v13 = vld [vmem:[#allocation2] sm:$0xfe]  ;;  %v1612_v15 = vpack.c.bf16 %v593_v5, %v589_v4  ;;  %v338_v18 = vld [vmem:[#allocation3 + $0x28] sm:$0xff]  ;;  %v1550_v21 = vpack.c.bf16 %v590_v9, %v586_v8 }
  0x5b   : > { %1595 = vmatpush1.bf16.msra.mxu1 %v1594_v14  ;;  %v463_v14 = vld [vmem:[#allocation2 + $0x10] sm:$0x1]  ;;  %v340_v20 = vld [vmem:[#allocation3 + $0x38] sm:$0xff]  ;;  %v599_v22 = vrot.slane %v461_v13, 1  ;;  %v1614_v24 = vpack.c.bf16 %v592_v16, %v588_v12  ;;  %v1616_v25 = vpack.c.bf16 %v338_v18, %v334_v17  ;;  %v337_v27 = vld [vmem:[#allocation3 + $0x20] sm:$0xff] }
  0x5c   : > { %1597 = vmatprep.subr.bf16.mxu1 %v1596_v19  ;;  %v604_v6 = vsel %vm598_vm1, %v602_v60, %v603_v61  ;;  %v336_v19 = vld [vmem:[#allocation3 + $0x18] sm:$0xff]  ;;  %v600_v23 = vrot.slane %v463_v14, 1  ;;  %v339_v30 = vld [vmem:[#allocation3 + $0x30] sm:$0xff]  ;;  %v342_v31 = vld [vmem:[#allocation3 + $0x48] sm:$0xff] }
  0x5d   : > { %1535 = vmatpush1.bf16.msra.mxu0 %v1534_v26  ;;  %671 = vmatprep.mubr.f32.mxu0 %v604_v6  ;;  %v333_v26 = vld [vmem:[#allocation3] sm:$0xff]  ;;  %v346_v32 = vld [vmem:[#allocation3 + $0x68] sm:$0xff]  ;;  %v344_v33 = vld [vmem:[#allocation3 + $0x58] sm:$0xff] }
  0x5e   : > { %1537 = vmatprep.subr.bf16.mxu0 %v1536_v29  ;;  %742 = vmatprep.mubr.f32.mxu1 %v604_v6  ;;  %v1680_v29 = vpack.c.bf16 %v340_v20, %v336_v19  ;;  %v601_v35 = vsel %vm598_vm1, %v599_v22, %v600_v23  ;;  %v1618_v36 = vpack.c.bf16 %v337_v27, %v333_v26  ;;  %v341_v39 = vld [vmem:[#allocation3 + $0x40] sm:$0xff]  ;;  %v347_v43 = vld [vmem:[#allocation3 + $0x70] sm:$0xff]  ;;  %v350_v44 = vld [vmem:[#allocation3 + $0x88] sm:$0xff] }
  0x5f   : > { %1599 = vmatpush1.bf16.msra.mxu1 %v1598_v28  ;;  %v335_v28 = vld [vmem:[#allocation3 + $0x10] sm:$0xff]  ;;  %v1620_v38 = vpack.c.bf16 %v346_v32, %v342_v31  ;;  %v354_v45 = vld [vmem:[#allocation3 + $0xa8] sm:$0xff]  ;;  %v356_v47 = vld [vmem:[#allocation3 + $0xb8] sm:$0xff] }
  0x60   : > { %1601 = vmatprep.subr.bf16.mxu1 %v1600_v34  ;;  %v348_v34 = vld [vmem:[#allocation3 + $0x78] sm:$0xff]  ;;  %v1682_v37 = vpack.c.bf16 %v339_v30, %v335_v28  ;;  %v1624_v50 = vpack.c.bf16 %v354_v45, %v350_v44  ;;  %v349_v51 = vld [vmem:[#allocation3 + $0x80] sm:$0xff]  ;;  %v351_v53 = vld [vmem:[#allocation3 + $0x90] sm:$0xff] }
  0x61   : > { %1539 = vmatpush1.bf16.msra.mxu0 %v1538_v40  ;;  %v345_v40 = vld [vmem:[#allocation3 + $0x60] sm:$0xff]  ;;  %v362_v57 = vld [vmem:[#allocation3 + $0xe8] sm:$0xff]  ;;  %v360_v58 = vld [vmem:[#allocation3 + $0xd8] sm:$0xff] }
  0x62   : > { %1541 = vmatprep.subr.bf16.mxu0 %v1540_v42  ;;  %v1684_v42 = vpack.c.bf16 %v348_v34, %v344_v33  ;;  %v1622_v48 = vpack.c.bf16 %v345_v40, %v341_v39  ;;  %v364_v59 = vld [vmem:[#allocation3 + $0xf8] sm:$0xff]  ;;  %v357_v63 = vld [vmem:[#allocation3 + $0xc0] sm:$0xff]  ;;  %v359_v3 = vld [vmem:[#allocation3 + $0xd0] sm:$0xff] }
  0x63   : > { %1603 = vmatpush1.bf16.msra.mxu1 %v1602_v41  ;;  %v343_v41 = vld [vmem:[#allocation3 + $0x50] sm:$0xff]  ;;  %v361_v2 = vld [vmem:[#allocation3 + $0xe0] sm:$0xff]  ;;  %v1692_v4 = vpack.c.bf16 %v364_v59, %v360_v58  ;;  %v366_v6 = vld [vmem:[#allocation3 + $0x108] sm:$0xff] }
  0x64   : > { %1605 = vmatprep.subr.bf16.mxu1 %v1604_v46  ;;  %v352_v46 = vld [vmem:[#allocation3 + $0x98] sm:$0xff]  ;;  %v1686_v49 = vpack.c.bf16 %v347_v43, %v343_v41  ;;  %v363_v5 = vld [vmem:[#allocation3 + $0xf0] sm:$0xff]  ;;  %v365_v13 = vld [vmem:[#allocation3 + $0x100] sm:$0xff] }
  0x65   : > { %1543 = vmatpush1.bf16.msra.mxu0 %v1542_v52  ;;  %v353_v52 = vld [vmem:[#allocation3 + $0xa0] sm:$0xff]  ;;  %v1688_v54 = vpack.c.bf16 %v356_v47, %v352_v46  ;;  %v368_v8 = vld [vmem:[#allocation3 + $0x118] sm:$0xff]  ;;  %v371_v17 = vld [vmem:[#allocation3 + $0x130] sm:$0xff] }
  0x66   : > { %1545 = vmatprep.subr.bf16.mxu0 %v1544_v56  ;;  %v358_v56 = vld [vmem:[#allocation3 + $0xc8] sm:$0xff]  ;;  %v1626_v60 = vpack.c.bf16 %v353_v52, %v349_v51  ;;  %v372_v9 = vld [vmem:[#allocation3 + $0x138] sm:$0xff]  ;;  %v369_v14 = vld [vmem:[#allocation3 + $0x120] sm:$0xff] }
  0x67   : > { %1607 = vmatpush1.bf16.msra.mxu1 %v1606_v55  ;;  %v355_v55 = vld [vmem:[#allocation3 + $0xb0] sm:$0xff]  ;;  %v1696_v16 = vpack.c.bf16 %v372_v9, %v368_v8  ;;  %v374_v18 = vld [vmem:[#allocation3 + $0x148] sm:$0xff]  ;;  %v376_v20 = vld [vmem:[#allocation3 + $0x158] sm:$0xff]  ;;  %v1634_v22 = vpack.c.bf16 %v369_v14, %v365_v13 }
  0x68   : > { %1609 = vmatprep.subr.bf16.mxu1 %v1608_v62  ;;  %v1690_v61 = vpack.c.bf16 %v355_v55, %v351_v53  ;;  %v1628_v62 = vpack.c.bf16 %v362_v57, %v358_v56  ;;  %v378_v19 = vld [vmem:[#allocation3 + $0x168] sm:$0xff]  ;;  %v377_v26 = vld [vmem:[#allocation3 + $0x160] sm:$0xff]  ;;  %v375_v27 = vld [vmem:[#allocation3 + $0x150] sm:$0xff] }
  0x69   : > { %1547 = vmatpush1.bf16.msra.mxu0 %v1546_v7  ;;  %v370_v7 = vld [vmem:[#allocation3 + $0x128] sm:$0xff]  ;;  %v384_v32 = vld [vmem:[#allocation3 + $0x198] sm:$0xff]  ;;  %v383_v39 = vld [vmem:[#allocation3 + $0x190] sm:$0xff] }
  0x6a   : > { %1549 = vmatprep.subr.bf16.mxu0 %v1548_v11  ;;  %v1694_v11 = vpack.c.bf16 %v363_v5, %v359_v3  ;;  %v1632_v12 = vpack.c.bf16 %v370_v7, %v366_v6  ;;  %v382_v30 = vld [vmem:[#allocation3 + $0x188] sm:$0xff]  ;;  %v388_v33 = vld [vmem:[#allocation3 + $0x1b8] sm:$0xff]  ;;  %v387_v41 = vld [vmem:[#allocation3 + $0x1b0] sm:$0xff] }
  0x6b   : > { %1611 = vmatpush1.bf16.msra.mxu1 %v1610_v10  ;;  %v1630_v10 = vpack.c.bf16 %v361_v2, %v357_v63  ;;  %v386_v31 = vld [vmem:[#allocation3 + $0x1a8] sm:$0xff]  ;;  %v1704_v40 = vpack.c.bf16 %v388_v33, %v384_v32  ;;  %v392_v44 = vld [vmem:[#allocation3 + $0x1d8] sm:$0xff]  ;;  %v393_v51 = vld [vmem:[#allocation3 + $0x1e0] sm:$0xff] }
  0x6c   : > { %1613 = vmatprep.subr.bf16.mxu1 %v1612_v15  ;;  %v367_v15 = vld [vmem:[#allocation3 + $0x110] sm:$0xff]  ;;  %v394_v43 = vld [vmem:[#allocation3 + $0x1e8] sm:$0xff]  ;;  %v396_v45 = vld [vmem:[#allocation3 + $0x1f8] sm:$0xff] }
  0x6d   : > { %1551 = vmatpush1.bf16.msra.mxu0 %v1550_v21  ;;  %v380_v21 = vld [vmem:[#allocation3 + $0x178] sm:$0xff]  ;;  %v1698_v23 = vpack.c.bf16 %v371_v17, %v367_v15  ;;  %v332_v46 = vld [vmem:[#allocation2 + $0x8] sm:$0xff]  ;;  %v391_v52 = vld [vmem:[#allocation3 + $0x1d0] sm:$0xff]  ;;  %v1708_v53 = vpack.c.bf16 %v396_v45, %v392_v44 }
  0x6e   : > { %1617 = vmatprep.subr.bf16.mxu0 %v1616_v25  ;;  %v373_v25 = vld [vmem:[#allocation3 + $0x140] sm:$0xff]  ;;  %v1700_v28 = vpack.c.bf16 %v380_v21, %v376_v20  ;;  %v398_v55 = vld [vmem:[#allocation3 + $0x208] sm:$0xff]  ;;  %v400_v57 = vld [vmem:[#allocation3 + $0x218] sm:$0xff] }
  0x6f   : > { %1615 = vmatpush1.bf16.msra.mxu1 %v1614_v24  ;;  %v1636_v24 = vpack.c.bf16 %v378_v19, %v374_v18  ;;  %v1638_v34 = vpack.c.bf16 %v377_v26, %v373_v25  ;;  %v402_v56 = vld [vmem:[#allocation3 + $0x228] sm:$0xff]  ;;  %v404_v58 = vld [vmem:[#allocation3 + $0x238] sm:$0xff]  ;;  %v401_v63 = vld [vmem:[#allocation3 + $0x220] sm:$0xff] }
  0x70   : > { %1681 = vmatprep.subr.bf16.mxu1 %v1680_v29  ;;  %672 = vmatmul.mubr.f32.vlgmr.msra.gmra.mrb[0].mxu0 %v601_v35  ;;  %v379_v29 = vld [vmem:[#allocation3 + $0x170] sm:$0xff]  ;;  %v1712_v3 = vpack.c.bf16 %v404_v58, %v400_v57  ;;  %v406_v5 = vld [vmem:[#allocation3 + $0x248] sm:$0xff]  ;;  %v408_v7 = vld [vmem:[#allocation3 + $0x258] sm:$0xff] }
  0x71   : > { %1619 = vmatpush1.bf16.msra.mxu0 %v1618_v36  ;;  %v1640_v36 = vpack.c.bf16 %v386_v31, %v382_v30  ;;  %813 = vmatprep.mubr.f32.mxu0 %v332_v46  ;;  %v399_v2 = vld [vmem:[#allocation3 + $0x210] sm:$0xff]  ;;  %v410_v6 = vld [vmem:[#allocation3 + $0x268] sm:$0xff]  ;;  %v412_v8 = vld [vmem:[#allocation3 + $0x278] sm:$0xff] }
  0x72   : > { %743 = vmatmul.mubr.f32.vlgmr.msra.gmra.mrb[0].mxu1 %v601_v35  ;;  %1621 = vmatprep.subr.bf16.mxu0 %v1620_v38  ;;  %v1702_v35 = vpack.c.bf16 %v379_v29, %v375_v27  ;;  %v385_v38 = vld [vmem:[#allocation3 + $0x1a0] sm:$0xff]  ;;  %v407_v14 = vld [vmem:[#allocation3 + $0x250] sm:$0xff]  ;;  %v1716_v15 = vpack.c.bf16 %v412_v8, %v408_v7  ;;  %v414_v17 = vld [vmem:[#allocation3 + $0x288] sm:$0xff] }
  0x73   : > { %1683 = vmatpush1.bf16.msra.mxu1 %v1682_v37  ;;  %v381_v37 = vld [vmem:[#allocation3 + $0x180] sm:$0xff]  ;;  %884 = vmatprep.mubr.f32.mxu1 %v332_v46  ;;  %v418_v18 = vld [vmem:[#allocation3 + $0x2a8] sm:$0xff]  ;;  %v416_v19 = vld [vmem:[#allocation3 + $0x298] sm:$0xff] }
  0x74   : > { %1685 = vmatprep.subr.bf16.mxu1 %v1684_v42  ;;  %v390_v42 = vld [vmem:[#allocation3 + $0x1c8] sm:$0xff]  ;;  %v1642_v47 = vpack.c.bf16 %v385_v38, %v381_v37  ;;  %v409_v13 = vld [vmem:[#allocation3 + $0x260] sm:$0xff]  ;;  %v420_v20 = vld [vmem:[#allocation3 + $0x2b8] sm:$0xff] }
  0x75   : > { %1623 = vmatpush1.bf16.msra.mxu0 %v1622_v48  ;;  %v1706_v48 = vpack.c.bf16 %v387_v41, %v383_v39  ;;  %v417_v25 = vld [vmem:[#allocation3 + $0x2a0] sm:$0xff]  ;;  %v415_v26 = vld [vmem:[#allocation3 + $0x290] sm:$0xff]  ;;  %v1720_v27 = vpack.c.bf16 %v420_v20, %v416_v19  ;;  %v422_v29 = vld [vmem:[#allocation3 + $0x2c8] sm:$0xff] }
  0x76   : > { %1625 = vmatprep.subr.bf16.mxu0 %v1624_v50  ;;  %v389_v50 = vld [vmem:[#allocation3 + $0x1c0] sm:$0xff]  ;;  %v426_v30 = vld [vmem:[#allocation3 + $0x2e8] sm:$0xff]  ;;  %v424_v31 = vld [vmem:[#allocation3 + $0x2d8] sm:$0xff] }
  0x77   : > { %1687 = vmatpush1.bf16.msra.mxu1 %v1686_v49  ;;  %v1644_v49 = vpack.c.bf16 %v394_v43, %v390_v42  ;;  %v1646_v59 = vpack.c.bf16 %v393_v51, %v389_v50  ;;  %v428_v32 = vld [vmem:[#allocation3 + $0x2f8] sm:$0xff]  ;;  %v425_v37 = vld [vmem:[#allocation3 + $0x2e0] sm:$0xff]  ;;  %v423_v38 = vld [vmem:[#allocation3 + $0x2d0] sm:$0xff] }
  0x78   : > { %1689 = vmatprep.subr.bf16.mxu1 %v1688_v54  ;;  %v395_v54 = vld [vmem:[#allocation3 + $0x1f0] sm:$0xff]  ;;  %v1724_v39 = vpack.c.bf16 %v428_v32, %v424_v31  ;;  %v430_v41 = vld [vmem:[#allocation3 + $0x308] sm:$0xff]  ;;  %v432_v43 = vld [vmem:[#allocation3 + $0x318] sm:$0xff] }
  0x79   : > { %1627 = vmatpush1.bf16.msra.mxu0 %v1626_v60  ;;  %v1710_v60 = vpack.c.bf16 %v395_v54, %v391_v52  ;;  %v434_v42 = vld [vmem:[#allocation3 + $0x328] sm:$0xff]  ;;  %v436_v44 = vld [vmem:[#allocation3 + $0x338] sm:$0xff]  ;;  %v431_v50 = vld [vmem:[#allocation3 + $0x310] sm:$0xff] }
  0x7a   : > { %1629 = vmatprep.subr.bf16.mxu0 %v1628_v62  ;;  %v397_v62 = vld [vmem:[#allocation3 + $0x200] sm:$0xff]  ;;  %v1728_v51 = vpack.c.bf16 %v436_v44, %v432_v43  ;;  %v435_v52 = vld [vmem:[#allocation3 + $0x330] sm:$0xff]  ;;  %v442_v54 = vld [vmem:[#allocation3 + $0x368] sm:$0xff] }
  0x7b   : > { %1691 = vmatpush1.bf16.msra.mxu1 %v1690_v61  ;;  %v1648_v61 = vpack.c.bf16 %v402_v56, %v398_v55  ;;  %v1650_v9 = vpack.c.bf16 %v401_v63, %v397_v62  ;;  %v440_v55 = vld [vmem:[#allocation3 + $0x358] sm:$0xff]  ;;  %v1730_v58 = vpack.c.bf16 %v435_v52, %v431_v50  ;;  %v439_v62 = vld [vmem:[#allocation3 + $0x350] sm:$0xff]  ;;  %v331_v43 = vld [vmem:[#allocation2] sm:$0xff] }
  0x7c   : > { %1693 = vmatprep.subr.bf16.mxu1 %v1692_v4  ;;  %v403_v4 = vld [vmem:[#allocation3 + $0x230] sm:$0xff]  ;;  %v444_v56 = vld [vmem:[#allocation3 + $0x378] sm:$0xff]  ;;  %v913_v52 = vld [vmem:[#allocation3 + $0x888] sm:$0xff] }
  0x7d   : > { %1631 = vmatpush1.bf16.msra.mxu0 %v1630_v10  ;;  %v1714_v10 = vpack.c.bf16 %v403_v4, %v399_v2  ;;  %v1732_v63 = vpack.c.bf16 %v444_v56, %v440_v55  ;;  %v443_v2 = vld [vmem:[#allocation3 + $0x370] sm:$0xff]  ;;  %v450_v4 = vld [vmem:[#allocation3 + $0x3a8] sm:$0xff]  ;;  %v915_v55 = vld [vmem:[#allocation3 + $0x898] sm:$0xff] }
  0x7e   : > { %1633 = vmatprep.subr.bf16.mxu0 %v1632_v12  ;;  %v405_v12 = vld [vmem:[#allocation3 + $0x240] sm:$0xff]  ;;  %v1734_v8 = vpack.c.bf16 %v443_v2, %v439_v62  ;;  %v910_v50 = vld [vmem:[#allocation3 + $0x870] sm:$0xff]  ;;  %v919_v56 = vld [vmem:[#allocation3 + $0x8b8] sm:$0xff] }
  0x7f   : > { %1695 = vmatpush1.bf16.msra.mxu1 %v1694_v11  ;;  %v1652_v11 = vpack.c.bf16 %v410_v6, %v406_v5  ;;  %v1654_v21 = vpack.c.bf16 %v409_v13, %v405_v12  ;;  %v448_v5 = vld [vmem:[#allocation3 + $0x398] sm:$0xff]  ;;  %v447_v12 = vld [vmem:[#allocation3 + $0x390] sm:$0xff]  ;;  %v916_v2 = vld [vmem:[#allocation3 + $0x8a0] sm:$0xff] }
  0x80   : > { %1697 = vmatprep.subr.bf16.mxu1 %v1696_v16  ;;  %v411_v16 = vld [vmem:[#allocation3 + $0x270] sm:$0xff]  ;;  %v452_v6 = vld [vmem:[#allocation3 + $0x3b8] sm:$0xff] }
  0x81   : > { %1635 = vmatpush1.bf16.msra.mxu0 %v1634_v22  ;;  %v1718_v22 = vpack.c.bf16 %v411_v16, %v407_v14  ;;  %v1736_v13 = vpack.c.bf16 %v452_v6, %v448_v5  ;;  %v451_v14 = vld [vmem:[#allocation3 + $0x3b0] sm:$0xff]  ;;  %v458_v16 = vld [vmem:[#allocation3 + $0x3e8] sm:$0xff] }
  0x82   : > { %1637 = vmatprep.subr.bf16.mxu0 %v1636_v24  ;;  %v413_v24 = vld [vmem:[#allocation3 + $0x280] sm:$0xff]  ;;  %v1738_v20 = vpack.c.bf16 %v451_v14, %v447_v12  ;;  %v918_v5 = vld [vmem:[#allocation3 + $0x8b0] sm:$0xff]  ;;  %v921_v6 = vld [vmem:[#allocation3 + $0x8c8] sm:$0xff] }
  0x83   : > { %1699 = vmatpush1.bf16.msra.mxu1 %v1698_v23  ;;  %v1656_v23 = vpack.c.bf16 %v418_v18, %v414_v17  ;;  %v1658_v33 = vpack.c.bf16 %v417_v25, %v413_v24  ;;  %v456_v17 = vld [vmem:[#allocation3 + $0x3d8] sm:$0xff]  ;;  %v455_v24 = vld [vmem:[#allocation3 + $0x3d0] sm:$0xff]  ;;  %v920_v14 = vld [vmem:[#allocation3 + $0x8c0] sm:$0xff] }
  0x84   : > { %1701 = vmatprep.subr.bf16.mxu1 %v1700_v28  ;;  %v419_v28 = vld [vmem:[#allocation3 + $0x2b0] sm:$0xff]  ;;  %v460_v18 = vld [vmem:[#allocation3 + $0x3f8] sm:$0xff] }
  0x85   : > { %1639 = vmatpush1.bf16.msra.mxu0 %v1638_v34  ;;  %v1722_v34 = vpack.c.bf16 %v419_v28, %v415_v26  ;;  %v1740_v25 = vpack.c.bf16 %v460_v18, %v456_v17  ;;  %v459_v26 = vld [vmem:[#allocation3 + $0x3f0] sm:$0xff]  ;;  %v901_v28 = vld [vmem:[#allocation3 + $0x828] sm:$0xff] }
  0x86   : > { %1641 = vmatprep.subr.bf16.mxu0 %v1640_v36  ;;  %v421_v36 = vld [vmem:[#allocation3 + $0x2c0] sm:$0xff]  ;;  %v1742_v32 = vpack.c.bf16 %v459_v26, %v455_v24  ;;  %v926_v18 = vld [vmem:[#allocation3 + $0x8f0] sm:$0xff] }
  0x87   : > { %1703 = vmatpush1.bf16.msra.mxu1 %v1702_v35  ;;  %v1660_v35 = vpack.c.bf16 %v426_v30, %v422_v29  ;;  %v1662_v45 = vpack.c.bf16 %v425_v37, %v421_v36  ;;  %v899_v29 = vld [vmem:[#allocation3 + $0x818] sm:$0xff]  ;;  %v898_v36 = vld [vmem:[#allocation3 + $0x810] sm:$0xff]  ;;  %v928_v26 = vld [vmem:[#allocation3 + $0x900] sm:$0xff] }
  0x88   : > { %1705 = vmatprep.subr.bf16.mxu1 %v1704_v40  ;;  %v427_v40 = vld [vmem:[#allocation3 + $0x2f0] sm:$0xff]  ;;  %v903_v30 = vld [vmem:[#allocation3 + $0x838] sm:$0xff] }
  0x89   : > { %1643 = vmatpush1.bf16.msra.mxu0 %v1642_v47  ;;  %v1726_v46 = vpack.c.bf16 %v427_v40, %v423_v38  ;;  %v1664_v47 = vpack.c.bf16 %v434_v42, %v430_v41  ;;  %v1808_v37 = vpack.c.bf16 %v903_v30, %v899_v29  ;;  %v902_v38 = vld [vmem:[#allocation3 + $0x830] sm:$0xff]  ;;  %v909_v40 = vld [vmem:[#allocation3 + $0x868] sm:$0xff]  ;;  %v907_v41 = vld [vmem:[#allocation3 + $0x858] sm:$0xff] }
  0x8a   : > { %1645 = vmatprep.subr.bf16.mxu0 %v1644_v49  ;;  %v433_v49 = vld [vmem:[#allocation3 + $0x320] sm:$0xff]  ;;  %v911_v42 = vld [vmem:[#allocation3 + $0x878] sm:$0xff]  ;;  %v934_v30 = vld [vmem:[#allocation3 + $0x930] sm:$0xff] }
  0x8b   : > { %1707 = vmatpush1.bf16.msra.mxu1 %v1706_v48  ;;  %v429_v48 = vld [vmem:[#allocation3 + $0x300] sm:$0xff] }
  0x8c   : > { %1709 = vmatprep.subr.bf16.mxu1 %v1708_v53  ;;  %v438_v53 = vld [vmem:[#allocation3 + $0x348] sm:$0xff]  ;;  %v1666_v57 = vpack.c.bf16 %v433_v49, %v429_v48  ;;  %v908_v48 = vld [vmem:[#allocation3 + $0x860] sm:$0xff]  ;;  %v906_v49 = vld [vmem:[#allocation3 + $0x850] sm:$0xff] }
  0x8d   : > { %1647 = vmatpush1.bf16.msra.mxu0 %v1646_v59  ;;  %v1668_v59 = vpack.c.bf16 %v442_v54, %v438_v53  ;;  %v917_v53 = vld [vmem:[#allocation3 + $0x8a8] sm:$0xff] }
  0x8e   : > { %1649 = vmatprep.subr.bf16.mxu0 %v1648_v61  ;;  %v441_v61 = vld [vmem:[#allocation3 + $0x360] sm:$0xff]  ;;  %v892_v54 = vld [vmem:[#allocation2 + $0x8] sm:$0xfc]  ;;  %v1752_v62 = vpack.c.bf16 %v917_v53, %v913_v52  ;;  %v946_v52 = vld [vmem:[#allocation3 + $0x990] sm:$0xff] }
  0x8f   : > { %1711 = vmatpush1.bf16.msra.mxu1 %v1710_v60  ;;  %v437_v60 = vld [vmem:[#allocation3 + $0x340] sm:$0xff] }
  0x90   : > { %1713 = vmatprep.subr.bf16.mxu1 %v1712_v3  ;;  %v446_v3 = vld [vmem:[#allocation3 + $0x388] sm:$0xff]  ;;  %v1670_v7 = vpack.c.bf16 %v441_v61, %v437_v60  ;;  %v1814_v61 = vpack.c.bf16 %v910_v50, %v906_v49  ;;  %v944_v50 = vld [vmem:[#allocation3 + $0x980] sm:$0xff] }
  0x91   : > { %1651 = vmatpush1.bf16.msra.mxu0 %v1650_v9  ;;  %v1672_v9 = vpack.c.bf16 %v450_v4, %v446_v3  ;;  %v914_v3 = vld [vmem:[#allocation3 + $0x890] sm:$0xff]  ;;  %v1816_v4 = vpack.c.bf16 %v919_v56, %v915_v55  ;;  %v953_v55 = vld [vmem:[#allocation3 + $0x9c8] sm:$0xff] }
  0x92   : > { %1653 = vmatprep.subr.bf16.mxu0 %v1652_v11  ;;  %v449_v11 = vld [vmem:[#allocation3 + $0x3a0] sm:$0xff]  ;;  %v1818_v12 = vpack.c.bf16 %v918_v5, %v914_v3  ;;  %v957_v56 = vld [vmem:[#allocation3 + $0x9e8] sm:$0xff] }
  0x93   : > { %1715 = vmatpush1.bf16.msra.mxu1 %v1714_v10  ;;  %v445_v10 = vld [vmem:[#allocation3 + $0x380] sm:$0xff]  ;;  %v961_v5 = vld [vmem:[#allocation3 + $0xa08] sm:$0xff] }
  0x94   : > { %1717 = vmatprep.subr.bf16.mxu1 %v1716_v15  ;;  %v454_v15 = vld [vmem:[#allocation3 + $0x3c8] sm:$0xff]  ;;  %v1674_v19 = vpack.c.bf16 %v449_v11, %v445_v10  ;;  %v927_v10 = vld [vmem:[#allocation3 + $0x8f8] sm:$0xff] }
  0x95   : > { %1655 = vmatpush1.bf16.msra.mxu0 %v1654_v21  ;;  %v1676_v21 = vpack.c.bf16 %v458_v16, %v454_v15  ;;  %v924_v15 = vld [vmem:[#allocation3 + $0x8e0] sm:$0xff]  ;;  %v922_v16 = vld [vmem:[#allocation3 + $0x8d0] sm:$0xff] }
  0x96   : > { %1657 = vmatprep.subr.bf16.mxu0 %v1656_v23  ;;  %v457_v23 = vld [vmem:[#allocation3 + $0x3e0] sm:$0xff]  ;;  %v1822_v24 = vpack.c.bf16 %v926_v18, %v922_v16  ;;  %v966_v16 = vld [vmem:[#allocation3 + $0xa30] sm:$0xff]  ;;  %v973_v18 = vld [vmem:[#allocation3 + $0xa68] sm:$0xff] }
  0x97   : > { %1719 = vmatpush1.bf16.msra.mxu1 %v1718_v22  ;;  %v453_v22 = vld [vmem:[#allocation3 + $0x3c0] sm:$0xff] }
  0x98   : > { %1721 = vmatprep.subr.bf16.mxu1 %v1720_v27  ;;  %v897_v27 = vld [vmem:[#allocation3 + $0x808] sm:$0xff]  ;;  %v1678_v31 = vpack.c.bf16 %v457_v23, %v453_v22  ;;  %v935_v22 = vld [vmem:[#allocation3 + $0x938] sm:$0xff]  ;;  %v1758_v23 = vpack.c.bf16 %v924_v15, %v920_v14  ;;  %v962_v14 = vld [vmem:[#allocation3 + $0xa10] sm:$0xff] }
  0x99   : > { %1659 = vmatpush1.bf16.msra.mxu0 %v1658_v33  ;;  %v1744_v33 = vpack.c.bf16 %v901_v28, %v897_v27  ;;  %v932_v27 = vld [vmem:[#allocation3 + $0x920] sm:$0xff]  ;;  %v930_v28 = vld [vmem:[#allocation3 + $0x910] sm:$0xff] }
  0x9a   : > { %1661 = vmatprep.subr.bf16.mxu0 %v1660_v35  ;;  %v900_v35 = vld [vmem:[#allocation3 + $0x820] sm:$0xff] }
  0x9b   : > { %1723 = vmatpush1.bf16.msra.mxu1 %v1722_v34  ;;  %v896_v34 = vld [vmem:[#allocation3 + $0x800] sm:$0xff] }
  0x9c   : > { %1725 = vmatprep.subr.bf16.mxu1 %v1724_v39  ;;  %v905_v39 = vld [vmem:[#allocation3 + $0x848] sm:$0xff]  ;;  %v1746_v44 = vpack.c.bf16 %v900_v35, %v896_v34  ;;  %v943_v34 = vld [vmem:[#allocation3 + $0x978] sm:$0xff]  ;;  %v1762_v35 = vpack.c.bf16 %v932_v27, %v928_v26  ;;  %v970_v26 = vld [vmem:[#allocation3 + $0xa50] sm:$0xff] }
  0x9d   : > { %1663 = vmatpush1.bf16.msra.mxu0 %v1662_v45  ;;  %v904_v45 = vld [vmem:[#allocation3 + $0x840] sm:$0xff] }
  0x9e   : > { %1665 = vmatprep.subr.bf16.mxu0 %v1664_v47  ;;  %v1748_v47 = vpack.c.bf16 %v909_v40, %v905_v39  ;;  %v940_v39 = vld [vmem:[#allocation3 + $0x960] sm:$0xff]  ;;  %v938_v40 = vld [vmem:[#allocation3 + $0x950] sm:$0xff] }
  0x9f   : > { %1727 = vmatpush1.bf16.msra.mxu1 %v1726_v46  ;;  %v1810_v46 = vpack.c.bf16 %v902_v38, %v898_v36  ;;  %v1826_v36 = vpack.c.bf16 %v934_v30, %v930_v28  ;;  %v936_v38 = vld [vmem:[#allocation3 + $0x940] sm:$0xff]  ;;  %v974_v28 = vld [vmem:[#allocation3 + $0xa70] sm:$0xff]  ;;  %v981_v30 = vld [vmem:[#allocation3 + $0xaa8] sm:$0xff] }
  0xa0   : > { %1729 = vmatprep.subr.bf16.mxu1 %v1728_v51  ;;  %v1812_v51 = vpack.c.bf16 %v911_v42, %v907_v41  ;;  %v942_v42 = vld [vmem:[#allocation3 + $0x970] sm:$0xff] }
  0xa1   : > { %1667 = vmatpush1.bf16.msra.mxu0 %v1666_v57  ;;  %v894_v57 = vld [vmem:[#allocation2 + $0x18] sm:$0x3] }
  0xa2   : > { %1669 = vmatprep.subr.bf16.mxu0 %v1668_v59  ;;  %v1750_v59 = vpack.c.bf16 %v908_v48, %v904_v45  ;;  %v1033_v60 = vrot.slane %v894_v57, 2  ;;  %v947_v45 = vld [vmem:[#allocation3 + $0x998] sm:$0xff]  ;;  %v1830_v48 = vpack.c.bf16 %v942_v42, %v938_v40  ;;  %v982_v40 = vld [vmem:[#allocation3 + $0xab0] sm:$0xff]  ;;  %v989_v42 = vld [vmem:[#allocation3 + $0xae8] sm:$0xff] }
  0xa3   : > { %1731 = vmatpush1.bf16.msra.mxu1 %v1730_v58  ;;  %v1032_v58 = vrot.slane %v892_v54, 2  ;;  %v950_v54 = vld [vmem:[#allocation3 + $0x9b0] sm:$0xff]  ;;  %v955_v57 = vld [vmem:[#allocation3 + $0x9d8] sm:$0xff] }
  0xa4   : > { %1733 = vmatprep.subr.bf16.mxu1 %v1732_v63  ;;  %v912_v63 = vld [vmem:[#allocation3 + $0x880] sm:$0xff] }
  0xa5   : > { %1671 = vmatpush1.bf16.msra.mxu0 %v1670_v7  ;;  %v925_v7 = vld [vmem:[#allocation3 + $0x8e8] sm:$0xff]  ;;  %v1754_v11 = vpack.c.bf16 %v916_v2, %v912_v63  ;;  %v956_v63 = vld [vmem:[#allocation3 + $0x9e0] sm:$0xff]  ;;  %v954_v2 = vld [vmem:[#allocation3 + $0x9d0] sm:$0xff] }
  0xa6   : > { %1673 = vmatprep.subr.bf16.mxu0 %v1672_v9  ;;  %v923_v9 = vld [vmem:[#allocation3 + $0x8d8] sm:$0xff] }
  0xa7   : > { %1735 = vmatpush1.bf16.msra.mxu1 %v1734_v8  ;;  %v1034_v8 = vsel %vm1028_vm2, %v1032_v58, %v1033_v60  ;;  %v1820_v17 = vpack.c.bf16 %v927_v10, %v923_v9  ;;  %v959_v58 = vld [vmem:[#allocation3 + $0x9f8] sm:$0xff]  ;;  %v1834_v60 = vpack.c.bf16 %v950_v54, %v946_v52  ;;  %v990_v52 = vld [vmem:[#allocation3 + $0xaf0] sm:$0xff]  ;;  %v997_v54 = vld [vmem:[#allocation3 + $0xb28] sm:$0xff] }
  0xa8   : > { %1737 = vmatprep.subr.bf16.mxu1 %v1736_v13  ;;  %v1756_v13 = vpack.c.bf16 %v925_v7, %v921_v6  ;;  %v1836_v3 = vpack.c.bf16 %v959_v58, %v955_v57  ;;  %v965_v6 = vld [vmem:[#allocation3 + $0xa28] sm:$0xff]  ;;  %v963_v7 = vld [vmem:[#allocation3 + $0xa18] sm:$0xff] }
  0xa9   : > { %1675 = vmatpush1.bf16.msra.mxu0 %v1674_v19  ;;  %v929_v19 = vld [vmem:[#allocation3 + $0x908] sm:$0xff] }
  0xaa   : > { %1677 = vmatprep.subr.bf16.mxu0 %v1676_v21  ;;  %v931_v21 = vld [vmem:[#allocation3 + $0x918] sm:$0xff] }
  0xab   : > { %1739 = vmatpush1.bf16.msra.mxu1 %v1738_v20  ;;  %v933_v20 = vld [vmem:[#allocation3 + $0x928] sm:$0xff]  ;;  %v1824_v29 = vpack.c.bf16 %v935_v22, %v931_v21  ;;  %v1842_v22 = vpack.c.bf16 %v966_v16, %v962_v14  ;;  %v1006_v14 = vld [vmem:[#allocation3 + $0xb70] sm:$0xff] }
  0xac   : > { %1741 = vmatprep.subr.bf16.mxu1 %v1740_v25  ;;  %v1760_v25 = vpack.c.bf16 %v933_v20, %v929_v19  ;;  %v971_v19 = vld [vmem:[#allocation3 + $0xa58] sm:$0xff]  ;;  %v1013_v16 = vld [vmem:[#allocation3 + $0xba8] sm:$0xff] }
  0xad   : > { %1679 = vmatpush1.bf16.msra.mxu0 %v1678_v31  ;;  %v937_v31 = vld [vmem:[#allocation3 + $0x948] sm:$0xff]  ;;  %v975_v20 = vld [vmem:[#allocation3 + $0xa78] sm:$0xff] }
  0xae   : > { %1745 = vmatprep.subr.bf16.mxu0 %v1744_v33  ;;  %v939_v33 = vld [vmem:[#allocation3 + $0x958] sm:$0xff]  ;;  %v1844_v27 = vpack.c.bf16 %v975_v20, %v971_v19 }
  0xaf   : > { %1743 = vmatpush1.bf16.msra.mxu1 %v1742_v32  ;;  %v941_v32 = vld [vmem:[#allocation3 + $0x968] sm:$0xff]  ;;  %v1828_v41 = vpack.c.bf16 %v943_v34, %v939_v33  ;;  %v1846_v34 = vpack.c.bf16 %v974_v28, %v970_v26  ;;  %v1014_v26 = vld [vmem:[#allocation3 + $0xbb0] sm:$0xff] }
  0xb0   : > { %1809 = vmatprep.subr.bf16.mxu1 %v1808_v37  ;;  %814 = vmatmul.mubr.f32.vlgmr.msra.gmra.mrb[0].mxu0 %v331_v43  ;;  %v1764_v37 = vpack.c.bf16 %v941_v32, %v937_v31  ;;  %v979_v31 = vld [vmem:[#allocation3 + $0xa98] sm:$0xff]  ;;  %v1021_v28 = vld [vmem:[#allocation3 + $0xbe8] sm:$0xff] }
  0xb1   : > { %1747 = vmatpush1.bf16.msra.mxu0 %v1746_v44  ;;  %1101 = vmatprep.mubr.f32.mxu0 %v1034_v8  ;;  %v949_v44 = vld [vmem:[#allocation3 + $0x9a8] sm:$0xff]  ;;  %v983_v32 = vld [vmem:[#allocation3 + $0xab8] sm:$0xff] }
  0xb2   : > { %885 = vmatmul.mubr.f32.vlgmr.msra.gmra.mrb[0].mxu1 %v331_v43  ;;  %1749 = vmatprep.subr.bf16.mxu0 %v1748_v47  ;;  %v945_v43 = vld [vmem:[#allocation3 + $0x988] sm:$0xff]  ;;  %v1766_v47 = vpack.c.bf16 %v940_v39, %v936_v38  ;;  %v978_v38 = vld [vmem:[#allocation3 + $0xa90] sm:$0xff]  ;;  %v1848_v39 = vpack.c.bf16 %v983_v32, %v979_v31  ;;  %v1016_v32 = vld [vmem:[#allocation3 + $0xbc0] sm:$0xff] }
  0xb3   : > { %1811 = vmatpush1.bf16.msra.mxu1 %v1810_v46  ;;  %1172 = vmatprep.mubr.f32.mxu1 %v1034_v8  ;;  %v951_v46 = vld [vmem:[#allocation3 + $0x9b8] sm:$0xff]  ;;  %v1768_v49 = vpack.c.bf16 %v949_v44, %v945_v43 }
  0xb4   : > { %1813 = vmatprep.subr.bf16.mxu1 %v1812_v51  ;;  %v948_v51 = vld [vmem:[#allocation3 + $0x9a0] sm:$0xff]  ;;  %v1832_v53 = vpack.c.bf16 %v951_v46, %v947_v45  ;;  %v967_v8 = vld [vmem:[#allocation3 + $0xa38] sm:$0xff]  ;;  %v1850_v46 = vpack.c.bf16 %v982_v40, %v978_v38  ;;  %v1022_v40 = vld [vmem:[#allocation3 + $0xbf0] sm:$0xff] }
  0xb5   : > { %1751 = vmatpush1.bf16.msra.mxu0 %v1750_v59  ;;  %v1770_v59 = vpack.c.bf16 %v948_v51, %v944_v50  ;;  %v1840_v15 = vpack.c.bf16 %v967_v8, %v963_v7  ;;  %v987_v43 = vld [vmem:[#allocation3 + $0xad8] sm:$0xff]  ;;  %v986_v50 = vld [vmem:[#allocation3 + $0xad0] sm:$0xff] }
  0xb6   : > { %1753 = vmatprep.subr.bf16.mxu0 %v1752_v62  ;;  %v952_v62 = vld [vmem:[#allocation3 + $0x9c0] sm:$0xff]  ;;  %v991_v44 = vld [vmem:[#allocation3 + $0xaf8] sm:$0xff]  ;;  %v1854_v58 = vpack.c.bf16 %v990_v52, %v986_v50  ;;  %v1230_v50 = vshrl.u32 %v310_v0, 7 }
  0xb7   : > { %1815 = vmatpush1.bf16.msra.mxu1 %v1814_v61  ;;  %v1772_v61 = vpack.c.bf16 %v957_v56, %v953_v55  ;;  %v1774_v9 = vpack.c.bf16 %v956_v63, %v952_v62  ;;  %v1852_v51 = vpack.c.bf16 %v991_v44, %v987_v43  ;;  %v995_v55 = vld [vmem:[#allocation3 + $0xb18] sm:$0xff]  ;;  %v994_v62 = vld [vmem:[#allocation3 + $0xb10] sm:$0xff] }
  0xb8   : > { %1817 = vmatprep.subr.bf16.mxu1 %v1816_v4  ;;  %v958_v4 = vld [vmem:[#allocation3 + $0x9f0] sm:$0xff]  ;;  %v999_v56 = vld [vmem:[#allocation3 + $0xb38] sm:$0xff] }
  0xb9   : > { %1755 = vmatpush1.bf16.msra.mxu0 %v1754_v11  ;;  %v1838_v10 = vpack.c.bf16 %v958_v4, %v954_v2  ;;  %v1776_v11 = vpack.c.bf16 %v965_v6, %v961_v5  ;;  %v1856_v63 = vpack.c.bf16 %v999_v56, %v995_v55  ;;  %v998_v2 = vld [vmem:[#allocation3 + $0xb30] sm:$0xff]  ;;  %v1005_v4 = vld [vmem:[#allocation3 + $0xb68] sm:$0xff]  ;;  %v1003_v5 = vld [vmem:[#allocation3 + $0xb58] sm:$0xff] }
  0xba   : > { %1757 = vmatprep.subr.bf16.mxu0 %v1756_v13  ;;  %v964_v13 = vld [vmem:[#allocation3 + $0xa20] sm:$0xff]  ;;  %v1007_v6 = vld [vmem:[#allocation3 + $0xb78] sm:$0xff]  ;;  %v1858_v8 = vpack.c.bf16 %v998_v2, %v994_v62 }
  0xbb   : > { %1819 = vmatpush1.bf16.msra.mxu1 %v1818_v12  ;;  %v960_v12 = vld [vmem:[#allocation3 + $0xa00] sm:$0xff] }
  0xbc   : > { %1821 = vmatprep.subr.bf16.mxu1 %v1820_v17  ;;  %v969_v17 = vld [vmem:[#allocation3 + $0xa48] sm:$0xff]  ;;  %v1778_v21 = vpack.c.bf16 %v964_v13, %v960_v12  ;;  %v1002_v12 = vld [vmem:[#allocation3 + $0xb50] sm:$0xff]  ;;  %v1860_v13 = vpack.c.bf16 %v1007_v6, %v1003_v5 }
  0xbd   : > { %1759 = vmatpush1.bf16.msra.mxu0 %v1758_v23  ;;  %v1780_v23 = vpack.c.bf16 %v973_v18, %v969_v17  ;;  %v1011_v17 = vld [vmem:[#allocation3 + $0xb98] sm:$0xff]  ;;  %v1862_v20 = vpack.c.bf16 %v1006_v14, %v1002_v12 }
  0xbe   : > { %1761 = vmatprep.subr.bf16.mxu0 %v1760_v25  ;;  %v972_v25 = vld [vmem:[#allocation3 + $0xa60] sm:$0xff]  ;;  %v1015_v18 = vld [vmem:[#allocation3 + $0xbb8] sm:$0xff] }
  0xbf   : > { %1823 = vmatpush1.bf16.msra.mxu1 %v1822_v24  ;;  %v968_v24 = vld [vmem:[#allocation3 + $0xa40] sm:$0xff] }
  0xc0   : > { %1825 = vmatprep.subr.bf16.mxu1 %v1824_v29  ;;  %v977_v29 = vld [vmem:[#allocation3 + $0xa88] sm:$0xff]  ;;  %v1782_v33 = vpack.c.bf16 %v972_v25, %v968_v24  ;;  %v1010_v24 = vld [vmem:[#allocation3 + $0xb90] sm:$0xff]  ;;  %v1864_v25 = vpack.c.bf16 %v1015_v18, %v1011_v17 }
  0xc1   : > { %1763 = vmatpush1.bf16.msra.mxu0 %v1762_v35  ;;  %v1784_v35 = vpack.c.bf16 %v981_v30, %v977_v29  ;;  %v1019_v29 = vld [vmem:[#allocation3 + $0xbd8] sm:$0xff] }
  0xc2   : > { %1765 = vmatprep.subr.bf16.mxu0 %v1764_v37  ;;  %v980_v37 = vld [vmem:[#allocation3 + $0xaa0] sm:$0xff]  ;;  %v1023_v30 = vld [vmem:[#allocation3 + $0xbf8] sm:$0xff] }
  0xc3   : > { %1827 = vmatpush1.bf16.msra.mxu1 %v1826_v36  ;;  %v976_v36 = vld [vmem:[#allocation3 + $0xa80] sm:$0xff]  ;;  %v1868_v38 = vpack.c.bf16 %v1023_v30, %v1019_v29 }
  0xc4   : > { %1829 = vmatprep.subr.bf16.mxu1 %v1828_v41  ;;  %v985_v41 = vld [vmem:[#allocation3 + $0xac8] sm:$0xff]  ;;  %v1786_v45 = vpack.c.bf16 %v980_v37, %v976_v36  ;;  %v891_v36 = vld [vmem:[#allocation2] sm:$0xfc]  ;;  %v893_v37 = vld [vmem:[#allocation2 + $0x10] sm:$0x3] }
  0xc5   : > { %1767 = vmatpush1.bf16.msra.mxu0 %v1766_v47  ;;  %v1788_v47 = vpack.c.bf16 %v989_v42, %v985_v41  ;;  %v1029_v42 = vrot.slane %v891_v36, 2  ;;  %v1030_v43 = vrot.slane %v893_v37, 2 }
  0xc6   : > { %1769 = vmatprep.subr.bf16.mxu0 %v1768_v49  ;;  %v988_v49 = vld [vmem:[#allocation3 + $0xae0] sm:$0xff] }
  0xc7   : > { %1831 = vmatpush1.bf16.msra.mxu1 %v1830_v48  ;;  %v984_v48 = vld [vmem:[#allocation3 + $0xac0] sm:$0xff] }
  0xc8   : > { %1833 = vmatprep.subr.bf16.mxu1 %v1832_v53  ;;  %v993_v53 = vld [vmem:[#allocation3 + $0xb08] sm:$0xff]  ;;  %v1790_v57 = vpack.c.bf16 %v988_v49, %v984_v48 }
  0xc9   : > { %1771 = vmatpush1.bf16.msra.mxu0 %v1770_v59  ;;  %v1792_v59 = vpack.c.bf16 %v997_v54, %v993_v53 }
  0xca   : > { %1773 = vmatprep.subr.bf16.mxu0 %v1772_v61  ;;  %v996_v61 = vld [vmem:[#allocation3 + $0xb20] sm:$0xff] }
  0xcb   : > { %1835 = vmatpush1.bf16.msra.mxu1 %v1834_v60  ;;  %v992_v60 = vld [vmem:[#allocation3 + $0xb00] sm:$0xff] }
  0xcc   : > { %1837 = vmatprep.subr.bf16.mxu1 %v1836_v3  ;;  %v1001_v3 = vld [vmem:[#allocation3 + $0xb48] sm:$0xff]  ;;  %v1794_v7 = vpack.c.bf16 %v996_v61, %v992_v60 }
  0xcd   : > { %1775 = vmatpush1.bf16.msra.mxu0 %v1774_v9  ;;  %v1796_v9 = vpack.c.bf16 %v1005_v4, %v1001_v3 }
  0xce   : > { %1777 = vmatprep.subr.bf16.mxu0 %v1776_v11  ;;  %v1004_v11 = vld [vmem:[#allocation3 + $0xb60] sm:$0xff] }
  0xcf   : > { %1839 = vmatpush1.bf16.msra.mxu1 %v1838_v10  ;;  %v1000_v10 = vld [vmem:[#allocation3 + $0xb40] sm:$0xff] }
  0xd0   : > { %1841 = vmatprep.subr.bf16.mxu1 %v1840_v15  ;;  %v1009_v15 = vld [vmem:[#allocation3 + $0xb88] sm:$0xff]  ;;  %v1798_v19 = vpack.c.bf16 %v1004_v11, %v1000_v10 }
  0xd1   : > { %1779 = vmatpush1.bf16.msra.mxu0 %v1778_v21  ;;  %v1800_v21 = vpack.c.bf16 %v1013_v16, %v1009_v15 }
  0xd2   : > { %1781 = vmatprep.subr.bf16.mxu0 %v1780_v23  ;;  %v1012_v23 = vld [vmem:[#allocation3 + $0xba0] sm:$0xff] }
  0xd3   : > { %1843 = vmatpush1.bf16.msra.mxu1 %v1842_v22  ;;  %v1008_v22 = vld [vmem:[#allocation3 + $0xb80] sm:$0xff] }
  0xd4   : > { %1845 = vmatprep.subr.bf16.mxu1 %v1844_v27  ;;  %v1017_v27 = vld [vmem:[#allocation3 + $0xbc8] sm:$0xff]  ;;  %v1802_v31 = vpack.c.bf16 %v1012_v23, %v1008_v22 }
  0xd5   : > { %1783 = vmatpush1.bf16.msra.mxu0 %v1782_v33  ;;  %v1866_v33 = vpack.c.bf16 %v1014_v26, %v1010_v24 }
  0xd6   : > { %1785 = vmatprep.subr.bf16.mxu0 %v1784_v35  ;;  %v1020_v35 = vld [vmem:[#allocation3 + $0xbe0] sm:$0xff] }
  0xd7   : > { %1847 = vmatpush1.bf16.msra.mxu1 %v1846_v34  ;;  %v1804_v34 = vpack.c.bf16 %v1021_v28, %v1017_v27  ;;  %v1806_v41 = vpack.c.bf16 %v1020_v35, %v1016_v32 }
  0xd8   : > { %1849 = vmatprep.subr.bf16.mxu1 %v1848_v39  ;;  %v1018_v39 = vld [vmem:[#allocation3 + $0xbd0] sm:$0xff] }
  0xd9   : > { %1787 = vmatpush1.bf16.msra.mxu0 %v1786_v45  ;;  %v1870_v44 = vpack.c.bf16 %v1022_v40, %v1018_v39  ;;  %v1031_v45 = vsel %vm1028_vm2, %v1029_v42, %v1030_v43 }
  0xda   : > { %1789 = vmatprep.subr.bf16.mxu0 %v1788_v47  ;;  %v1979_v47 = vmov 1966171168  }
  0xdb   : > { %1851 = vmatpush1.bf16.msra.mxu1 %v1850_v46  ;;  %v1227_v48 = vunpack.c.l.s4 %v1979_v47 }
  0xdc   : > { %1853 = vmatprep.subr.bf16.mxu1 %v1852_v51 }
  0xdd   : > { %1791 = vmatpush1.bf16.msra.mxu0 %v1790_v57  ;;  %v1228_v49 = vunpack.c.0.s8 %v1227_v48 }
  0xde   : > { %1793 = vmatprep.subr.bf16.mxu0 %v1792_v59 }
  0xdf   : > { %1855 = vmatpush1.bf16.msra.mxu1 %v1854_v58  ;;  %v2120_v56 = vsub.s32 %v1228_v49, %v1230_v50 }
  0xe0   : > { %1857 = vmatprep.subr.bf16.mxu1 %v1856_v63 }
  0xe1   : > { %1795 = vmatpush1.bf16.msra.mxu0 %v1794_v7 }
  0xe2   : > { %1797 = vmatprep.subr.bf16.mxu0 %v1796_v9 }
  0xe3   : > { %1859 = vmatpush1.bf16.msra.mxu1 %v1858_v8 }
  0xe4   : > { %1861 = vmatprep.subr.bf16.mxu1 %v1860_v13 }
  0xe5   : > { %1799 = vmatpush1.bf16.msra.mxu0 %v1798_v19 }
  0xe6   : > { %1801 = vmatprep.subr.bf16.mxu0 %v1800_v21 }
  0xe7   : > { %1863 = vmatpush1.bf16.msra.mxu1 %v1862_v20 }
  0xe8   : > { %1865 = vmatprep.subr.bf16.mxu1 %v1864_v25 }
  0xe9   : > { %1803 = vmatpush1.bf16.msra.mxu0 %v1802_v31 }
  0xea   : > { %1805 = vmatprep.subr.bf16.mxu0 %v1804_v34 }
  0xeb   : > { %1867 = vmatpush1.bf16.msra.mxu1 %v1866_v33 }
  0xec   : > { %1869 = vmatprep.subr.bf16.mxu1 %v1868_v38 }
  0xed   : > { %1807 = vmatpush1.bf16.msra.mxu0 %v1806_v41 }
  0xef   : > { %1871 = vmatpush1.bf16.msra.mxu1 %v1870_v44 }
  0xf0   : > { %1102 = vmatmul.mubr.f32.vlgmr.msra.gmra.mrb[0].mxu0 %v1031_v45 }
  0xf2   : > { %1173 = vmatmul.mubr.f32.vlgmr.msra.gmra.mrb[0].mxu1 %v1031_v45 }
 0x1c3   : > { %v1103_v51 = vpop.f32.mrb[0].mxu0 }
 0x1c4   : > { %1183 = vst [vmem:[%s301_s9] sm:$0xff] %v1103_v51  ;;  %v1196_v52 = vrot.slane %v1103_v51, 4  ;;  %v1254_v53 = vmul.f32 %v1103_v51, %v1103_v51  ;;  %v1105_v55 = vpop.f32.mrb[1].mxu0 }
 0x1c5   : > { %v1174_v54 = vpop.f32.mrb[0].mxu1  ;;  %1184 = vst [vmem:[%s301_s9 + $0x8] sm:$0xff] %v1105_v55  ;;  %v1202_v58 = vrot.slane %v1105_v55, 4  ;;  %v1255_v59 = vmul.f32 %v1105_v55, %v1105_v55 }
 0x1c6   : > { %1185 = vst [vmem:[%s301_s9 + $0x10] sm:$0xff] %v1174_v54  ;;  %v1208_v1 = vrot.slane %v1174_v54, 4  ;;  %v1256_v57 = vmul.f32 %v1174_v54, %v1174_v54  ;;  %v1176_v60 = vpop.f32.mrb[1].mxu1  ;;  %v1197_v0 = vadd.f32 %v1196_v52, %v1103_v51  ;;  %v1258_v61 = vrot.slane %v1254_v53, 4 }
 0x1c7   : > { %1186 = vst [vmem:[%s301_s9 + $0x18] sm:$0xff] %v1176_v60  ;;  %v1214_v62 = vrot.slane %v1176_v60, 4  ;;  %v1257_v63 = vmul.f32 %v1176_v60, %v1176_v60  ;;  %v1203_v4 = vadd.f32 %v1202_v58, %v1105_v55  ;;  %v1264_v5 = vrot.slane %v1255_v59, 4 }
 0x1c8   : > { %v1209_v2 = vadd.f32 %v1208_v1, %v1174_v54  ;;  %v1270_v3 = vrot.slane %v1256_v57, 4  ;;  %v1198_v6 = vrot.slane %v1197_v0, 2  ;;  %v1259_v7 = vadd.f32 %v1258_v61, %v1254_v53  ;;  %v1195_v54 = vld [vmem:[%s2095_s26] sm:$0xf] }
 0x1c9   : > { %v1215_v8 = vadd.f32 %v1214_v62, %v1176_v60  ;;  %v1276_v9 = vrot.slane %v1257_v63, 4  ;;  %v1204_v12 = vrot.slane %v1203_v4, 2  ;;  %v1265_v13 = vadd.f32 %v1264_v5, %v1255_v59 }
 0x1ca   : > { %v1210_v10 = vrot.slane %v1209_v2, 2  ;;  %v1271_v11 = vadd.f32 %v1270_v3, %v1256_v57  ;;  %v1199_v14 = vadd.f32 %v1198_v6, %v1197_v0  ;;  %v1260_v15 = vrot.slane %v1259_v7, 2  ;;  %v1253_v57 = vld [vmem:[%s2109_s29] sm:$0xf] }
 0x1cb   : > { %v1216_v16 = vrot.slane %v1215_v8, 2  ;;  %v1277_v17 = vadd.f32 %v1276_v9, %v1257_v63  ;;  %v1205_v20 = vadd.f32 %v1204_v12, %v1203_v4  ;;  %v1266_v21 = vrot.slane %v1265_v13, 2 }
 0x1cc   : > { %v1211_v18 = vadd.f32 %v1210_v10, %v1209_v2  ;;  %v1272_v19 = vrot.slane %v1271_v11, 2  ;;  %v1200_v22 = vrot.slane %v1199_v14, 1  ;;  %v1261_v23 = vadd.f32 %v1260_v15, %v1259_v7 }
 0x1cd   : > { %v1217_v24 = vadd.f32 %v1216_v16, %v1215_v8  ;;  %v1278_v25 = vrot.slane %v1277_v17, 2  ;;  %v1206_v28 = vrot.slane %v1205_v20, 1  ;;  %v1267_v29 = vadd.f32 %v1266_v21, %v1265_v13 }
 0x1ce   : > { %v1212_v26 = vrot.slane %v1211_v18, 1  ;;  %v1273_v27 = vadd.f32 %v1272_v19, %v1271_v11  ;;  %v1201_v30 = vadd.f32 %v1200_v22, %v1199_v14  ;;  %v1262_v31 = vrot.slane %v1261_v23, 1 }
 0x1cf   : > { %v1218_v32 = vrot.slane %v1217_v24, 1  ;;  %v1279_v33 = vadd.f32 %v1278_v25, %v1277_v17  ;;  %v1207_v36 = vadd.f32 %v1206_v28, %v1205_v20  ;;  %v1268_v37 = vrot.slane %v1267_v29, 1 }
 0x1d0   : > { %v1213_v34 = vadd.f32 %v1212_v26, %v1211_v18  ;;  %v1274_v35 = vrot.slane %v1273_v27, 1  ;;  %v1263_v38 = vadd.f32 %v1262_v31, %v1261_v23 }
 0x1d1   : > { %v1219_v39 = vadd.f32 %v1218_v32, %v1217_v24  ;;  %v1280_v40 = vrot.slane %v1279_v33, 1  ;;  %v1224_v42 = vcombine.low %v1201_v30, %v1207_v36  ;;  %v1269_v43 = vadd.f32 %v1268_v37, %v1267_v29 }
 0x1d2   : > { %v1275_v41 = vadd.f32 %v1274_v35, %v1273_v27 }
 0x1d3   : > { %v1225_v44 = vcombine.low %v1213_v34, %v1219_v39  ;;  %v1281_v45 = vadd.f32 %v1280_v40, %v1279_v33  ;;  %v1232_v47 = vrot.slane %v1224_v42, %v2120_v56  ;;  %v1286_v48 = vcombine.low %v1263_v38, %v1269_v43 }
 0x1d5   : > { %v1239_v49 = vrot.slane %v1225_v44, %v2120_v56  ;;  %v1287_v50 = vcombine.low %v1275_v41, %v1281_v45  ;;  %v1294_v51 = vrot.slane %v1286_v48, %v2120_v56 }
 0x1d7   : > { %v1240_v52 = vcombine.low %v1232_v47, %v1239_v49  ;;  %v1301_v53 = vrot.slane %v1287_v50, %v2120_v56 }
 0x1d9   : > { %v1247_v55 = vrot.slane %v1240_v52, %v2120_v56  ;;  %v1302_v1 = vcombine.low %v1294_v51, %v1301_v53 }
 0x1db   : > { %v1249_v58 = vadd.f32 %v1247_v55, %v1195_v54  ;;  %v1309_v59 = vrot.slane %v1302_v1, %v2120_v56 }
 0x1dd   : > { %1252 = vst.msk [vmem:[%s2095_s26] sm:$0xf] %vm2098_vm3, %v1249_v58  ;;  %v1311_v60 = vadd.f32 %v1309_v59, %v1253_v57 }
 0x1df   : > { %1312 = vst.msk [vmem:[%s2109_s29] sm:$0xf] %vm2098_vm3, %v1311_v60 }
 0x1e0 PF: > { %s18_s23 = sadd.s32 1, %s1973_s23   ;;  %s2162_s21 = smov %s1969_s22 }
 0x1e1   : > { %p15_p4 = scmp.ge.s32.totalorder %s18_s23, 4   ;;  %s2163_s22 = smov %s2165_s3 }
 0x1e3   :  { %17 = sbr.rel (!%p15_p4) target bundleno = 2 (0x2), region = 102 }
 0x1ea   :  { %1370 = vsyncpa [#allocation4], 1 }
 0x1eb   :  { %1372 = vsyncpa [#allocation4 + $0x1], 1 }

// kernel: up3d_forward.3
= control target key start
LH: loop header
LB: loop body
LE: loop exit
PB: predicated region body
PF: predicated region fallthrough
CT: control target
= control target key end

     0   :  { %s3753_s21 = smov 0   ;;  %s3755_s22 = smov 0   ;;  %s6189_s0 = inlined_call_operand.vmem [shape: f32[2,8,512], index: 0, kind: input, shape index: {}]   ;;  %s6190_s1 = inlined_call_operand.vmem [shape: f32[3,512,512], index: 1, kind: input, shape index: {}]   ;;  %s6191_s2 = inlined_call_operand.vmem [shape: f32[1,512], index: 2, kind: input, shape index: {}]   ;;  %s6192_s3 = inlined_call_operand.vmem [shape: f32[1,512], index: 3, kind: input, shape index: {}]   ;;  %s6193_s4 = inlined_call_operand.vmem [shape: f32[2,8,512], index: 4, kind: output, shape index: {0}]   ;;  %s6194_s5 = inlined_call_operand.vmem [shape: f32[2,1,512], index: 5, kind: output, shape index: {1}]   ;;  %s6195_s6 = inlined_call_operand.vmem [shape: f32[2,1,512], index: 6, kind: output, shape index: {2}]  }
   0x1   :  { %s3757_s23 = smov 0  }
   0x2 LB: > { %s29_s24 = sadd.s32 1, %s3710_s22  ;;  %p2355_p0 = scmp.ge.s32.totalorder %s3714_s23, 1  ;;  %s3714_s23 = sphi %s3757_s23, %s17_s23   ;;  %s3710_s22 = sphi %s3755_s22, %s6199_s22   ;;  %s3706_s21 = sphi %s3753_s21, %s6198_s21  }
   0x3   : > { %p31_p1 = scmp.ge.s32.totalorder %s29_s24, 2  ;;  %p231_p2 = scmp.lt.s32.totalorder %s3714_s23, 3 }
   0x5   : > { %s6201_s24 = smov (%p31_p1, %s29_s24), 0  ;;  %p232_p3 = pnand %p2355_p0, %p231_p2 }
   0x6   : > { %v2363_v0 = vld [vmem:[%s6190_s1 + $0x808] sm:$0xff] (!%p232_p3)  ;;  %v2365_v2 = vld [vmem:[%s6190_s1 + $0x818] sm:$0xff] (!%p232_p3)  ;;  %v2362_v5 = vld [vmem:[%s6190_s1 + $0x800] sm:$0xff] (!%p232_p3)  ;;  %p273_p4 = scmp.lt.s32.totalorder (!%p232_p3), %s3706_s21, 1  ;;  %vm917_vm1 = vcmask (!%p232_p3), 1046528   ;;  %vm1775_vm2 = vcmask (!%p232_p3), 1045504  }
   0x7   : > { %235 = sbr.rel (%p232_p3) target bundleno = 633 (0x279), region = 36  ;;  %v2367_v1 = vld [vmem:[%s6190_s1 + $0x828] sm:$0xff] (!%p232_p3)  ;;  %v2369_v4 = vld [vmem:[%s6190_s1 + $0x838] sm:$0xff] (!%p232_p3)  ;;  %v2366_v6 = vld [vmem:[%s6190_s1 + $0x820] sm:$0xff] (!%p232_p3) }
   0x8   : > { %v2878_v3 = vpack.c.bf16 (!%p232_p3), %v2367_v1, %v2363_v0  ;;  %v3006_v7 = vpack.c.bf16 (!%p232_p3), %v2369_v4, %v2365_v2  ;;  %v2880_v8 = vpack.c.bf16 (!%p232_p3), %v2366_v6, %v2362_v5  ;;  %v2364_v9 = vld [vmem:[%s6190_s1 + $0x810] sm:$0xff] (!%p232_p3)  ;;  %v2371_v11 = vld [vmem:[%s6190_s1 + $0x848] sm:$0xff] (!%p232_p3)  ;;  %v2373_v14 = vld [vmem:[%s6190_s1 + $0x858] sm:$0xff] (!%p232_p3) }
   0x9   : > { %v2368_v10 = vld [vmem:[%s6190_s1 + $0x830] sm:$0xff] (!%p232_p3)  ;;  %v2375_v13 = vld [vmem:[%s6190_s1 + $0x868] sm:$0xff] (!%p232_p3)  ;;  %v2377_v15 = vld [vmem:[%s6190_s1 + $0x878] sm:$0xff] (!%p232_p3) }
   0xa   : > { %2879 = vmatprep.subr.bf16.mxu0 (!%p232_p3), %v2878_v3  ;;  %v3008_v12 = vpack.c.bf16 (!%p232_p3), %v2368_v10, %v2364_v9  ;;  %3007 = vmatprep.subr.bf16.mxu1 (!%p232_p3), %v3006_v7  ;;  %v2882_v16 = vpack.c.bf16 (!%p232_p3), %v2375_v13, %v2371_v11  ;;  %v3010_v17 = vpack.c.bf16 (!%p232_p3), %v2377_v15, %v2373_v14  ;;  %v2370_v18 = vld [vmem:[%s6190_s1 + $0x840] sm:$0xff] (!%p232_p3)  ;;  %v2372_v20 = vld [vmem:[%s6190_s1 + $0x850] sm:$0xff] (!%p232_p3)  ;;  %v2379_v23 = vld [vmem:[%s6190_s1 + $0x888] sm:$0xff] (!%p232_p3) }
   0xb   : > { %2881 = vmatpush1.bf16.msra.mxu0 (!%p232_p3), %v2880_v8  ;;  %v2374_v19 = vld [vmem:[%s6190_s1 + $0x860] sm:$0xff] (!%p232_p3)  ;;  %v2376_v22 = vld [vmem:[%s6190_s1 + $0x870] sm:$0xff] (!%p232_p3)  ;;  %v2383_v24 = vld [vmem:[%s6190_s1 + $0x8a8] sm:$0xff] (!%p232_p3) }
   0xc   : > { %3009 = vmatpush1.bf16.msra.mxu1 (!%p232_p3), %v3008_v12  ;;  %v2884_v21 = vpack.c.bf16 (!%p232_p3), %v2374_v19, %v2370_v18  ;;  %2883 = vmatprep.subr.bf16.mxu0 (!%p232_p3), %v2882_v16  ;;  %v3012_v25 = vpack.c.bf16 (!%p232_p3), %v2376_v22, %v2372_v20  ;;  %v2886_v26 = vpack.c.bf16 (!%p232_p3), %v2383_v24, %v2379_v23  ;;  %v2381_v27 = vld [vmem:[%s6190_s1 + $0x898] sm:$0xff] (!%p232_p3)  ;;  %v2378_v29 = vld [vmem:[%s6190_s1 + $0x880] sm:$0xff] (!%p232_p3)  ;;  %v2380_v32 = vld [vmem:[%s6190_s1 + $0x890] sm:$0xff] (!%p232_p3) }
   0xd   : > { %3011 = vmatprep.subr.bf16.mxu1 (!%p232_p3), %v3010_v17  ;;  %v2385_v28 = vld [vmem:[%s6190_s1 + $0x8b8] sm:$0xff] (!%p232_p3)  ;;  %v2382_v31 = vld [vmem:[%s6190_s1 + $0x8a0] sm:$0xff] (!%p232_p3)  ;;  %v2384_v33 = vld [vmem:[%s6190_s1 + $0x8b0] sm:$0xff] (!%p232_p3) }
   0xe   : > { %v3014_v30 = vpack.c.bf16 %v2385_v28, %v2381_v27  ;;  %v2888_v34 = vpack.c.bf16 %v2382_v31, %v2378_v29  ;;  %v2387_v35 = vld [vmem:[%s6190_s1 + $0x8c8] sm:$0xff]  ;;  %v2389_v37 = vld [vmem:[%s6190_s1 + $0x8d8] sm:$0xff]  ;;  %v3016_v38 = vpack.c.bf16 %v2384_v33, %v2380_v32  ;;  %v2386_v41 = vld [vmem:[%s6190_s1 + $0x8c0] sm:$0xff]  ;;  %s6203_s21 = smov (!%p273_p4, %s3706_s21), 1 }
   0xf   : > { %2885 = vmatpush1.bf16.msra.mxu0 %v2884_v21  ;;  %v2391_v36 = vld [vmem:[%s6190_s1 + $0x8e8] sm:$0xff]  ;;  %v2393_v40 = vld [vmem:[%s6190_s1 + $0x8f8] sm:$0xff]  ;;  %v2390_v42 = vld [vmem:[%s6190_s1 + $0x8e0] sm:$0xff]  ;;  %s2876_s15 = sshll.u32 %s6203_s21, 5  ;;  %s2360_s7 = sshll.u32 %s6203_s21, 2 }
  0x10   : > { %3013 = vmatpush1.bf16.msra.mxu1 %v3012_v25  ;;  %2887 = vmatprep.subr.bf16.mxu0 %v2886_v26  ;;  %v2890_v39 = vpack.c.bf16 %v2391_v36, %v2387_v35  ;;  %v3018_v43 = vpack.c.bf16 %v2393_v40, %v2389_v37  ;;  %v2388_v44 = vld [vmem:[%s6190_s1 + $0x8d0] sm:$0xff]  ;;  %v2395_v46 = vld [vmem:[%s6190_s1 + $0x908] sm:$0xff]  ;;  %v2397_v48 = vld [vmem:[%s6190_s1 + $0x918] sm:$0xff]  ;;  %v2892_v50 = vpack.c.bf16 %v2390_v42, %v2386_v41  ;;  %s4070_s12 = scalar_lea.vmem %s6189_s0, %s2876_s15  ;;  %s6143_s10 = scalar_lea.vmem %s6194_s5, %s2360_s7 }
  0x11   : > { %3015 = vmatprep.subr.bf16.mxu1 %v3014_v30  ;;  %v2392_v45 = vld [vmem:[%s6190_s1 + $0x8f0] sm:$0xff]  ;;  %v2399_v47 = vld [vmem:[%s6190_s1 + $0x928] sm:$0xff]  ;;  %v2401_v49 = vld [vmem:[%s6190_s1 + $0x938] sm:$0xff]  ;;  %s6152_s14 = scalar_lea.vmem %s6195_s6, %s2360_s7  ;;  %s286_s18 = scalar_lea.vmem %s6193_s4, %s2876_s15 }
  0x12   : > { %v3020_v51 = vpack.c.bf16 %v2392_v45, %v2388_v44  ;;  %v2894_v52 = vpack.c.bf16 %v2399_v47, %v2395_v46  ;;  %v2394_v53 = vld [vmem:[%s6190_s1 + $0x900] sm:$0xff]  ;;  %v2396_v55 = vld [vmem:[%s6190_s1 + $0x910] sm:$0xff]  ;;  %v3022_v56 = vpack.c.bf16 %v2401_v49, %v2397_v48  ;;  %v2403_v58 = vld [vmem:[%s6190_s1 + $0x948] sm:$0xff]  ;;  %v295_v47 = vlaneseq }
  0x13   : > { %2889 = vmatpush1.bf16.msra.mxu0 %v2888_v34  ;;  %v2398_v54 = vld [vmem:[%s6190_s1 + $0x920] sm:$0xff]  ;;  %v2400_v57 = vld [vmem:[%s6190_s1 + $0x930] sm:$0xff]  ;;  %v2407_v59 = vld [vmem:[%s6190_s1 + $0x968] sm:$0xff] }
  0x14   : > { %3017 = vmatpush1.bf16.msra.mxu1 %v3016_v38  ;;  %2891 = vmatprep.subr.bf16.mxu0 %v2890_v39  ;;  %v2405_v60 = vld [vmem:[%s6190_s1 + $0x958] sm:$0xff]  ;;  %v2896_v62 = vpack.c.bf16 %v2398_v54, %v2394_v53  ;;  %v3024_v63 = vpack.c.bf16 %v2400_v57, %v2396_v55  ;;  %v2898_v0 = vpack.c.bf16 %v2407_v59, %v2403_v58  ;;  %v2402_v1 = vld [vmem:[%s6190_s1 + $0x940] sm:$0xff]  ;;  %v2404_v3 = vld [vmem:[%s6190_s1 + $0x950] sm:$0xff]  ;;  %vm4211_vm0 = vcmp.lt.s32.totalorder %v295_v47, 512 }
  0x15   : > { %3019 = vmatprep.subr.bf16.mxu1 %v3018_v43  ;;  %v2409_v61 = vld [vmem:[%s6190_s1 + $0x978] sm:$0xff]  ;;  %v2406_v2 = vld [vmem:[%s6190_s1 + $0x960] sm:$0xff]  ;;  %v2408_v5 = vld [vmem:[%s6190_s1 + $0x970] sm:$0xff] }
  0x16   : > { %v3026_v4 = vpack.c.bf16 %v2409_v61, %v2405_v60  ;;  %v2411_v6 = vld [vmem:[%s6190_s1 + $0x988] sm:$0xff]  ;;  %v2413_v8 = vld [vmem:[%s6190_s1 + $0x998] sm:$0xff]  ;;  %v2900_v10 = vpack.c.bf16 %v2406_v2, %v2402_v1  ;;  %v3028_v11 = vpack.c.bf16 %v2408_v5, %v2404_v3  ;;  %v2410_v13 = vld [vmem:[%s6190_s1 + $0x980] sm:$0xff]  ;;  %v4032_v60 = vshrl.u32 %v295_v47, 7 }
  0x17   : > { %2893 = vmatpush1.bf16.msra.mxu0 %v2892_v50  ;;  %v2415_v7 = vld [vmem:[%s6190_s1 + $0x9a8] sm:$0xff]  ;;  %v2417_v9 = vld [vmem:[%s6190_s1 + $0x9b8] sm:$0xff]  ;;  %v2414_v14 = vld [vmem:[%s6190_s1 + $0x9a0] sm:$0xff] }
  0x18   : > { %3021 = vmatpush1.bf16.msra.mxu1 %v3020_v51  ;;  %2895 = vmatprep.subr.bf16.mxu0 %v2894_v52  ;;  %v2902_v12 = vpack.c.bf16 %v2415_v7, %v2411_v6  ;;  %v2412_v15 = vld [vmem:[%s6190_s1 + $0x990] sm:$0xff]  ;;  %v3030_v16 = vpack.c.bf16 %v2417_v9, %v2413_v8  ;;  %v2419_v18 = vld [vmem:[%s6190_s1 + $0x9c8] sm:$0xff]  ;;  %v2421_v20 = vld [vmem:[%s6190_s1 + $0x9d8] sm:$0xff]  ;;  %v2904_v22 = vpack.c.bf16 %v2414_v14, %v2410_v13 }
  0x19   : > { %3023 = vmatprep.subr.bf16.mxu1 %v3022_v56  ;;  %v2416_v17 = vld [vmem:[%s6190_s1 + $0x9b0] sm:$0xff]  ;;  %v2423_v19 = vld [vmem:[%s6190_s1 + $0x9e8] sm:$0xff]  ;;  %v2425_v21 = vld [vmem:[%s6190_s1 + $0x9f8] sm:$0xff] }
  0x1a   : > { %v3032_v23 = vpack.c.bf16 %v2416_v17, %v2412_v15  ;;  %v2906_v24 = vpack.c.bf16 %v2423_v19, %v2419_v18  ;;  %v2418_v25 = vld [vmem:[%s6190_s1 + $0x9c0] sm:$0xff]  ;;  %v2420_v27 = vld [vmem:[%s6190_s1 + $0x9d0] sm:$0xff]  ;;  %v3034_v28 = vpack.c.bf16 %v2425_v21, %v2421_v20  ;;  %v2427_v30 = vld [vmem:[%s6190_s1 + $0xa08] sm:$0xff] }
  0x1b   : > { %2897 = vmatpush1.bf16.msra.mxu0 %v2896_v62  ;;  %v2422_v26 = vld [vmem:[%s6190_s1 + $0x9e0] sm:$0xff]  ;;  %v2424_v29 = vld [vmem:[%s6190_s1 + $0x9f0] sm:$0xff]  ;;  %v2431_v31 = vld [vmem:[%s6190_s1 + $0xa28] sm:$0xff] }
  0x1c   : > { %3025 = vmatpush1.bf16.msra.mxu1 %v3024_v63  ;;  %2899 = vmatprep.subr.bf16.mxu0 %v2898_v0  ;;  %v2429_v32 = vld [vmem:[%s6190_s1 + $0xa18] sm:$0xff]  ;;  %v2908_v34 = vpack.c.bf16 %v2422_v26, %v2418_v25  ;;  %v3036_v35 = vpack.c.bf16 %v2424_v29, %v2420_v27  ;;  %v2910_v36 = vpack.c.bf16 %v2431_v31, %v2427_v30  ;;  %v2426_v37 = vld [vmem:[%s6190_s1 + $0xa00] sm:$0xff]  ;;  %v2428_v39 = vld [vmem:[%s6190_s1 + $0xa10] sm:$0xff] }
  0x1d   : > { %3027 = vmatprep.subr.bf16.mxu1 %v3026_v4  ;;  %v2433_v33 = vld [vmem:[%s6190_s1 + $0xa38] sm:$0xff]  ;;  %v2430_v38 = vld [vmem:[%s6190_s1 + $0xa20] sm:$0xff]  ;;  %v2432_v41 = vld [vmem:[%s6190_s1 + $0xa30] sm:$0xff] }
  0x1e   : > { %v3038_v40 = vpack.c.bf16 %v2433_v33, %v2429_v32  ;;  %v2435_v42 = vld [vmem:[%s6190_s1 + $0xa48] sm:$0xff]  ;;  %v2437_v44 = vld [vmem:[%s6190_s1 + $0xa58] sm:$0xff]  ;;  %v2912_v46 = vpack.c.bf16 %v2430_v38, %v2426_v37  ;;  %v3040_v48 = vpack.c.bf16 %v2432_v41, %v2428_v39  ;;  %v2434_v50 = vld [vmem:[%s6190_s1 + $0xa40] sm:$0xff] }
  0x1f   : > { %2901 = vmatpush1.bf16.msra.mxu0 %v2900_v10  ;;  %v2439_v43 = vld [vmem:[%s6190_s1 + $0xa68] sm:$0xff]  ;;  %v2441_v45 = vld [vmem:[%s6190_s1 + $0xa78] sm:$0xff]  ;;  %v2438_v51 = vld [vmem:[%s6190_s1 + $0xa60] sm:$0xff] }
  0x20   : > { %3029 = vmatpush1.bf16.msra.mxu1 %v3028_v11  ;;  %2903 = vmatprep.subr.bf16.mxu0 %v2902_v12  ;;  %v2914_v49 = vpack.c.bf16 %v2439_v43, %v2435_v42  ;;  %v2436_v52 = vld [vmem:[%s6190_s1 + $0xa50] sm:$0xff]  ;;  %v3042_v53 = vpack.c.bf16 %v2441_v45, %v2437_v44  ;;  %v2443_v55 = vld [vmem:[%s6190_s1 + $0xa88] sm:$0xff]  ;;  %v2445_v57 = vld [vmem:[%s6190_s1 + $0xa98] sm:$0xff]  ;;  %v2916_v59 = vpack.c.bf16 %v2438_v51, %v2434_v50  ;;  %v313_v11 = vsub.s32 1, %v4032_v60 }
  0x21   : > { %3031 = vmatprep.subr.bf16.mxu1 %v3030_v16  ;;  %v2440_v54 = vld [vmem:[%s6190_s1 + $0xa70] sm:$0xff]  ;;  %v2447_v56 = vld [vmem:[%s6190_s1 + $0xaa8] sm:$0xff]  ;;  %v2449_v58 = vld [vmem:[%s6190_s1 + $0xab8] sm:$0xff]  ;;  %v309_v12 = vsub.s32 0, %v4032_v60 }
  0x22   : > { %v3044_v61 = vpack.c.bf16 %v2440_v54, %v2436_v52  ;;  %v2918_v62 = vpack.c.bf16 %v2447_v56, %v2443_v55  ;;  %v2442_v63 = vld [vmem:[%s6190_s1 + $0xa80] sm:$0xff]  ;;  %v2444_v1 = vld [vmem:[%s6190_s1 + $0xa90] sm:$0xff]  ;;  %v3046_v2 = vpack.c.bf16 %v2449_v58, %v2445_v57  ;;  %v2451_v4 = vld [vmem:[%s6190_s1 + $0xac8] sm:$0xff] }
  0x23   : > { %2905 = vmatpush1.bf16.msra.mxu0 %v2904_v22  ;;  %v2446_v0 = vld [vmem:[%s6190_s1 + $0xaa0] sm:$0xff]  ;;  %v2448_v3 = vld [vmem:[%s6190_s1 + $0xab0] sm:$0xff]  ;;  %v2455_v5 = vld [vmem:[%s6190_s1 + $0xae8] sm:$0xff] }
  0x24   : > { %3033 = vmatpush1.bf16.msra.mxu1 %v3032_v23  ;;  %2907 = vmatprep.subr.bf16.mxu0 %v2906_v24  ;;  %v2453_v6 = vld [vmem:[%s6190_s1 + $0xad8] sm:$0xff]  ;;  %v2920_v8 = vpack.c.bf16 %v2446_v0, %v2442_v63  ;;  %v2450_v9 = vld [vmem:[%s6190_s1 + $0xac0] sm:$0xff]  ;;  %v3048_v13 = vpack.c.bf16 %v2448_v3, %v2444_v1  ;;  %v2922_v14 = vpack.c.bf16 %v2455_v5, %v2451_v4  ;;  %v2452_v15 = vld [vmem:[%s6190_s1 + $0xad0] sm:$0xff] }
  0x25   : > { %3035 = vmatprep.subr.bf16.mxu1 %v3034_v28  ;;  %v2457_v7 = vld [vmem:[%s6190_s1 + $0xaf8] sm:$0xff]  ;;  %v2454_v10 = vld [vmem:[%s6190_s1 + $0xae0] sm:$0xff]  ;;  %v2456_v16 = vld [vmem:[%s6190_s1 + $0xaf0] sm:$0xff] }
  0x26   : > { %v2459_v17 = vld [vmem:[%s6190_s1 + $0xb08] sm:$0xff]  ;;  %v3050_v18 = vpack.c.bf16 %v2457_v7, %v2453_v6  ;;  %v2461_v20 = vld [vmem:[%s6190_s1 + $0xb18] sm:$0xff]  ;;  %v2924_v22 = vpack.c.bf16 %v2454_v10, %v2450_v9  ;;  %v4096_v24 = vld [vmem:[%s6191_s2] sm:$0xf]  ;;  %v3052_v31 = vpack.c.bf16 %v2456_v16, %v2452_v15 }
  0x27   : > { %2909 = vmatpush1.bf16.msra.mxu0 %v2908_v34  ;;  %v2463_v19 = vld [vmem:[%s6190_s1 + $0xb28] sm:$0xff]  ;;  %v2465_v21 = vld [vmem:[%s6190_s1 + $0xb38] sm:$0xff]  ;;  %v4101_v25 = vld [vmem:[%s6192_s3] sm:$0xf]  ;;  %v314_v27 = vrot.slane %v4096_v24, %v313_v11  ;;  %v310_v29 = vrot.slane %v4096_v24, %v309_v12 }
  0x28   : > { %3037 = vmatpush1.bf16.msra.mxu1 %v3036_v35  ;;  %2911 = vmatprep.subr.bf16.mxu0 %v2910_v36  ;;  %v302_v23 = vld [vmem:[%s4070_s12 + $0x8] sm:$0xff]  ;;  %v2458_v26 = vld [vmem:[%s6190_s1 + $0xb00] sm:$0xff]  ;;  %v340_v28 = vrot.slane %v4101_v25, %v313_v11  ;;  %v336_v30 = vrot.slane %v4101_v25, %v309_v12  ;;  %v2926_v32 = vpack.c.bf16 %v2463_v19, %v2459_v17  ;;  %v2460_v34 = vld [vmem:[%s6190_s1 + $0xb10] sm:$0xff] }
  0x29   : > { %3039 = vmatprep.subr.bf16.mxu1 %v3038_v40  ;;  %v2462_v33 = vld [vmem:[%s6190_s1 + $0xb20] sm:$0xff]  ;;  %v3054_v36 = vpack.c.bf16 %v2465_v21, %v2461_v20  ;;  %v2464_v37 = vld [vmem:[%s6190_s1 + $0xb30] sm:$0xff]  ;;  %v2467_v38 = vld [vmem:[%s6190_s1 + $0xb48] sm:$0xff]  ;;  %v328_v40 = vmul.f32 %v314_v27, %v302_v23 }
  0x2a   : > { %v301_v35 = vld [vmem:[%s4070_s12] sm:$0xff]  ;;  %v2471_v39 = vld [vmem:[%s6190_s1 + $0xb68] sm:$0xff]  ;;  %v2469_v42 = vld [vmem:[%s6190_s1 + $0xb58] sm:$0xff]  ;;  %v2928_v44 = vpack.c.bf16 %v2462_v33, %v2458_v26  ;;  %v3716_v33 = vmov 0.0  }
  0x2b   : > { %2913 = vmatpush1.bf16.msra.mxu0 %v2912_v46  ;;  %v327_v41 = vmul.f32 %v310_v29, %v301_v35  ;;  %v2473_v43 = vld [vmem:[%s6190_s1 + $0xb78] sm:$0xff]  ;;  %v354_v45 = vadd.f32 %v340_v28, %v328_v40  ;;  %v2466_v50 = vld [vmem:[%s6190_s1 + $0xb40] sm:$0xff]  ;;  %v2468_v52 = vld [vmem:[%s6190_s1 + $0xb50] sm:$0xff]  ;;  %299 = vst.msk [vmem:[#allocation2] ss:$8 sm:$0xf] %vm4211_vm0, %v3716_v33 }
  0x2c   : > { %3041 = vmatpush1.bf16.msra.mxu1 %v3040_v48  ;;  %2915 = vmatprep.subr.bf16.mxu0 %v2914_v49  ;;  %v3056_v48 = vpack.c.bf16 %v2464_v37, %v2460_v34  ;;  %v2930_v49 = vpack.c.bf16 %v2471_v39, %v2467_v38  ;;  %v2470_v51 = vld [vmem:[%s6190_s1 + $0xb60] sm:$0xff]  ;;  %v2472_v54 = vld [vmem:[%s6190_s1 + $0xb70] sm:$0xff]  ;;  %v2475_v55 = vld [vmem:[%s6190_s1 + $0xb88] sm:$0xff]  ;;  %382 = vst.msk [vmem:[#allocation2 + $0x21] ss:$8 sm:$0xf] %vm4211_vm0, %v3716_v33 }
  0x2d   : > { %3043 = vmatprep.subr.bf16.mxu1 %v3042_v53  ;;  %v353_v46 = vadd.f32 %v336_v30, %v327_v41  ;;  %v3058_v53 = vpack.c.bf16 %v2473_v43, %v2469_v42  ;;  %v2479_v56 = vld [vmem:[%s6190_s1 + $0xba8] sm:$0xff]  ;;  %v358_v57 = vmax.f32 %v354_v45, 0.0  ;;  %v3060_v1 = vpack.c.bf16 %v2472_v54, %v2468_v52  ;;  %v2474_v3 = vld [vmem:[%s6190_s1 + $0xb80] sm:$0xff]  ;;  %v2476_v5 = vld [vmem:[%s6190_s1 + $0xb90] sm:$0xff]  ;;  %2088 = vst.msk [vmem:[%s6143_s10] sm:$0xf] %vm4211_vm0, %v3716_v33 }
  0x2e   : > { %v2478_v4 = vld [vmem:[%s6190_s1 + $0xba0] sm:$0xff]  ;;  %v2480_v7 = vld [vmem:[%s6190_s1 + $0xbb0] sm:$0xff]  ;;  %v2487_v9 = vld [vmem:[%s6190_s1 + $0xbe8] sm:$0xff]  ;;  %2089 = vst.msk [vmem:[%s6152_s14] sm:$0xf] %vm4211_vm0, %v3716_v33 }
  0x2f   : > { %2917 = vmatpush1.bf16.msra.mxu0 %v2916_v59  ;;  %v357_v58 = vmax.f32 %v353_v46, 0.0  ;;  %v2477_v59 = vld [vmem:[%s6190_s1 + $0xb98] sm:$0xff]  ;;  %v366_v63 = vrot.slane %v358_v57, 7  ;;  %v2936_v12 = vpack.c.bf16 %v2478_v4, %v2474_v3  ;;  %v2486_v16 = vld [vmem:[%s6190_s1 + $0xbe0] sm:$0xff]  ;;  %v2484_v17 = vld [vmem:[%s6190_s1 + $0xbd0] sm:$0xff] }
  0x30   : > { %3045 = vmatpush1.bf16.msra.mxu1 %v3044_v61  ;;  %2919 = vmatprep.subr.bf16.mxu0 %v2918_v62  ;;  %v2481_v61 = vld [vmem:[%s6190_s1 + $0xbb8] sm:$0xff]  ;;  %v2932_v62 = vpack.c.bf16 %v2470_v51, %v2466_v50  ;;  %v2491_v20 = vld [vmem:[%s6190_s1 + $0xc08] sm:$0xff]  ;;  %v2490_v26 = vld [vmem:[%s6190_s1 + $0xc00] sm:$0xff] }
  0x31   : > { %3047 = vmatprep.subr.bf16.mxu1 %v3046_v2  ;;  %v365_v0 = vrot.slane %v357_v58, 7  ;;  %v2934_v2 = vpack.c.bf16 %v2479_v56, %v2475_v55  ;;  %v3062_v6 = vpack.c.bf16 %v2481_v61, %v2477_v59  ;;  %374 = vst [vmem:[#allocation2 + $0x8] sm:$0xfe] %v366_v63  ;;  %378 = vst [vmem:[#allocation2 + $0x28] sm:$0x1] %v366_v63  ;;  %v2485_v10 = vld [vmem:[%s6190_s1 + $0xbd8] sm:$0xff] }
  0x32   : > { %v2489_v11 = vld [vmem:[%s6190_s1 + $0xbf8] sm:$0xff]  ;;  %v2495_v21 = vld [vmem:[%s6190_s1 + $0xc28] sm:$0xff]  ;;  %v2494_v27 = vld [vmem:[%s6190_s1 + $0xc20] sm:$0xff] }
  0x33   : > { %2921 = vmatpush1.bf16.msra.mxu0 %v2920_v8  ;;  %v2483_v8 = vld [vmem:[%s6190_s1 + $0xbc8] sm:$0xff]  ;;  %373 = vst [vmem:[#allocation2] sm:$0xfe] %v365_v0  ;;  %377 = vst [vmem:[#allocation2 + $0x20] sm:$0x1] %v365_v0  ;;  %v3066_v19 = vpack.c.bf16 %v2489_v11, %v2485_v10  ;;  %v2497_v23 = vld [vmem:[%s6190_s1 + $0xc38] sm:$0xff]  ;;  %v2942_v39 = vpack.c.bf16 %v2495_v21, %v2491_v20 }
  0x34   : > { %3049 = vmatpush1.bf16.msra.mxu1 %v3048_v13  ;;  %2923 = vmatprep.subr.bf16.mxu0 %v2922_v14  ;;  %v2482_v13 = vld [vmem:[%s6190_s1 + $0xbc0] sm:$0xff]  ;;  %v3064_v14 = vpack.c.bf16 %v2480_v7, %v2476_v5  ;;  %v2938_v15 = vpack.c.bf16 %v2487_v9, %v2483_v8  ;;  %v2492_v30 = vld [vmem:[%s6190_s1 + $0xc10] sm:$0xff]  ;;  %v2503_v42 = vld [vmem:[%s6190_s1 + $0xc68] sm:$0xff] }
  0x35   : > { %3051 = vmatprep.subr.bf16.mxu1 %v3050_v18  ;;  %v2488_v18 = vld [vmem:[%s6190_s1 + $0xbf0] sm:$0xff]  ;;  %v2940_v29 = vpack.c.bf16 %v2486_v16, %v2482_v13  ;;  %v2501_v45 = vld [vmem:[%s6190_s1 + $0xc58] sm:$0xff]  ;;  %v2502_v54 = vld [vmem:[%s6190_s1 + $0xc60] sm:$0xff] }
  0x36   : > { %v3068_v47 = vpack.c.bf16 %v2488_v18, %v2484_v17  ;;  %v2505_v46 = vld [vmem:[%s6190_s1 + $0xc78] sm:$0xff]  ;;  %v2500_v55 = vld [vmem:[%s6190_s1 + $0xc50] sm:$0xff]  ;;  %v2507_v58 = vld [vmem:[%s6190_s1 + $0xc88] sm:$0xff] }
  0x37   : > { %2925 = vmatpush1.bf16.msra.mxu0 %v2924_v22  ;;  %v2493_v22 = vld [vmem:[%s6190_s1 + $0xc18] sm:$0xff]  ;;  %v3074_v56 = vpack.c.bf16 %v2505_v46, %v2501_v45  ;;  %v2504_v57 = vld [vmem:[%s6190_s1 + $0xc70] sm:$0xff]  ;;  %v2511_v59 = vld [vmem:[%s6190_s1 + $0xca8] sm:$0xff] }
  0x38   : > { %3053 = vmatpush1.bf16.msra.mxu1 %v3052_v31  ;;  %2927 = vmatprep.subr.bf16.mxu0 %v2926_v32  ;;  %v2496_v31 = vld [vmem:[%s6190_s1 + $0xc30] sm:$0xff]  ;;  %v2499_v32 = vld [vmem:[%s6190_s1 + $0xc48] sm:$0xff]  ;;  %v3070_v43 = vpack.c.bf16 %v2497_v23, %v2493_v22  ;;  %v2509_v61 = vld [vmem:[%s6190_s1 + $0xc98] sm:$0xff]  ;;  %v3076_v0 = vpack.c.bf16 %v2504_v57, %v2500_v55 }
  0x39   : > { %3055 = vmatprep.subr.bf16.mxu1 %v3054_v36  ;;  %v645_v34 = vld [vmem:[#allocation2 + $0x8] sm:$0xfe]  ;;  %v649_v35 = vld [vmem:[#allocation2 + $0x28] sm:$0x1]  ;;  %v3072_v51 = vpack.c.bf16 %v2496_v31, %v2492_v30  ;;  %v2946_v52 = vpack.c.bf16 %v2503_v42, %v2499_v32  ;;  %v2510_v3 = vld [vmem:[%s6190_s1 + $0xca0] sm:$0xff] }
  0x3a   : > { %v644_v36 = vld [vmem:[#allocation2] sm:$0xfe]  ;;  %v921_v37 = vrot.slane %v645_v34, 1  ;;  %v922_v38 = vrot.slane %v649_v35, 1  ;;  %v648_v40 = vld [vmem:[#allocation2 + $0x20] sm:$0x1] }
  0x3b   : > { %2929 = vmatpush1.bf16.msra.mxu0 %v2928_v44  ;;  %v918_v41 = vrot.slane %v644_v36, 1  ;;  %v919_v44 = vrot.slane %v648_v40, 1  ;;  %v2508_v4 = vld [vmem:[%s6190_s1 + $0xc90] sm:$0xff]  ;;  %v2515_v7 = vld [vmem:[%s6190_s1 + $0xcc8] sm:$0xff]  ;;  %v2517_v9 = vld [vmem:[%s6190_s1 + $0xcd8] sm:$0xff] }
  0x3c   : > { %3057 = vmatpush1.bf16.msra.mxu1 %v3056_v48  ;;  %2931 = vmatprep.subr.bf16.mxu0 %v2930_v49  ;;  %v923_v48 = vsel %vm917_vm1, %v921_v37, %v922_v38  ;;  %v2944_v49 = vpack.c.bf16 %v2494_v27, %v2490_v26  ;;  %v2519_v8 = vld [vmem:[%s6190_s1 + $0xce8] sm:$0xff]  ;;  %v2521_v10 = vld [vmem:[%s6190_s1 + $0xcf8] sm:$0xff]  ;;  %v2516_v16 = vld [vmem:[%s6190_s1 + $0xcd0] sm:$0xff] }
  0x3d   : > { %3059 = vmatprep.subr.bf16.mxu1 %v3058_v53  ;;  %998 = vmatprep.mubr.f32.mxu0 %v923_v48  ;;  %v920_v50 = vsel %vm917_vm1, %v918_v41, %v919_v44  ;;  %v2498_v53 = vld [vmem:[%s6190_s1 + $0xc40] sm:$0xff]  ;;  %v2954_v13 = vpack.c.bf16 %v2519_v8, %v2515_v7  ;;  %v3082_v17 = vpack.c.bf16 %v2521_v10, %v2517_v9  ;;  %v2520_v18 = vld [vmem:[%s6190_s1 + $0xcf0] sm:$0xff]  ;;  %v2527_v20 = vld [vmem:[%s6190_s1 + $0xd28] sm:$0xff]  ;;  %v321_v44 = vsub.s32 3, %v4032_v60 }
  0x3e   : > { %1140 = vmatprep.mubr.f32.mxu1 %v923_v48  ;;  %v2948_v63 = vpack.c.bf16 %v2502_v54, %v2498_v53  ;;  %v2525_v21 = vld [vmem:[%s6190_s1 + $0xd18] sm:$0xff]  ;;  %v3084_v26 = vpack.c.bf16 %v2520_v18, %v2516_v16  ;;  %v2526_v30 = vld [vmem:[%s6190_s1 + $0xd20] sm:$0xff]  ;;  %v2524_v31 = vld [vmem:[%s6190_s1 + $0xd10] sm:$0xff] }
  0x3f   : > { %2933 = vmatpush1.bf16.msra.mxu0 %v2932_v62  ;;  %v2513_v62 = vld [vmem:[%s6190_s1 + $0xcb8] sm:$0xff]  ;;  %v2531_v34 = vld [vmem:[%s6190_s1 + $0xd48] sm:$0xff]  ;;  %v2530_v41 = vld [vmem:[%s6190_s1 + $0xd40] sm:$0xff] }
  0x40   : > { %3061 = vmatpush1.bf16.msra.mxu1 %v3060_v1  ;;  %2935 = vmatprep.subr.bf16.mxu0 %v2934_v2  ;;  %v2950_v1 = vpack.c.bf16 %v2511_v59, %v2507_v58  ;;  %v2506_v2 = vld [vmem:[%s6190_s1 + $0xc80] sm:$0xff]  ;;  %v3078_v5 = vpack.c.bf16 %v2513_v62, %v2509_v61  ;;  %v2529_v22 = vld [vmem:[%s6190_s1 + $0xd38] sm:$0xff]  ;;  %v2535_v35 = vld [vmem:[%s6190_s1 + $0xd68] sm:$0xff]  ;;  %v322_v59 = vrot.slane %v4096_v24, %v321_v44 }
  0x41   : > { %3063 = vmatprep.subr.bf16.mxu1 %v3062_v6  ;;  %v2512_v6 = vld [vmem:[%s6190_s1 + $0xcb0] sm:$0xff]  ;;  %v2952_v11 = vpack.c.bf16 %v2510_v3, %v2506_v2  ;;  %v3086_v32 = vpack.c.bf16 %v2529_v22, %v2525_v21  ;;  %v2533_v36 = vld [vmem:[%s6190_s1 + $0xd58] sm:$0xff]  ;;  %v2962_v40 = vpack.c.bf16 %v2535_v35, %v2531_v34  ;;  %v2534_v42 = vld [vmem:[%s6190_s1 + $0xd60] sm:$0xff]  ;;  %v348_v3 = vrot.slane %v4101_v25, %v321_v44 }
  0x42   : > { %v2537_v37 = vld [vmem:[%s6190_s1 + $0xd78] sm:$0xff]  ;;  %v2536_v46 = vld [vmem:[%s6190_s1 + $0xd70] sm:$0xff]  ;;  %v2539_v48 = vld [vmem:[%s6190_s1 + $0xd88] sm:$0xff]  ;;  %v2964_v53 = vpack.c.bf16 %v2534_v42, %v2530_v41 }
  0x43   : > { %2937 = vmatpush1.bf16.msra.mxu0 %v2936_v12  ;;  %v3080_v12 = vpack.c.bf16 %v2512_v6, %v2508_v4  ;;  %v3090_v45 = vpack.c.bf16 %v2537_v37, %v2533_v36  ;;  %v2542_v57 = vld [vmem:[%s6190_s1 + $0xda0] sm:$0xff]  ;;  %v2540_v58 = vld [vmem:[%s6190_s1 + $0xd90] sm:$0xff]  ;;  %v2553_v2 = vld [vmem:[%s6190_s1 + $0xdf8] sm:$0xff] }
  0x44   : > { %3065 = vmatpush1.bf16.msra.mxu1 %v3064_v14  ;;  %2939 = vmatprep.subr.bf16.mxu0 %v2938_v15  ;;  %v2514_v14 = vld [vmem:[%s6190_s1 + $0xcc0] sm:$0xff]  ;;  %v2544_v62 = vld [vmem:[%s6190_s1 + $0xdb0] sm:$0xff]  ;;  %v304_v7 = vld [vmem:[%s4070_s12 + $0x18] sm:$0xff] }
  0x45   : > { %3067 = vmatprep.subr.bf16.mxu1 %v3066_v19  ;;  %v2518_v15 = vld [vmem:[%s6190_s1 + $0xce0] sm:$0xff]  ;;  %v2523_v19 = vld [vmem:[%s6190_s1 + $0xd08] sm:$0xff]  ;;  %v3096_v9 = vpack.c.bf16 %v2544_v62, %v2540_v58  ;;  %v303_v16 = vld [vmem:[%s4070_s12 + $0x10] sm:$0xff] }
  0x46   : > { %v2956_v23 = vpack.c.bf16 %v2518_v15, %v2514_v14  ;;  %v2958_v27 = vpack.c.bf16 %v2527_v20, %v2523_v19  ;;  %v2546_v6 = vld [vmem:[%s6190_s1 + $0xdc0] sm:$0xff]  ;;  %v2559_v15 = vld [vmem:[%s6190_s1 + $0xe28] sm:$0xff]  ;;  %v2561_v18 = vld [vmem:[%s6190_s1 + $0xe38] sm:$0xff] }
  0x47   : > { %2941 = vmatpush1.bf16.msra.mxu0 %v2940_v29  ;;  %v2522_v29 = vld [vmem:[%s6190_s1 + $0xd00] sm:$0xff]  ;;  %v2563_v34 = vld [vmem:[%s6190_s1 + $0xe48] sm:$0xff]  ;;  %v2565_v36 = vld [vmem:[%s6190_s1 + $0xe58] sm:$0xff] }
  0x48   : > { %3069 = vmatpush1.bf16.msra.mxu1 %v3068_v47  ;;  %2943 = vmatprep.subr.bf16.mxu0 %v2942_v39  ;;  %v2528_v47 = vld [vmem:[%s6190_s1 + $0xd30] sm:$0xff]  ;;  %v2960_v38 = vpack.c.bf16 %v2526_v30, %v2522_v29  ;;  %v2567_v35 = vld [vmem:[%s6190_s1 + $0xe68] sm:$0xff]  ;;  %v2569_v37 = vld [vmem:[%s6190_s1 + $0xe78] sm:$0xff] }
  0x49   : > { %3071 = vmatprep.subr.bf16.mxu1 %v3070_v43  ;;  %v3088_v39 = vpack.c.bf16 %v2528_v47, %v2524_v31  ;;  %v2532_v43 = vld [vmem:[%s6190_s1 + $0xd50] sm:$0xff]  ;;  %v2978_v42 = vpack.c.bf16 %v2567_v35, %v2563_v34  ;;  %v2566_v44 = vld [vmem:[%s6190_s1 + $0xe60] sm:$0xff] }
  0x4a   : > { %999 = vmatmul.mubr.f32.vlgmr.msra.gmra.mrb[0].mxu0 %v920_v50  ;;  %v3092_v54 = vpack.c.bf16 %v2536_v46, %v2532_v43  ;;  %v2556_v29 = vld [vmem:[%s6190_s1 + $0xe10] sm:$0xff]  ;;  %v2562_v43 = vld [vmem:[%s6190_s1 + $0xe40] sm:$0xff] }
  0x4b   : > { %2945 = vmatpush1.bf16.msra.mxu0 %v2944_v49  ;;  %1141 = vmatmul.mubr.f32.vlgmr.msra.gmra.mrb[0].mxu1 %v920_v50  ;;  %v2543_v49 = vld [vmem:[%s6190_s1 + $0xda8] sm:$0xff]  ;;  %v2541_v50 = vld [vmem:[%s6190_s1 + $0xd98] sm:$0xff]  ;;  %v2560_v47 = vld [vmem:[%s6190_s1 + $0xe30] sm:$0xff] }
  0x4c   : > { %3073 = vmatpush1.bf16.msra.mxu1 %v3072_v51  ;;  %2947 = vmatprep.subr.bf16.mxu0 %v2946_v52  ;;  %v2545_v51 = vld [vmem:[%s6190_s1 + $0xdb8] sm:$0xff]  ;;  %v317_v52 = vsub.s32 2, %v4032_v60  ;;  %v2966_v55 = vpack.c.bf16 %v2543_v49, %v2539_v48  ;;  %v3104_v41 = vpack.c.bf16 %v2560_v47, %v2556_v29  ;;  %v3106_v48 = vpack.c.bf16 %v2569_v37, %v2565_v36  ;;  %v2568_v49 = vld [vmem:[%s6190_s1 + $0xe70] sm:$0xff]  ;;  %v2574_v58 = vld [vmem:[%s6190_s1 + $0xea0] sm:$0xff] }
  0x4d   : > { %3075 = vmatprep.subr.bf16.mxu1 %v3074_v56  ;;  %v2538_v56 = vld [vmem:[%s6190_s1 + $0xd80] sm:$0xff]  ;;  %v3094_v61 = vpack.c.bf16 %v2545_v51, %v2541_v50  ;;  %v2571_v50 = vld [vmem:[%s6190_s1 + $0xe88] sm:$0xff]  ;;  %v2576_v62 = vld [vmem:[%s6190_s1 + $0xeb0] sm:$0xff] }
  0x4e   : > { %v318_v4 = vrot.slane %v4096_v24, %v317_v52  ;;  %v344_v8 = vrot.slane %v4101_v25, %v317_v52  ;;  %v2548_v24 = vld [vmem:[%s6190_s1 + $0xdd0] sm:$0xff]  ;;  %v2555_v25 = vld [vmem:[%s6190_s1 + $0xe08] sm:$0xff]  ;;  %v2573_v52 = vld [vmem:[%s6190_s1 + $0xe98] sm:$0xff] }
  0x4f   : > { %2949 = vmatpush1.bf16.msra.mxu0 %v2948_v63  ;;  %v2547_v63 = vld [vmem:[%s6190_s1 + $0xdc8] sm:$0xff]  ;;  %v2594_v36 = vld [vmem:[%s6190_s1 + $0xf40] sm:$0xff] }
  0x50   : > { %3077 = vmatpush1.bf16.msra.mxu1 %v3076_v0  ;;  %2951 = vmatprep.subr.bf16.mxu0 %v2950_v1  ;;  %v2551_v0 = vld [vmem:[%s6190_s1 + $0xde8] sm:$0xff]  ;;  %v2549_v1 = vld [vmem:[%s6190_s1 + $0xdd8] sm:$0xff]  ;;  %v329_v20 = vmul.f32 %v318_v4, %v303_v16  ;;  %v2598_v37 = vld [vmem:[%s6190_s1 + $0xf60] sm:$0xff] }
  0x51   : > { %3079 = vmatprep.subr.bf16.mxu1 %v3078_v5  ;;  %v2968_v5 = vpack.c.bf16 %v2542_v57, %v2538_v56  ;;  %v2970_v10 = vpack.c.bf16 %v2551_v0, %v2547_v63  ;;  %v3098_v14 = vpack.c.bf16 %v2553_v2, %v2549_v1  ;;  %v2575_v51 = vld [vmem:[%s6190_s1 + $0xea8] sm:$0xff]  ;;  %v2570_v57 = vld [vmem:[%s6190_s1 + $0xe80] sm:$0xff]  ;;  %v2581_v1 = vld [vmem:[%s6190_s1 + $0xed8] sm:$0xff] }
  0x52   : > { %v355_v31 = vadd.f32 %v344_v8, %v329_v20  ;;  %v2982_v56 = vpack.c.bf16 %v2575_v51, %v2571_v50  ;;  %v2579_v63 = vld [vmem:[%s6190_s1 + $0xec8] sm:$0xff]  ;;  %v2585_v2 = vld [vmem:[%s6190_s1 + $0xef8] sm:$0xff]  ;;  %v2578_v8 = vld [vmem:[%s6190_s1 + $0xec0] sm:$0xff] }
  0x53   : > { %2953 = vmatpush1.bf16.msra.mxu0 %v2952_v11  ;;  %v2550_v11 = vld [vmem:[%s6190_s1 + $0xde0] sm:$0xff]  ;;  %v2583_v0 = vld [vmem:[%s6190_s1 + $0xee8] sm:$0xff]  ;;  %v2593_v16 = vld [vmem:[%s6190_s1 + $0xf38] sm:$0xff] }
  0x54   : > { %3081 = vmatpush1.bf16.msra.mxu1 %v3080_v12  ;;  %2955 = vmatprep.subr.bf16.mxu0 %v2954_v13  ;;  %v2552_v12 = vld [vmem:[%s6190_s1 + $0xdf0] sm:$0xff]  ;;  %v330_v13 = vmul.f32 %v322_v59, %v304_v7  ;;  %v2972_v21 = vpack.c.bf16 %v2550_v11, %v2546_v6  ;;  %v2986_v7 = vpack.c.bf16 %v2583_v0, %v2579_v63  ;;  %v2595_v29 = vld [vmem:[%s6190_s1 + $0xf48] sm:$0xff]  ;;  %v2606_v50 = vld [vmem:[%s6190_s1 + $0xfa0] sm:$0xff] }
  0x55   : > { %3083 = vmatprep.subr.bf16.mxu1 %v3082_v17  ;;  %v2557_v17 = vld [vmem:[%s6190_s1 + $0xe18] sm:$0xff]  ;;  %v3100_v22 = vpack.c.bf16 %v2552_v12, %v2548_v24  ;;  %v2572_v59 = vld [vmem:[%s6190_s1 + $0xe90] sm:$0xff]  ;;  %v3114_v12 = vpack.c.bf16 %v2585_v2, %v2581_v1 }
  0x56   : > { %v356_v19 = vadd.f32 %v348_v3, %v330_v13  ;;  %v2984_v3 = vpack.c.bf16 %v2574_v58, %v2570_v57  ;;  %v3112_v6 = vpack.c.bf16 %v2576_v62, %v2572_v59  ;;  %v2584_v13 = vld [vmem:[%s6190_s1 + $0xef0] sm:$0xff]  ;;  %v2617_v57 = vld [vmem:[%s6190_s1 + $0xff8] sm:$0xff]  ;;  %v2610_v59 = vld [vmem:[%s6190_s1 + $0xfc0] sm:$0xff] }
  0x57   : > { %2957 = vmatpush1.bf16.msra.mxu0 %v2956_v23  ;;  %v2974_v23 = vpack.c.bf16 %v2559_v15, %v2555_v25  ;;  %v2591_v25 = vld [vmem:[%s6190_s1 + $0xf28] sm:$0xff]  ;;  %v2589_v15 = vld [vmem:[%s6190_s1 + $0xf18] sm:$0xff]  ;;  %v2604_v51 = vld [vmem:[%s6190_s1 + $0xf90] sm:$0xff] }
  0x58   : > { %3085 = vmatpush1.bf16.msra.mxu1 %v3084_v26  ;;  %2959 = vmatprep.subr.bf16.mxu0 %v2958_v27  ;;  %v2554_v26 = vld [vmem:[%s6190_s1 + $0xe00] sm:$0xff]  ;;  %v360_v30 = vmax.f32 %v356_v19, 0.0  ;;  %v2612_v0 = vld [vmem:[%s6190_s1 + $0xfd0] sm:$0xff] }
  0x59   : > { %3087 = vmatprep.subr.bf16.mxu1 %v3086_v32  ;;  %v2558_v27 = vld [vmem:[%s6190_s1 + $0xe20] sm:$0xff]  ;;  %v3102_v32 = vpack.c.bf16 %v2561_v18, %v2557_v17 }
  0x5b   : > { %2961 = vmatpush1.bf16.msra.mxu0 %v2960_v38  ;;  %v368_v38 = vrot.slane %v360_v30, 7  ;;  %v2599_v30 = vld [vmem:[%s6190_s1 + $0xf68] sm:$0xff] }
  0x5c   : > { %3089 = vmatpush1.bf16.msra.mxu1 %v3088_v39  ;;  %2963 = vmatprep.subr.bf16.mxu0 %v2962_v40  ;;  %v359_v39 = vmax.f32 %v355_v31, 0.0  ;;  %v2976_v40 = vpack.c.bf16 %v2558_v27, %v2554_v26  ;;  %v3118_v26 = vpack.c.bf16 %v2593_v16, %v2589_v15  ;;  %v2592_v27 = vld [vmem:[%s6190_s1 + $0xf30] sm:$0xff]  ;;  %v2597_v31 = vld [vmem:[%s6190_s1 + $0xf58] sm:$0xff]  ;;  %v2994_v35 = vpack.c.bf16 %v2599_v30, %v2595_v29  ;;  %v400_v29 = vld [vmem:[%s6190_s1 + $0x60] sm:$0xff] }
  0x5d   : > { %3091 = vmatprep.subr.bf16.mxu1 %v3090_v45  ;;  %v2564_v45 = vld [vmem:[%s6190_s1 + $0xe50] sm:$0xff]  ;;  %376 = vst [vmem:[#allocation2 + $0x18] sm:$0xfe] %v368_v38  ;;  %380 = vst [vmem:[#allocation2 + $0x38] sm:$0x1] %v368_v38 }
  0x5e   : > { %v367_v46 = vrot.slane %v359_v39, 7  ;;  %v2596_v38 = vld [vmem:[%s6190_s1 + $0xf50] sm:$0xff] }
  0x5f   : > { %2965 = vmatpush1.bf16.msra.mxu0 %v2964_v53  ;;  %v2577_v53 = vld [vmem:[%s6190_s1 + $0xeb8] sm:$0xff]  ;;  %v394_v16 = vld [vmem:[%s6190_s1 + $0x30] sm:$0xff] }
  0x60   : > { %3093 = vmatpush1.bf16.msra.mxu1 %v3092_v54  ;;  %2967 = vmatprep.subr.bf16.mxu0 %v2966_v55  ;;  %375 = vst [vmem:[#allocation2 + $0x10] sm:$0xfe] %v367_v46  ;;  %379 = vst [vmem:[#allocation2 + $0x30] sm:$0x1] %v367_v46  ;;  %v2980_v54 = vpack.c.bf16 %v2566_v44, %v2562_v43  ;;  %v3108_v55 = vpack.c.bf16 %v2568_v49, %v2564_v45  ;;  %v2605_v43 = vld [vmem:[%s6190_s1 + $0xf98] sm:$0xff]  ;;  %v2602_v49 = vld [vmem:[%s6190_s1 + $0xf80] sm:$0xff] }
  0x61   : > { %3095 = vmatprep.subr.bf16.mxu1 %v3094_v61  ;;  %v3110_v61 = vpack.c.bf16 %v2577_v53, %v2573_v52  ;;  %v2609_v44 = vld [vmem:[%s6190_s1 + $0xfb8] sm:$0xff]  ;;  %v2996_v45 = vpack.c.bf16 %v2598_v37, %v2594_v36  ;;  %v2608_v53 = vld [vmem:[%s6190_s1 + $0xfb0] sm:$0xff]  ;;  %v3000_v58 = vpack.c.bf16 %v2606_v50, %v2602_v49 }
  0x62   : > { %v3126_v52 = vpack.c.bf16 %v2609_v44, %v2605_v43  ;;  %v3128_v62 = vpack.c.bf16 %v2608_v53, %v2604_v51  ;;  %v398_v30 = vld [vmem:[%s6190_s1 + $0x50] sm:$0xff]  ;;  %v411_v36 = vld [vmem:[%s6190_s1 + $0xb8] sm:$0xff]  ;;  %v385_v43 = vld [vmem:[#allocation2 + $0x8] sm:$0xff] }
  0x63   : > { %2969 = vmatpush1.bf16.msra.mxu0 %v2968_v5  ;;  %v415_v49 = vld [vmem:[%s6190_s1 + $0xd8] sm:$0xff] }
  0x64   : > { %3097 = vmatpush1.bf16.msra.mxu1 %v3096_v9  ;;  %2971 = vmatprep.subr.bf16.mxu0 %v2970_v10  ;;  %v647_v4 = vld [vmem:[#allocation2 + $0x18] sm:$0xfe]  ;;  %v651_v5 = vld [vmem:[#allocation2 + $0x38] sm:$0x1]  ;;  %v2582_v9 = vld [vmem:[%s6190_s1 + $0xee0] sm:$0xff] }
  0x65   : > { %3099 = vmatprep.subr.bf16.mxu1 %v3098_v14  ;;  %v2580_v10 = vld [vmem:[%s6190_s1 + $0xed0] sm:$0xff]  ;;  %v927_v11 = vrot.slane %v647_v4, 1  ;;  %v928_v24 = vrot.slane %v651_v5, 1  ;;  %v2587_v14 = vld [vmem:[%s6190_s1 + $0xf08] sm:$0xff]  ;;  %v2988_v18 = vpack.c.bf16 %v2582_v9, %v2578_v8  ;;  %v395_v8 = vld [vmem:[%s6190_s1 + $0x38] sm:$0xff] }
  0x66   : > { %v3116_v19 = vpack.c.bf16 %v2584_v13, %v2580_v10  ;;  %v2990_v20 = vpack.c.bf16 %v2591_v25, %v2587_v14  ;;  %v2616_v4 = vld [vmem:[%s6190_s1 + $0xff0] sm:$0xff]  ;;  %v389_v5 = vld [vmem:[%s6190_s1 + $0x8] sm:$0xff]  ;;  %v388_v13 = vld [vmem:[%s6190_s1] sm:$0xff] }
  0x67   : > { %2973 = vmatpush1.bf16.msra.mxu0 %v2972_v21  ;;  %v929_v17 = vsel %vm917_vm1, %v927_v11, %v928_v24  ;;  %v2586_v21 = vld [vmem:[%s6190_s1 + $0xf00] sm:$0xff]  ;;  %v646_v1 = vld [vmem:[#allocation2 + $0x10] sm:$0xfe]  ;;  %v650_v2 = vld [vmem:[#allocation2 + $0x30] sm:$0x1]  ;;  %v3132_v24 = vpack.c.bf16 %v2616_v4, %v2612_v0 }
  0x68   : > { %3101 = vmatpush1.bf16.msra.mxu1 %v3100_v22  ;;  %2975 = vmatprep.subr.bf16.mxu0 %v2974_v23  ;;  %v2590_v22 = vld [vmem:[%s6190_s1 + $0xf20] sm:$0xff]  ;;  %v2588_v23 = vld [vmem:[%s6190_s1 + $0xf10] sm:$0xff]  ;;  %v924_v10 = vrot.slane %v646_v1, 1  ;;  %v925_v11 = vrot.slane %v650_v2, 1  ;;  %v419_v50 = vld [vmem:[%s6190_s1 + $0xf8] sm:$0xff] }
  0x69   : > { %3103 = vmatprep.subr.bf16.mxu1 %v3102_v32  ;;  %1069 = vmatprep.mubr.f32.mxu0 %v929_v17  ;;  %v2601_v32 = vld [vmem:[%s6190_s1 + $0xf78] sm:$0xff]  ;;  %v2992_v47 = vpack.c.bf16 %v2590_v22, %v2586_v21  ;;  %v3120_v34 = vpack.c.bf16 %v2592_v27, %v2588_v23  ;;  %v392_v14 = vld [vmem:[%s6190_s1 + $0x20] sm:$0xff]  ;;  %v390_v25 = vld [vmem:[%s6190_s1 + $0x10] sm:$0xff] }
  0x6a   : > { %1211 = vmatprep.mubr.f32.mxu1 %v929_v17  ;;  %v3122_v39 = vpack.c.bf16 %v2601_v32, %v2597_v31  ;;  %v397_v17 = vld [vmem:[%s6190_s1 + $0x48] sm:$0xff]  ;;  %v926_v21 = vsel %vm917_vm1, %v924_v10, %v925_v11  ;;  %v3136_v22 = vpack.c.bf16 %v392_v14, %v388_v13  ;;  %v3264_v23 = vpack.c.bf16 %v394_v16, %v390_v25  ;;  %v396_v27 = vld [vmem:[%s6190_s1 + $0x40] sm:$0xff]  ;;  %v402_v32 = vld [vmem:[%s6190_s1 + $0x70] sm:$0xff] }
  0x6b   : > { %2977 = vmatpush1.bf16.msra.mxu0 %v2976_v40  ;;  %v2600_v40 = vld [vmem:[%s6190_s1 + $0xf70] sm:$0xff]  ;;  %v3140_v37 = vpack.c.bf16 %v400_v29, %v396_v27  ;;  %v424_v4 = vld [vmem:[%s6190_s1 + $0x120] sm:$0xff]  ;;  %v431_v10 = vld [vmem:[%s6190_s1 + $0x158] sm:$0xff] }
  0x6c   : > { %3105 = vmatpush1.bf16.msra.mxu1 %v3104_v41  ;;  %2979 = vmatprep.subr.bf16.mxu0 %v2978_v42  ;;  %v2603_v41 = vld [vmem:[%s6190_s1 + $0xf88] sm:$0xff]  ;;  %v3124_v46 = vpack.c.bf16 %v2600_v40, %v2596_v38  ;;  %v404_v38 = vld [vmem:[%s6190_s1 + $0x80] sm:$0xff]  ;;  %v435_v11 = vld [vmem:[%s6190_s1 + $0x178] sm:$0xff] }
  0x6d   : > { %3107 = vmatprep.subr.bf16.mxu1 %v3106_v48  ;;  %v2607_v42 = vld [vmem:[%s6190_s1 + $0xfa8] sm:$0xff]  ;;  %v428_v14 = vld [vmem:[%s6190_s1 + $0x140] sm:$0xff]  ;;  %v3282_v16 = vpack.c.bf16 %v435_v11, %v431_v10  ;;  %v475_v10 = vld [vmem:[%s6190_s1 + $0x2b8] sm:$0xff] }
  0x6e   : > { %v2998_v48 = vpack.c.bf16 %v2607_v42, %v2603_v41  ;;  %v408_v41 = vld [vmem:[%s6190_s1 + $0xa0] sm:$0xff]  ;;  %v406_v42 = vld [vmem:[%s6190_s1 + $0x90] sm:$0xff] }
  0x6f   : > { %2981 = vmatpush1.bf16.msra.mxu0 %v2980_v54  ;;  %v2611_v54 = vld [vmem:[%s6190_s1 + $0xfc8] sm:$0xff]  ;;  %v3144_v51 = vpack.c.bf16 %v408_v41, %v404_v38  ;;  %v432_v25 = vld [vmem:[%s6190_s1 + $0x160] sm:$0xff] }
  0x70   : > { %3109 = vmatpush1.bf16.msra.mxu1 %v3108_v55  ;;  %2983 = vmatprep.subr.bf16.mxu0 %v2982_v56  ;;  %v2615_v55 = vld [vmem:[%s6190_s1 + $0xfe8] sm:$0xff]  ;;  %v2613_v56 = vld [vmem:[%s6190_s1 + $0xfd8] sm:$0xff]  ;;  %v436_v27 = vld [vmem:[%s6190_s1 + $0x180] sm:$0xff] }
  0x71   : > { %3111 = vmatprep.subr.bf16.mxu1 %v3110_v61  ;;  %v2614_v61 = vld [vmem:[%s6190_s1 + $0xfe0] sm:$0xff]  ;;  %v3002_v63 = vpack.c.bf16 %v2615_v55, %v2611_v54 }
  0x72   : > { %v3004_v9 = vpack.c.bf16 %v2614_v61, %v2610_v59  ;;  %v412_v54 = vld [vmem:[%s6190_s1 + $0xc0] sm:$0xff]  ;;  %v421_v59 = vld [vmem:[%s6190_s1 + $0x108] sm:$0xff] }
  0x73   : > { %2985 = vmatpush1.bf16.msra.mxu0 %v2984_v3  ;;  %v3130_v3 = vpack.c.bf16 %v2617_v57, %v2613_v56  ;;  %v416_v55 = vld [vmem:[%s6190_s1 + $0xe0] sm:$0xff]  ;;  %v414_v56 = vld [vmem:[%s6190_s1 + $0xd0] sm:$0xff]  ;;  %v3274_v57 = vpack.c.bf16 %v419_v50, %v415_v49  ;;  %v425_v61 = vld [vmem:[%s6190_s1 + $0x128] sm:$0xff] }
  0x74   : > { %3113 = vmatpush1.bf16.msra.mxu1 %v3112_v6  ;;  %2987 = vmatprep.subr.bf16.mxu0 %v2986_v7  ;;  %v393_v6 = vld [vmem:[%s6190_s1 + $0x28] sm:$0xff]  ;;  %v391_v7 = vld [vmem:[%s6190_s1 + $0x18] sm:$0xff]  ;;  %v3148_v0 = vpack.c.bf16 %v416_v55, %v412_v54  ;;  %v3150_v2 = vpack.c.bf16 %v425_v61, %v421_v59  ;;  %v440_v29 = vld [vmem:[%s6190_s1 + $0x1a0] sm:$0xff] }
  0x75   : > { %3115 = vmatprep.subr.bf16.mxu1 %v3114_v12  ;;  %v3134_v12 = vpack.c.bf16 %v393_v6, %v389_v5  ;;  %v3262_v15 = vpack.c.bf16 %v395_v8, %v391_v7  ;;  %v422_v5 = vld [vmem:[%s6190_s1 + $0x110] sm:$0xff]  ;;  %v429_v8 = vld [vmem:[%s6190_s1 + $0x148] sm:$0xff]  ;;  %v448_v41 = vld [vmem:[%s6190_s1 + $0x1e0] sm:$0xff] }
  0x76   : > { %v426_v7 = vld [vmem:[%s6190_s1 + $0x130] sm:$0xff]  ;;  %v459_v49 = vld [vmem:[%s6190_s1 + $0x238] sm:$0xff]  ;;  %v456_v54 = vld [vmem:[%s6190_s1 + $0x220] sm:$0xff] }
  0x77   : > { %2989 = vmatpush1.bf16.msra.mxu0 %v2988_v18  ;;  %v401_v18 = vld [vmem:[%s6190_s1 + $0x68] sm:$0xff]  ;;  %v454_v55 = vld [vmem:[%s6190_s1 + $0x210] sm:$0xff]  ;;  %v463_v61 = vld [vmem:[%s6190_s1 + $0x258] sm:$0xff] }
  0x78   : > { %3117 = vmatpush1.bf16.msra.mxu1 %v3116_v19  ;;  %2991 = vmatprep.subr.bf16.mxu0 %v2990_v20  ;;  %v399_v19 = vld [vmem:[%s6190_s1 + $0x58] sm:$0xff]  ;;  %v465_v59 = vld [vmem:[%s6190_s1 + $0x268] sm:$0xff] }
  0x79   : > { %3119 = vmatprep.subr.bf16.mxu1 %v3118_v26  ;;  %v403_v20 = vld [vmem:[%s6190_s1 + $0x78] sm:$0xff]  ;;  %v3138_v26 = vpack.c.bf16 %v401_v18, %v397_v17  ;;  %v434_v17 = vld [vmem:[%s6190_s1 + $0x170] sm:$0xff]  ;;  %v437_v18 = vld [vmem:[%s6190_s1 + $0x188] sm:$0xff] }
  0x7a   : > { %v3266_v31 = vpack.c.bf16 %v403_v20, %v399_v19  ;;  %v441_v19 = vld [vmem:[%s6190_s1 + $0x1a8] sm:$0xff]  ;;  %v439_v20 = vld [vmem:[%s6190_s1 + $0x198] sm:$0xff] }
  0x7b   : > { %2993 = vmatpush1.bf16.msra.mxu0 %v2992_v47  ;;  %v405_v47 = vld [vmem:[%s6190_s1 + $0x88] sm:$0xff] }
  0x7c   : > { %3121 = vmatpush1.bf16.msra.mxu1 %v3120_v34  ;;  %2995 = vmatprep.subr.bf16.mxu0 %v2994_v35  ;;  %v409_v34 = vld [vmem:[%s6190_s1 + $0xa8] sm:$0xff]  ;;  %v407_v35 = vld [vmem:[%s6190_s1 + $0x98] sm:$0xff] }
  0x7d   : > { %3123 = vmatprep.subr.bf16.mxu1 %v3122_v39  ;;  %v3268_v39 = vpack.c.bf16 %v402_v32, %v398_v30  ;;  %v3142_v40 = vpack.c.bf16 %v409_v34, %v405_v47  ;;  %v3270_v44 = vpack.c.bf16 %v411_v36, %v407_v35  ;;  %v438_v30 = vld [vmem:[%s6190_s1 + $0x190] sm:$0xff]  ;;  %v445_v47 = vld [vmem:[%s6190_s1 + $0x1c8] sm:$0xff]  ;;  %v447_v35 = vld [vmem:[%s6190_s1 + $0x1d8] sm:$0xff] }
  0x7e   : > { %v442_v32 = vld [vmem:[%s6190_s1 + $0x1b0] sm:$0xff]  ;;  %v449_v34 = vld [vmem:[%s6190_s1 + $0x1e8] sm:$0xff]  ;;  %v451_v36 = vld [vmem:[%s6190_s1 + $0x1f8] sm:$0xff] }
  0x7f   : > { %2997 = vmatpush1.bf16.msra.mxu0 %v2996_v45  ;;  %v410_v45 = vld [vmem:[%s6190_s1 + $0xb0] sm:$0xff]  ;;  %v3288_v38 = vpack.c.bf16 %v442_v32, %v438_v30  ;;  %v485_v32 = vld [vmem:[%s6190_s1 + $0x308] sm:$0xff] }
  0x80   : > { %3125 = vmatpush1.bf16.msra.mxu1 %v3124_v46  ;;  %2999 = vmatprep.subr.bf16.mxu0 %v2998_v48  ;;  %v413_v46 = vld [vmem:[%s6190_s1 + $0xc8] sm:$0xff] }
  0x81   : > { %3127 = vmatprep.subr.bf16.mxu1 %v3126_v52  ;;  %v417_v48 = vld [vmem:[%s6190_s1 + $0xe8] sm:$0xff]  ;;  %v3272_v52 = vpack.c.bf16 %v410_v45, %v406_v42  ;;  %v446_v42 = vld [vmem:[%s6190_s1 + $0x1d0] sm:$0xff] }
  0x82   : > { %v3146_v53 = vpack.c.bf16 %v417_v48, %v413_v46  ;;  %v453_v45 = vld [vmem:[%s6190_s1 + $0x208] sm:$0xff]  ;;  %v455_v48 = vld [vmem:[%s6190_s1 + $0x218] sm:$0xff] }
  0x83   : > { %3001 = vmatpush1.bf16.msra.mxu0 %v3000_v58  ;;  %v418_v58 = vld [vmem:[%s6190_s1 + $0xf0] sm:$0xff]  ;;  %v457_v46 = vld [vmem:[%s6190_s1 + $0x228] sm:$0xff] }
  0x84   : > { %3129 = vmatpush1.bf16.msra.mxu1 %v3128_v62  ;;  %3003 = vmatprep.subr.bf16.mxu0 %v3002_v63  ;;  %v423_v62 = vld [vmem:[%s6190_s1 + $0x118] sm:$0xff]  ;;  %v3276_v1 = vpack.c.bf16 %v418_v58, %v414_v56  ;;  %v3294_v56 = vpack.c.bf16 %v459_v49, %v455_v48  ;;  %v461_v58 = vld [vmem:[%s6190_s1 + $0x248] sm:$0xff] }
  0x85   : > { %3131 = vmatprep.subr.bf16.mxu1 %v3130_v3  ;;  %v427_v63 = vld [vmem:[%s6190_s1 + $0x138] sm:$0xff]  ;;  %v420_v3 = vld [vmem:[%s6190_s1 + $0x100] sm:$0xff] }
  0x86   : > { %v3278_v6 = vpack.c.bf16 %v427_v63, %v423_v62  ;;  %v467_v62 = vld [vmem:[%s6190_s1 + $0x278] sm:$0xff] }
  0x87   : > { %3005 = vmatpush1.bf16.msra.mxu0 %v3004_v9  ;;  %v433_v9 = vld [vmem:[%s6190_s1 + $0x168] sm:$0xff]  ;;  %v499_v48 = vld [vmem:[%s6190_s1 + $0x378] sm:$0xff] }
  0x88   : > { %3133 = vmatpush1.bf16.msra.mxu1 %v3132_v24  ;;  %3135 = vmatprep.subr.bf16.mxu0 %v3134_v12  ;;  %v3152_v24 = vpack.c.bf16 %v424_v4, %v420_v3  ;;  %v3280_v12 = vpack.c.bf16 %v426_v7, %v422_v5  ;;  %v3154_v13 = vpack.c.bf16 %v433_v9, %v429_v8  ;;  %v464_v3 = vld [vmem:[%s6190_s1 + $0x260] sm:$0xff]  ;;  %v462_v4 = vld [vmem:[%s6190_s1 + $0x250] sm:$0xff]  ;;  %v469_v7 = vld [vmem:[%s6190_s1 + $0x288] sm:$0xff] }
  0x89   : > { %3263 = vmatprep.subr.bf16.mxu1 %v3262_v15  ;;  %v430_v15 = vld [vmem:[%s6190_s1 + $0x150] sm:$0xff]  ;;  %v3298_v5 = vpack.c.bf16 %v467_v62, %v463_v61  ;;  %v473_v8 = vld [vmem:[%s6190_s1 + $0x2a8] sm:$0xff]  ;;  %v471_v9 = vld [vmem:[%s6190_s1 + $0x298] sm:$0xff] }
  0x8a   : > { %1070 = vmatmul.mubr.f32.vlgmr.msra.gmra.mrb[0].mxu0 %v926_v21  ;;  %v507_v61 = vld [vmem:[%s6190_s1 + $0x3b8] sm:$0xff] }
  0x8b   : > { %1212 = vmatmul.mubr.f32.vlgmr.msra.gmra.mrb[0].mxu1 %v926_v21  ;;  %3137 = vmatpush1.bf16.msra.mxu0 %v3136_v22  ;;  %v443_v21 = vld [vmem:[%s6190_s1 + $0x1b8] sm:$0xff]  ;;  %v3156_v22 = vpack.c.bf16 %v432_v25, %v428_v14  ;;  %v472_v14 = vld [vmem:[%s6190_s1 + $0x2a0] sm:$0xff]  ;;  %v470_v25 = vld [vmem:[%s6190_s1 + $0x290] sm:$0xff] }
  0x8c   : > { %3265 = vmatpush1.bf16.msra.mxu1 %v3264_v23  ;;  %3139 = vmatprep.subr.bf16.mxu0 %v3138_v26  ;;  %v3284_v23 = vpack.c.bf16 %v434_v17, %v430_v15  ;;  %v3158_v26 = vpack.c.bf16 %v441_v19, %v437_v18  ;;  %v3302_v15 = vpack.c.bf16 %v475_v10, %v471_v9  ;;  %v477_v17 = vld [vmem:[%s6190_s1 + $0x2c8] sm:$0xff]  ;;  %v479_v19 = vld [vmem:[%s6190_s1 + $0x2d8] sm:$0xff] }
  0x8d   : > { %3267 = vmatprep.subr.bf16.mxu1 %v3266_v31  ;;  %1282 = vmatprep.mubr.f32.mxu0 %v385_v43  ;;  %v3286_v31 = vpack.c.bf16 %v443_v21, %v439_v20  ;;  %v481_v18 = vld [vmem:[%s6190_s1 + $0x2e8] sm:$0xff]  ;;  %v483_v20 = vld [vmem:[%s6190_s1 + $0x2f8] sm:$0xff] }
  0x8e   : > { %1424 = vmatprep.mubr.f32.mxu1 %v385_v43  ;;  %v3290_v43 = vpack.c.bf16 %v451_v36, %v447_v35  ;;  %v3306_v30 = vpack.c.bf16 %v483_v20, %v479_v19  ;;  %v491_v35 = vld [vmem:[%s6190_s1 + $0x338] sm:$0xff] }
  0x8f   : > { %3141 = vmatpush1.bf16.msra.mxu0 %v3140_v37  ;;  %v3160_v37 = vpack.c.bf16 %v440_v29, %v436_v27  ;;  %v480_v27 = vld [vmem:[%s6190_s1 + $0x2e0] sm:$0xff]  ;;  %v478_v29 = vld [vmem:[%s6190_s1 + $0x2d0] sm:$0xff]  ;;  %v515_v9 = vld [vmem:[%s6190_s1 + $0x3f8] sm:$0xff] }
  0x90   : > { %3269 = vmatpush1.bf16.msra.mxu1 %v3268_v39  ;;  %3143 = vmatprep.subr.bf16.mxu0 %v3142_v40  ;;  %v3162_v39 = vpack.c.bf16 %v449_v34, %v445_v47  ;;  %v444_v40 = vld [vmem:[%s6190_s1 + $0x1c0] sm:$0xff]  ;;  %v489_v47 = vld [vmem:[%s6190_s1 + $0x328] sm:$0xff]  ;;  %v487_v34 = vld [vmem:[%s6190_s1 + $0x318] sm:$0xff] }
  0x91   : > { %3271 = vmatprep.subr.bf16.mxu1 %v3270_v44  ;;  %v450_v44 = vld [vmem:[%s6190_s1 + $0x1f0] sm:$0xff]  ;;  %v3164_v50 = vpack.c.bf16 %v448_v41, %v444_v40  ;;  %v488_v40 = vld [vmem:[%s6190_s1 + $0x320] sm:$0xff]  ;;  %v523_v19 = vld [vmem:[%s6190_s1 + $0x438] sm:$0xff] }
  0x92   : > { %v486_v41 = vld [vmem:[%s6190_s1 + $0x310] sm:$0xff] }
  0x93   : > { %3145 = vmatpush1.bf16.msra.mxu0 %v3144_v51  ;;  %v3292_v51 = vpack.c.bf16 %v450_v44, %v446_v42  ;;  %v3310_v42 = vpack.c.bf16 %v491_v35, %v487_v34  ;;  %v493_v44 = vld [vmem:[%s6190_s1 + $0x348] sm:$0xff]  ;;  %v531_v34 = vld [vmem:[%s6190_s1 + $0x478] sm:$0xff]  ;;  %v384_v35 = vld [vmem:[#allocation2] sm:$0xff] }
  0x94   : > { %3273 = vmatpush1.bf16.msra.mxu1 %v3272_v52  ;;  %3147 = vmatprep.subr.bf16.mxu0 %v3146_v53  ;;  %v3166_v52 = vpack.c.bf16 %v457_v46, %v453_v45  ;;  %v452_v53 = vld [vmem:[%s6190_s1 + $0x200] sm:$0xff]  ;;  %v497_v45 = vld [vmem:[%s6190_s1 + $0x368] sm:$0xff]  ;;  %v495_v46 = vld [vmem:[%s6190_s1 + $0x358] sm:$0xff] }
  0x95   : > { %3275 = vmatprep.subr.bf16.mxu1 %v3274_v57  ;;  %v458_v57 = vld [vmem:[%s6190_s1 + $0x230] sm:$0xff]  ;;  %v3168_v63 = vpack.c.bf16 %v456_v54, %v452_v53  ;;  %v496_v53 = vld [vmem:[%s6190_s1 + $0x360] sm:$0xff] }
  0x96   : > { %v494_v54 = vld [vmem:[%s6190_s1 + $0x350] sm:$0xff] }
  0x97   : > { %3149 = vmatpush1.bf16.msra.mxu0 %v3148_v0  ;;  %v3296_v0 = vpack.c.bf16 %v458_v57, %v454_v55  ;;  %v3314_v55 = vpack.c.bf16 %v499_v48, %v495_v46  ;;  %v501_v57 = vld [vmem:[%s6190_s1 + $0x388] sm:$0xff]  ;;  %v535_v46 = vld [vmem:[%s6190_s1 + $0x498] sm:$0xff] }
  0x98   : > { %3277 = vmatpush1.bf16.msra.mxu1 %v3276_v1  ;;  %3151 = vmatprep.subr.bf16.mxu0 %v3150_v2  ;;  %v3170_v1 = vpack.c.bf16 %v465_v59, %v461_v58  ;;  %v460_v2 = vld [vmem:[%s6190_s1 + $0x240] sm:$0xff]  ;;  %v505_v58 = vld [vmem:[%s6190_s1 + $0x3a8] sm:$0xff]  ;;  %v503_v59 = vld [vmem:[%s6190_s1 + $0x398] sm:$0xff] }
  0x99   : > { %3279 = vmatprep.subr.bf16.mxu1 %v3278_v6  ;;  %v466_v6 = vld [vmem:[%s6190_s1 + $0x270] sm:$0xff]  ;;  %v3172_v11 = vpack.c.bf16 %v464_v3, %v460_v2  ;;  %v504_v2 = vld [vmem:[%s6190_s1 + $0x3a0] sm:$0xff]  ;;  %v539_v48 = vld [vmem:[%s6190_s1 + $0x4b8] sm:$0xff] }
  0x9a   : > { %v502_v3 = vld [vmem:[%s6190_s1 + $0x390] sm:$0xff] }
  0x9b   : > { %3153 = vmatpush1.bf16.msra.mxu0 %v3152_v24  ;;  %v3300_v24 = vpack.c.bf16 %v466_v6, %v462_v4  ;;  %v3318_v4 = vpack.c.bf16 %v507_v61, %v503_v59  ;;  %v509_v6 = vld [vmem:[%s6190_s1 + $0x3c8] sm:$0xff]  ;;  %v543_v61 = vld [vmem:[%s6190_s1 + $0x4d8] sm:$0xff] }
  0x9c   : > { %3281 = vmatpush1.bf16.msra.mxu1 %v3280_v12  ;;  %3155 = vmatprep.subr.bf16.mxu0 %v3154_v13  ;;  %v3174_v12 = vpack.c.bf16 %v473_v8, %v469_v7  ;;  %v468_v13 = vld [vmem:[%s6190_s1 + $0x280] sm:$0xff]  ;;  %v513_v7 = vld [vmem:[%s6190_s1 + $0x3e8] sm:$0xff]  ;;  %v511_v8 = vld [vmem:[%s6190_s1 + $0x3d8] sm:$0xff] }
  0x9d   : > { %3283 = vmatprep.subr.bf16.mxu1 %v3282_v16  ;;  %v474_v16 = vld [vmem:[%s6190_s1 + $0x2b0] sm:$0xff]  ;;  %v3176_v21 = vpack.c.bf16 %v472_v14, %v468_v13  ;;  %v512_v13 = vld [vmem:[%s6190_s1 + $0x3e0] sm:$0xff]  ;;  %v545_v59 = vld [vmem:[%s6190_s1 + $0x4e8] sm:$0xff] }
  0x9e   : > { %v510_v14 = vld [vmem:[%s6190_s1 + $0x3d0] sm:$0xff] }
  0x9f   : > { %3157 = vmatpush1.bf16.msra.mxu0 %v3156_v22  ;;  %v3304_v22 = vpack.c.bf16 %v474_v16, %v470_v25  ;;  %v3322_v25 = vpack.c.bf16 %v515_v9, %v511_v8  ;;  %v517_v16 = vld [vmem:[%s6190_s1 + $0x408] sm:$0xff]  ;;  %v551_v9 = vld [vmem:[%s6190_s1 + $0x518] sm:$0xff] }
  0xa0   : > { %3285 = vmatpush1.bf16.msra.mxu1 %v3284_v23  ;;  %3159 = vmatprep.subr.bf16.mxu0 %v3158_v26  ;;  %v3178_v23 = vpack.c.bf16 %v481_v18, %v477_v17  ;;  %v476_v26 = vld [vmem:[%s6190_s1 + $0x2c0] sm:$0xff]  ;;  %v521_v17 = vld [vmem:[%s6190_s1 + $0x428] sm:$0xff]  ;;  %v519_v18 = vld [vmem:[%s6190_s1 + $0x418] sm:$0xff] }
  0xa1   : > { %3287 = vmatprep.subr.bf16.mxu1 %v3286_v31  ;;  %v482_v31 = vld [vmem:[%s6190_s1 + $0x2f0] sm:$0xff]  ;;  %v3180_v36 = vpack.c.bf16 %v480_v27, %v476_v26  ;;  %v520_v26 = vld [vmem:[%s6190_s1 + $0x420] sm:$0xff]  ;;  %v553_v8 = vld [vmem:[%s6190_s1 + $0x528] sm:$0xff] }
  0xa2   : > { %v518_v27 = vld [vmem:[%s6190_s1 + $0x410] sm:$0xff] }
  0xa3   : > { %3161 = vmatpush1.bf16.msra.mxu0 %v3160_v37  ;;  %v3308_v37 = vpack.c.bf16 %v482_v31, %v478_v29  ;;  %v3326_v29 = vpack.c.bf16 %v523_v19, %v519_v18  ;;  %v525_v31 = vld [vmem:[%s6190_s1 + $0x448] sm:$0xff]  ;;  %v559_v19 = vld [vmem:[%s6190_s1 + $0x558] sm:$0xff] }
  0xa4   : > { %3289 = vmatpush1.bf16.msra.mxu1 %v3288_v38  ;;  %3163 = vmatprep.subr.bf16.mxu0 %v3162_v39  ;;  %v3182_v38 = vpack.c.bf16 %v489_v47, %v485_v32  ;;  %v484_v39 = vld [vmem:[%s6190_s1 + $0x300] sm:$0xff]  ;;  %v529_v32 = vld [vmem:[%s6190_s1 + $0x468] sm:$0xff]  ;;  %v527_v47 = vld [vmem:[%s6190_s1 + $0x458] sm:$0xff] }
  0xa5   : > { %3291 = vmatprep.subr.bf16.mxu1 %v3290_v43  ;;  %v490_v43 = vld [vmem:[%s6190_s1 + $0x330] sm:$0xff]  ;;  %v3184_v49 = vpack.c.bf16 %v488_v40, %v484_v39  ;;  %v524_v39 = vld [vmem:[%s6190_s1 + $0x440] sm:$0xff]  ;;  %v561_v18 = vld [vmem:[%s6190_s1 + $0x568] sm:$0xff] }
  0xa6   : > { %v528_v40 = vld [vmem:[%s6190_s1 + $0x460] sm:$0xff] }
  0xa7   : > { %3165 = vmatpush1.bf16.msra.mxu0 %v3164_v50  ;;  %v3312_v50 = vpack.c.bf16 %v490_v43, %v486_v41  ;;  %v526_v41 = vld [vmem:[%s6190_s1 + $0x450] sm:$0xff] }
  0xa8   : > { %3293 = vmatpush1.bf16.msra.mxu1 %v3292_v51  ;;  %3167 = vmatprep.subr.bf16.mxu0 %v3166_v52  ;;  %v3186_v51 = vpack.c.bf16 %v497_v45, %v493_v44  ;;  %v492_v52 = vld [vmem:[%s6190_s1 + $0x340] sm:$0xff]  ;;  %v530_v43 = vld [vmem:[%s6190_s1 + $0x470] sm:$0xff]  ;;  %v533_v44 = vld [vmem:[%s6190_s1 + $0x488] sm:$0xff] }
  0xa9   : > { %3295 = vmatprep.subr.bf16.mxu1 %v3294_v56  ;;  %v498_v56 = vld [vmem:[%s6190_s1 + $0x370] sm:$0xff]  ;;  %v3188_v62 = vpack.c.bf16 %v496_v53, %v492_v52  ;;  %v537_v45 = vld [vmem:[%s6190_s1 + $0x4a8] sm:$0xff]  ;;  %v532_v53 = vld [vmem:[%s6190_s1 + $0x480] sm:$0xff] }
  0xaa   : > { %v3206_v52 = vpack.c.bf16 %v537_v45, %v533_v44  ;;  %v573_v44 = vld [vmem:[%s6190_s1 + $0x5c8] sm:$0xff] }
  0xab   : > { %3169 = vmatpush1.bf16.msra.mxu0 %v3168_v63  ;;  %v3316_v63 = vpack.c.bf16 %v498_v56, %v494_v54  ;;  %v536_v54 = vld [vmem:[%s6190_s1 + $0x4a0] sm:$0xff]  ;;  %v3334_v56 = vpack.c.bf16 %v539_v48, %v535_v46  ;;  %v577_v45 = vld [vmem:[%s6190_s1 + $0x5e8] sm:$0xff]  ;;  %v575_v46 = vld [vmem:[%s6190_s1 + $0x5d8] sm:$0xff] }
  0xac   : > { %3297 = vmatpush1.bf16.msra.mxu1 %v3296_v0  ;;  %3171 = vmatprep.subr.bf16.mxu0 %v3170_v1  ;;  %v3190_v0 = vpack.c.bf16 %v505_v58, %v501_v57  ;;  %v500_v1 = vld [vmem:[%s6190_s1 + $0x380] sm:$0xff]  ;;  %v538_v57 = vld [vmem:[%s6190_s1 + $0x4b0] sm:$0xff]  ;;  %v541_v58 = vld [vmem:[%s6190_s1 + $0x4c8] sm:$0xff] }
  0xad   : > { %3299 = vmatprep.subr.bf16.mxu1 %v3298_v5  ;;  %v506_v5 = vld [vmem:[%s6190_s1 + $0x3b0] sm:$0xff]  ;;  %v3192_v10 = vpack.c.bf16 %v504_v2, %v500_v1  ;;  %v3210_v1 = vpack.c.bf16 %v545_v59, %v541_v58  ;;  %v540_v2 = vld [vmem:[%s6190_s1 + $0x4c0] sm:$0xff]  ;;  %v579_v48 = vld [vmem:[%s6190_s1 + $0x5f8] sm:$0xff] }
  0xae   : > { %v585_v58 = vld [vmem:[%s6190_s1 + $0x628] sm:$0xff]  ;;  %v583_v59 = vld [vmem:[%s6190_s1 + $0x618] sm:$0xff] }
  0xaf   : > { %3173 = vmatpush1.bf16.msra.mxu0 %v3172_v11  ;;  %v3320_v11 = vpack.c.bf16 %v506_v5, %v502_v3  ;;  %v544_v3 = vld [vmem:[%s6190_s1 + $0x4e0] sm:$0xff] }
  0xb0   : > { %3301 = vmatpush1.bf16.msra.mxu1 %v3300_v24  ;;  %3175 = vmatprep.subr.bf16.mxu0 %v3174_v12  ;;  %v3194_v24 = vpack.c.bf16 %v513_v7, %v509_v6  ;;  %v508_v12 = vld [vmem:[%s6190_s1 + $0x3c0] sm:$0xff]  ;;  %v546_v6 = vld [vmem:[%s6190_s1 + $0x4f0] sm:$0xff]  ;;  %v549_v7 = vld [vmem:[%s6190_s1 + $0x508] sm:$0xff] }
  0xb1   : > { %3303 = vmatprep.subr.bf16.mxu1 %v3302_v15  ;;  %v514_v15 = vld [vmem:[%s6190_s1 + $0x3f0] sm:$0xff]  ;;  %v3196_v20 = vpack.c.bf16 %v512_v13, %v508_v12  ;;  %v3214_v12 = vpack.c.bf16 %v553_v8, %v549_v7  ;;  %v548_v13 = vld [vmem:[%s6190_s1 + $0x500] sm:$0xff]  ;;  %v593_v7 = vld [vmem:[%s6190_s1 + $0x668] sm:$0xff] }
  0xb2   : > { %v591_v8 = vld [vmem:[%s6190_s1 + $0x658] sm:$0xff] }
  0xb3   : > { %3177 = vmatpush1.bf16.msra.mxu0 %v3176_v21  ;;  %v3324_v21 = vpack.c.bf16 %v514_v15, %v510_v14  ;;  %v552_v14 = vld [vmem:[%s6190_s1 + $0x520] sm:$0xff] }
  0xb4   : > { %3305 = vmatpush1.bf16.msra.mxu1 %v3304_v22  ;;  %3179 = vmatprep.subr.bf16.mxu0 %v3178_v23  ;;  %v3198_v22 = vpack.c.bf16 %v521_v17, %v517_v16  ;;  %v516_v23 = vld [vmem:[%s6190_s1 + $0x400] sm:$0xff]  ;;  %v554_v16 = vld [vmem:[%s6190_s1 + $0x530] sm:$0xff]  ;;  %v557_v17 = vld [vmem:[%s6190_s1 + $0x548] sm:$0xff] }
  0xb5   : > { %3307 = vmatprep.subr.bf16.mxu1 %v3306_v30  ;;  %v522_v30 = vld [vmem:[%s6190_s1 + $0x430] sm:$0xff] }
  0xb7   : > { %3181 = vmatpush1.bf16.msra.mxu0 %v3180_v36  ;;  %v3200_v36 = vpack.c.bf16 %v520_v26, %v516_v23  ;;  %v3218_v23 = vpack.c.bf16 %v561_v18, %v557_v17  ;;  %v556_v26 = vld [vmem:[%s6190_s1 + $0x540] sm:$0xff]  ;;  %v601_v17 = vld [vmem:[%s6190_s1 + $0x6a8] sm:$0xff]  ;;  %v599_v18 = vld [vmem:[%s6190_s1 + $0x698] sm:$0xff] }
  0xb8   : > { %3309 = vmatpush1.bf16.msra.mxu1 %v3308_v37  ;;  %3183 = vmatprep.subr.bf16.mxu0 %v3182_v38  ;;  %v3328_v37 = vpack.c.bf16 %v522_v30, %v518_v27  ;;  %v3202_v38 = vpack.c.bf16 %v529_v32, %v525_v31  ;;  %v560_v27 = vld [vmem:[%s6190_s1 + $0x560] sm:$0xff]  ;;  %v562_v31 = vld [vmem:[%s6190_s1 + $0x570] sm:$0xff]  ;;  %v565_v32 = vld [vmem:[%s6190_s1 + $0x588] sm:$0xff] }
  0xb9   : > { %3311 = vmatprep.subr.bf16.mxu1 %v3310_v42  ;;  %v3330_v42 = vpack.c.bf16 %v531_v34, %v527_v47  ;;  %v569_v47 = vld [vmem:[%s6190_s1 + $0x5a8] sm:$0xff]  ;;  %v567_v34 = vld [vmem:[%s6190_s1 + $0x598] sm:$0xff] }
  0xbb   : > { %3185 = vmatpush1.bf16.msra.mxu0 %v3184_v49  ;;  %v387_v49 = vld [vmem:[#allocation2 + $0x18] sm:$0xff] }
  0xbc   : > { %3313 = vmatpush1.bf16.msra.mxu1 %v3312_v50  ;;  %3187 = vmatprep.subr.bf16.mxu0 %v3186_v51  ;;  %v3204_v50 = vpack.c.bf16 %v528_v40, %v524_v39  ;;  %v3332_v51 = vpack.c.bf16 %v530_v43, %v526_v41  ;;  %v564_v39 = vld [vmem:[%s6190_s1 + $0x580] sm:$0xff]  ;;  %v566_v41 = vld [vmem:[%s6190_s1 + $0x590] sm:$0xff] }
  0xbd   : > { %3315 = vmatprep.subr.bf16.mxu1 %v3314_v55  ;;  %v534_v55 = vld [vmem:[%s6190_s1 + $0x490] sm:$0xff]  ;;  %v568_v40 = vld [vmem:[%s6190_s1 + $0x5a0] sm:$0xff] }
  0xbe   : > { %v570_v43 = vld [vmem:[%s6190_s1 + $0x5b0] sm:$0xff] }
  0xbf   : > { %3189 = vmatpush1.bf16.msra.mxu0 %v3188_v62  ;;  %v547_v62 = vld [vmem:[%s6190_s1 + $0x4f8] sm:$0xff] }
  0xc0   : > { %3317 = vmatpush1.bf16.msra.mxu1 %v3316_v63  ;;  %3191 = vmatprep.subr.bf16.mxu0 %v3190_v0  ;;  %v3208_v63 = vpack.c.bf16 %v536_v54, %v532_v53  ;;  %v3336_v0 = vpack.c.bf16 %v538_v57, %v534_v55  ;;  %v3338_v5 = vpack.c.bf16 %v547_v62, %v543_v61  ;;  %v576_v53 = vld [vmem:[%s6190_s1 + $0x5e0] sm:$0xff]  ;;  %v574_v54 = vld [vmem:[%s6190_s1 + $0x5d0] sm:$0xff]  ;;  %v581_v57 = vld [vmem:[%s6190_s1 + $0x608] sm:$0xff] }
  0xc1   : > { %3319 = vmatprep.subr.bf16.mxu1 %v3318_v4  ;;  %v542_v4 = vld [vmem:[%s6190_s1 + $0x4d0] sm:$0xff]  ;;  %v3354_v55 = vpack.c.bf16 %v579_v48, %v575_v46  ;;  %v587_v61 = vld [vmem:[%s6190_s1 + $0x638] sm:$0xff] }
  0xc2   : > { %v619_v46 = vld [vmem:[%s6190_s1 + $0x738] sm:$0xff] }
  0xc3   : > { %3193 = vmatpush1.bf16.msra.mxu0 %v3192_v10  ;;  %v555_v10 = vld [vmem:[%s6190_s1 + $0x538] sm:$0xff] }
  0xc4   : > { %3321 = vmatpush1.bf16.msra.mxu1 %v3320_v11  ;;  %3195 = vmatprep.subr.bf16.mxu0 %v3194_v24  ;;  %v3212_v11 = vpack.c.bf16 %v544_v3, %v540_v2  ;;  %v3340_v24 = vpack.c.bf16 %v546_v6, %v542_v4  ;;  %v3342_v15 = vpack.c.bf16 %v555_v10, %v551_v9  ;;  %v584_v2 = vld [vmem:[%s6190_s1 + $0x620] sm:$0xff]  ;;  %v582_v3 = vld [vmem:[%s6190_s1 + $0x610] sm:$0xff]  ;;  %v589_v6 = vld [vmem:[%s6190_s1 + $0x648] sm:$0xff] }
  0xc5   : > { %3323 = vmatprep.subr.bf16.mxu1 %v3322_v25  ;;  %v550_v25 = vld [vmem:[%s6190_s1 + $0x510] sm:$0xff]  ;;  %v3358_v4 = vpack.c.bf16 %v587_v61, %v583_v59  ;;  %v595_v9 = vld [vmem:[%s6190_s1 + $0x678] sm:$0xff] }
  0xc6   : > { %v627_v59 = vld [vmem:[%s6190_s1 + $0x778] sm:$0xff] }
  0xc7   : > { %3197 = vmatpush1.bf16.msra.mxu0 %v3196_v20  ;;  %v563_v20 = vld [vmem:[%s6190_s1 + $0x578] sm:$0xff] }
  0xc8   : > { %3325 = vmatpush1.bf16.msra.mxu1 %v3324_v21  ;;  %3199 = vmatprep.subr.bf16.mxu0 %v3198_v22  ;;  %v3216_v21 = vpack.c.bf16 %v552_v14, %v548_v13  ;;  %v3344_v22 = vpack.c.bf16 %v554_v16, %v550_v25  ;;  %v3346_v30 = vpack.c.bf16 %v563_v20, %v559_v19  ;;  %v592_v13 = vld [vmem:[%s6190_s1 + $0x660] sm:$0xff]  ;;  %v590_v14 = vld [vmem:[%s6190_s1 + $0x650] sm:$0xff]  ;;  %v597_v16 = vld [vmem:[%s6190_s1 + $0x688] sm:$0xff] }
  0xc9   : > { %3327 = vmatprep.subr.bf16.mxu1 %v3326_v29  ;;  %v558_v29 = vld [vmem:[%s6190_s1 + $0x550] sm:$0xff]  ;;  %v3362_v25 = vpack.c.bf16 %v595_v9, %v591_v8  ;;  %v603_v19 = vld [vmem:[%s6190_s1 + $0x6b8] sm:$0xff] }
  0xca   : > { %1283 = vmatmul.mubr.f32.vlgmr.msra.gmra.mrb[0].mxu0 %v384_v35  ;;  %v635_v8 = vld [vmem:[%s6190_s1 + $0x7b8] sm:$0xff] }
  0xcb   : > { %3201 = vmatpush1.bf16.msra.mxu0 %v3200_v36  ;;  %1425 = vmatmul.mubr.f32.vlgmr.msra.gmra.mrb[0].mxu1 %v384_v35  ;;  %v571_v35 = vld [vmem:[%s6190_s1 + $0x5b8] sm:$0xff]  ;;  %v3220_v36 = vpack.c.bf16 %v560_v27, %v556_v26  ;;  %v600_v26 = vld [vmem:[%s6190_s1 + $0x6a0] sm:$0xff]  ;;  %v598_v27 = vld [vmem:[%s6190_s1 + $0x690] sm:$0xff] }
  0xcc   : > { %3329 = vmatpush1.bf16.msra.mxu1 %v3328_v37  ;;  %3203 = vmatprep.subr.bf16.mxu0 %v3202_v38  ;;  %v3348_v37 = vpack.c.bf16 %v562_v31, %v558_v29  ;;  %v3222_v38 = vpack.c.bf16 %v569_v47, %v565_v32  ;;  %v3366_v29 = vpack.c.bf16 %v603_v19, %v599_v18  ;;  %v605_v31 = vld [vmem:[%s6190_s1 + $0x6c8] sm:$0xff]  ;;  %v607_v47 = vld [vmem:[%s6190_s1 + $0x6d8] sm:$0xff] }
  0xcd   : > { %3331 = vmatprep.subr.bf16.mxu1 %v3330_v42  ;;  %1353 = vmatprep.mubr.f32.mxu0 %v387_v49  ;;  %v3350_v42 = vpack.c.bf16 %v571_v35, %v567_v34  ;;  %v609_v32 = vld [vmem:[%s6190_s1 + $0x6e8] sm:$0xff]  ;;  %v611_v34 = vld [vmem:[%s6190_s1 + $0x6f8] sm:$0xff] }
  0xce   : > { %1495 = vmatprep.mubr.f32.mxu1 %v387_v49  ;;  %v3224_v49 = vpack.c.bf16 %v568_v40, %v564_v39  ;;  %v608_v39 = vld [vmem:[%s6190_s1 + $0x6e0] sm:$0xff]  ;;  %v606_v40 = vld [vmem:[%s6190_s1 + $0x6d0] sm:$0xff]  ;;  %v643_v18 = vld [vmem:[%s6190_s1 + $0x7f8] sm:$0xff] }
  0xcf   : > { %3205 = vmatpush1.bf16.msra.mxu0 %v3204_v50  ;;  %v3352_v50 = vpack.c.bf16 %v570_v43, %v566_v41  ;;  %v3370_v41 = vpack.c.bf16 %v611_v34, %v607_v47  ;;  %v613_v43 = vld [vmem:[%s6190_s1 + $0x708] sm:$0xff]  ;;  %v2625_v47 = vld [vmem:[%s6190_s1 + $0x1038] sm:$0xff] }
  0xd0   : > { %3333 = vmatpush1.bf16.msra.mxu1 %v3332_v51  ;;  %3207 = vmatprep.subr.bf16.mxu0 %v3206_v52  ;;  %v3226_v51 = vpack.c.bf16 %v577_v45, %v573_v44  ;;  %v572_v52 = vld [vmem:[%s6190_s1 + $0x5c0] sm:$0xff]  ;;  %v617_v44 = vld [vmem:[%s6190_s1 + $0x728] sm:$0xff]  ;;  %v615_v45 = vld [vmem:[%s6190_s1 + $0x718] sm:$0xff] }
  0xd1   : > { %3335 = vmatprep.subr.bf16.mxu1 %v3334_v56  ;;  %v578_v56 = vld [vmem:[%s6190_s1 + $0x5f0] sm:$0xff]  ;;  %v3228_v62 = vpack.c.bf16 %v576_v53, %v572_v52  ;;  %v616_v52 = vld [vmem:[%s6190_s1 + $0x720] sm:$0xff] }
  0xd2   : > { %v614_v53 = vld [vmem:[%s6190_s1 + $0x710] sm:$0xff] }
  0xd3   : > { %3209 = vmatpush1.bf16.msra.mxu0 %v3208_v63  ;;  %v3356_v63 = vpack.c.bf16 %v578_v56, %v574_v54  ;;  %v3374_v54 = vpack.c.bf16 %v619_v46, %v615_v45  ;;  %v621_v56 = vld [vmem:[%s6190_s1 + $0x748] sm:$0xff]  ;;  %v2629_v46 = vld [vmem:[%s6190_s1 + $0x1058] sm:$0xff] }
  0xd4   : > { %3337 = vmatpush1.bf16.msra.mxu1 %v3336_v0  ;;  %3211 = vmatprep.subr.bf16.mxu0 %v3210_v1  ;;  %v3230_v0 = vpack.c.bf16 %v585_v58, %v581_v57  ;;  %v580_v1 = vld [vmem:[%s6190_s1 + $0x600] sm:$0xff]  ;;  %v625_v57 = vld [vmem:[%s6190_s1 + $0x768] sm:$0xff]  ;;  %v623_v58 = vld [vmem:[%s6190_s1 + $0x758] sm:$0xff] }
  0xd5   : > { %3339 = vmatprep.subr.bf16.mxu1 %v3338_v5  ;;  %v586_v5 = vld [vmem:[%s6190_s1 + $0x630] sm:$0xff]  ;;  %v3232_v10 = vpack.c.bf16 %v584_v2, %v580_v1  ;;  %v624_v1 = vld [vmem:[%s6190_s1 + $0x760] sm:$0xff]  ;;  %v2631_v45 = vld [vmem:[%s6190_s1 + $0x1068] sm:$0xff] }
  0xd6   : > { %v622_v2 = vld [vmem:[%s6190_s1 + $0x750] sm:$0xff] }
  0xd7   : > { %3213 = vmatpush1.bf16.msra.mxu0 %v3212_v11  ;;  %v3360_v11 = vpack.c.bf16 %v586_v5, %v582_v3  ;;  %v3378_v3 = vpack.c.bf16 %v627_v59, %v623_v58  ;;  %v629_v5 = vld [vmem:[%s6190_s1 + $0x788] sm:$0xff]  ;;  %v2632_v59 = vld [vmem:[%s6190_s1 + $0x1070] sm:$0xff] }
  0xd8   : > { %3341 = vmatpush1.bf16.msra.mxu1 %v3340_v24  ;;  %3215 = vmatprep.subr.bf16.mxu0 %v3214_v12  ;;  %v3234_v24 = vpack.c.bf16 %v593_v7, %v589_v6  ;;  %v588_v12 = vld [vmem:[%s6190_s1 + $0x640] sm:$0xff]  ;;  %v633_v6 = vld [vmem:[%s6190_s1 + $0x7a8] sm:$0xff]  ;;  %v631_v7 = vld [vmem:[%s6190_s1 + $0x798] sm:$0xff] }
  0xd9   : > { %3343 = vmatprep.subr.bf16.mxu1 %v3342_v15  ;;  %v594_v15 = vld [vmem:[%s6190_s1 + $0x670] sm:$0xff]  ;;  %v3236_v20 = vpack.c.bf16 %v592_v13, %v588_v12  ;;  %v632_v12 = vld [vmem:[%s6190_s1 + $0x7a0] sm:$0xff] }
  0xda   : > { %v630_v13 = vld [vmem:[%s6190_s1 + $0x790] sm:$0xff] }
  0xdb   : > { %3217 = vmatpush1.bf16.msra.mxu0 %v3216_v21  ;;  %v3364_v21 = vpack.c.bf16 %v594_v15, %v590_v14  ;;  %v3382_v14 = vpack.c.bf16 %v635_v8, %v631_v7  ;;  %v637_v15 = vld [vmem:[%s6190_s1 + $0x7c8] sm:$0xff]  ;;  %v2636_v7 = vld [vmem:[%s6190_s1 + $0x1090] sm:$0xff] }
  0xdc   : > { %3345 = vmatpush1.bf16.msra.mxu1 %v3344_v22  ;;  %3219 = vmatprep.subr.bf16.mxu0 %v3218_v23  ;;  %v3238_v22 = vpack.c.bf16 %v601_v17, %v597_v16  ;;  %v596_v23 = vld [vmem:[%s6190_s1 + $0x680] sm:$0xff]  ;;  %v641_v16 = vld [vmem:[%s6190_s1 + $0x7e8] sm:$0xff]  ;;  %v639_v17 = vld [vmem:[%s6190_s1 + $0x7d8] sm:$0xff] }
  0xdd   : > { %3347 = vmatprep.subr.bf16.mxu1 %v3346_v30  ;;  %v602_v30 = vld [vmem:[%s6190_s1 + $0x6b0] sm:$0xff]  ;;  %v3240_v35 = vpack.c.bf16 %v600_v26, %v596_v23  ;;  %v640_v23 = vld [vmem:[%s6190_s1 + $0x7e0] sm:$0xff] }
  0xde   : > { %v638_v26 = vld [vmem:[%s6190_s1 + $0x7d0] sm:$0xff] }
  0xdf   : > { %3221 = vmatpush1.bf16.msra.mxu0 %v3220_v36  ;;  %v3368_v36 = vpack.c.bf16 %v602_v30, %v598_v27  ;;  %v3386_v27 = vpack.c.bf16 %v643_v18, %v639_v17  ;;  %v2619_v30 = vld [vmem:[%s6190_s1 + $0x1008] sm:$0xff]  ;;  %v2644_v17 = vld [vmem:[%s6190_s1 + $0x10d0] sm:$0xff] }
  0xe0   : > { %3349 = vmatpush1.bf16.msra.mxu1 %v3348_v37  ;;  %3223 = vmatprep.subr.bf16.mxu0 %v3222_v38  ;;  %v3242_v37 = vpack.c.bf16 %v609_v32, %v605_v31  ;;  %v604_v38 = vld [vmem:[%s6190_s1 + $0x6c0] sm:$0xff]  ;;  %v2623_v31 = vld [vmem:[%s6190_s1 + $0x1028] sm:$0xff]  ;;  %v2621_v32 = vld [vmem:[%s6190_s1 + $0x1018] sm:$0xff] }
  0xe1   : > { %3351 = vmatprep.subr.bf16.mxu1 %v3350_v42  ;;  %v610_v42 = vld [vmem:[%s6190_s1 + $0x6f0] sm:$0xff]  ;;  %v3244_v48 = vpack.c.bf16 %v608_v39, %v604_v38  ;;  %v3390_v38 = vpack.c.bf16 %v2623_v31, %v2619_v30  ;;  %v2618_v39 = vld [vmem:[%s6190_s1 + $0x1000] sm:$0xff] }
  0xe2   : > { %v2650_v30 = vld [vmem:[%s6190_s1 + $0x1100] sm:$0xff] }
  0xe3   : > { %3225 = vmatpush1.bf16.msra.mxu0 %v3224_v49  ;;  %v3372_v49 = vpack.c.bf16 %v610_v42, %v606_v40  ;;  %v2622_v40 = vld [vmem:[%s6190_s1 + $0x1020] sm:$0xff]  ;;  %v3518_v42 = vpack.c.bf16 %v2625_v47, %v2621_v32  ;;  %v2652_v32 = vld [vmem:[%s6190_s1 + $0x1110] sm:$0xff] }
  0xe4   : > { %3353 = vmatpush1.bf16.msra.mxu1 %v3352_v50  ;;  %3227 = vmatprep.subr.bf16.mxu0 %v3226_v51  ;;  %v3246_v50 = vpack.c.bf16 %v617_v44, %v613_v43  ;;  %v612_v51 = vld [vmem:[%s6190_s1 + $0x700] sm:$0xff]  ;;  %v2624_v43 = vld [vmem:[%s6190_s1 + $0x1030] sm:$0xff]  ;;  %v2627_v44 = vld [vmem:[%s6190_s1 + $0x1048] sm:$0xff] }
  0xe5   : > { %3355 = vmatprep.subr.bf16.mxu1 %v3354_v55  ;;  %v618_v55 = vld [vmem:[%s6190_s1 + $0x730] sm:$0xff]  ;;  %v3248_v61 = vpack.c.bf16 %v616_v52, %v612_v51  ;;  %v3392_v52 = vpack.c.bf16 %v2622_v40, %v2618_v39  ;;  %v2654_v31 = vld [vmem:[%s6190_s1 + $0x1120] sm:$0xff] }
  0xe6   : > { %v386_v51 = vld [vmem:[#allocation2 + $0x10] sm:$0xff]  ;;  %v3408_v39 = vpack.c.bf16 %v2654_v31, %v2650_v30  ;;  %v2694_v30 = vld [vmem:[%s6190_s1 + $0x1260] sm:$0xff] }
  0xe7   : > { %3229 = vmatpush1.bf16.msra.mxu0 %v3228_v62  ;;  %v3376_v62 = vpack.c.bf16 %v618_v55, %v614_v53  ;;  %v2626_v55 = vld [vmem:[%s6190_s1 + $0x1040] sm:$0xff]  ;;  %v2692_v31 = vld [vmem:[%s6190_s1 + $0x1250] sm:$0xff] }
  0xe8   : > { %3357 = vmatpush1.bf16.msra.mxu1 %v3356_v63  ;;  %3231 = vmatprep.subr.bf16.mxu0 %v3230_v0  ;;  %v3250_v63 = vpack.c.bf16 %v625_v57, %v621_v56  ;;  %v620_v0 = vld [vmem:[%s6190_s1 + $0x740] sm:$0xff]  ;;  %v2628_v57 = vld [vmem:[%s6190_s1 + $0x1050] sm:$0xff] }
  0xe9   : > { %3359 = vmatprep.subr.bf16.mxu1 %v3358_v4  ;;  %v626_v4 = vld [vmem:[%s6190_s1 + $0x770] sm:$0xff]  ;;  %v3252_v9 = vpack.c.bf16 %v624_v1, %v620_v0  ;;  %v2630_v56 = vld [vmem:[%s6190_s1 + $0x1060] sm:$0xff]  ;;  %v2641_v0 = vld [vmem:[%s6190_s1 + $0x10b8] sm:$0xff] }
  0xeb   : > { %3233 = vmatpush1.bf16.msra.mxu0 %v3232_v10  ;;  %v3380_v10 = vpack.c.bf16 %v626_v4, %v622_v2  ;;  %v3396_v2 = vpack.c.bf16 %v2630_v56, %v2626_v55  ;;  %v2666_v55 = vld [vmem:[%s6190_s1 + $0x1180] sm:$0xff] }
  0xec   : > { %3361 = vmatpush1.bf16.msra.mxu1 %v3360_v11  ;;  %3235 = vmatprep.subr.bf16.mxu0 %v3234_v24  ;;  %v3254_v11 = vpack.c.bf16 %v633_v6, %v629_v5  ;;  %v628_v24 = vld [vmem:[%s6190_s1 + $0x780] sm:$0xff] }
  0xed   : > { %3363 = vmatprep.subr.bf16.mxu1 %v3362_v25  ;;  %v634_v25 = vld [vmem:[%s6190_s1 + $0x7b0] sm:$0xff]  ;;  %v3256_v19 = vpack.c.bf16 %v632_v12, %v628_v24  ;;  %v2634_v5 = vld [vmem:[%s6190_s1 + $0x1080] sm:$0xff]  ;;  %v2645_v24 = vld [vmem:[%s6190_s1 + $0x10d8] sm:$0xff] }
  0xee   : > { %v2638_v6 = vld [vmem:[%s6190_s1 + $0x10a0] sm:$0xff]  ;;  %v2649_v12 = vld [vmem:[%s6190_s1 + $0x10f8] sm:$0xff] }
  0xef   : > { %3237 = vmatpush1.bf16.msra.mxu0 %v3236_v20  ;;  %v3384_v20 = vpack.c.bf16 %v634_v25, %v630_v13  ;;  %v3400_v13 = vpack.c.bf16 %v2638_v6, %v2634_v5  ;;  %v3530_v18 = vpack.c.bf16 %v2649_v12, %v2645_v24  ;;  %v2670_v56 = vld [vmem:[%s6190_s1 + $0x11a0] sm:$0xff]  ;;  %v2676_v6 = vld [vmem:[%s6190_s1 + $0x11d0] sm:$0xff]  ;;  %v2689_v24 = vld [vmem:[%s6190_s1 + $0x1238] sm:$0xff] }
  0xf0   : > { %3365 = vmatpush1.bf16.msra.mxu1 %v3364_v21  ;;  %3239 = vmatprep.subr.bf16.mxu0 %v3238_v22  ;;  %v3258_v21 = vpack.c.bf16 %v641_v16, %v637_v15  ;;  %v636_v22 = vld [vmem:[%s6190_s1 + $0x7c0] sm:$0xff] }
  0xf1   : > { %3367 = vmatprep.subr.bf16.mxu1 %v3366_v29  ;;  %v642_v29 = vld [vmem:[%s6190_s1 + $0x7f0] sm:$0xff]  ;;  %v3260_v34 = vpack.c.bf16 %v640_v23, %v636_v22  ;;  %v2642_v15 = vld [vmem:[%s6190_s1 + $0x10c0] sm:$0xff]  ;;  %v2653_v22 = vld [vmem:[%s6190_s1 + $0x1118] sm:$0xff] }
  0xf2   : > { %v2646_v16 = vld [vmem:[%s6190_s1 + $0x10e0] sm:$0xff]  ;;  %v2657_v23 = vld [vmem:[%s6190_s1 + $0x1138] sm:$0xff] }
  0xf3   : > { %3241 = vmatpush1.bf16.msra.mxu0 %v3240_v35  ;;  %v1503_v35 = vld [vmem:[#allocation2 + $0x8] sm:$0xfc]  ;;  %v3534_v47 = vpack.c.bf16 %v2657_v23, %v2653_v22  ;;  %v2678_v5 = vld [vmem:[%s6190_s1 + $0x11e0] sm:$0xff]  ;;  %v2697_v22 = vld [vmem:[%s6190_s1 + $0x1278] sm:$0xff] }
  0xf4   : > { %3369 = vmatpush1.bf16.msra.mxu1 %v3368_v36  ;;  %3243 = vmatprep.subr.bf16.mxu0 %v3242_v37  ;;  %v1507_v36 = vld [vmem:[#allocation2 + $0x28] sm:$0x3]  ;;  %v3388_v37 = vpack.c.bf16 %v642_v29, %v638_v26  ;;  %v3404_v26 = vpack.c.bf16 %v2646_v16, %v2642_v15  ;;  %v2686_v15 = vld [vmem:[%s6190_s1 + $0x1220] sm:$0xff]  ;;  %v2684_v16 = vld [vmem:[%s6190_s1 + $0x1210] sm:$0xff] }
  0xf5   : > { %3371 = vmatprep.subr.bf16.mxu1 %v3370_v41  ;;  %v2620_v41 = vld [vmem:[%s6190_s1 + $0x1010] sm:$0xff] }
  0xf6   : > { %v3520_v53 = vpack.c.bf16 %v2624_v43, %v2620_v41  ;;  %v2662_v43 = vld [vmem:[%s6190_s1 + $0x1160] sm:$0xff] }
  0xf7   : > { %3245 = vmatpush1.bf16.msra.mxu0 %v3244_v48  ;;  %v2633_v48 = vld [vmem:[%s6190_s1 + $0x1078] sm:$0xff] }
  0xf8   : > { %3373 = vmatpush1.bf16.msra.mxu1 %v3372_v49  ;;  %3247 = vmatprep.subr.bf16.mxu0 %v3246_v50  ;;  %v1779_v49 = vrot.slane %v1503_v35, 2  ;;  %v1780_v50 = vrot.slane %v1507_v36, 2  ;;  %v3522_v58 = vpack.c.bf16 %v2633_v48, %v2629_v46  ;;  %v2659_v35 = vld [vmem:[%s6190_s1 + $0x1148] sm:$0xff]  ;;  %v2664_v46 = vld [vmem:[%s6190_s1 + $0x1170] sm:$0xff] }
  0xf9   : > { %3375 = vmatprep.subr.bf16.mxu1 %v3374_v54  ;;  %v3394_v54 = vpack.c.bf16 %v2631_v45, %v2627_v44  ;;  %v2663_v36 = vld [vmem:[%s6190_s1 + $0x1168] sm:$0xff]  ;;  %v2660_v44 = vld [vmem:[%s6190_s1 + $0x1150] sm:$0xff] }
  0xfa   : > { %v1781_v1 = vsel %vm1775_vm2, %v1779_v49, %v1780_v50  ;;  %v3410_v41 = vpack.c.bf16 %v2663_v36, %v2659_v35  ;;  %v2667_v48 = vld [vmem:[%s6190_s1 + $0x1188] sm:$0xff]  ;;  %v2669_v50 = vld [vmem:[%s6190_s1 + $0x1198] sm:$0xff] }
  0xfb   : > { %3249 = vmatpush1.bf16.msra.mxu0 %v3248_v61  ;;  %v2635_v61 = vld [vmem:[%s6190_s1 + $0x1088] sm:$0xff]  ;;  %v2701_v36 = vld [vmem:[%s6190_s1 + $0x1298] sm:$0xff] }
  0xfc   : > { %3377 = vmatpush1.bf16.msra.mxu1 %v3376_v62  ;;  %3251 = vmatprep.subr.bf16.mxu0 %v3250_v63  ;;  %v2639_v62 = vld [vmem:[%s6190_s1 + $0x10a8] sm:$0xff]  ;;  %v2637_v63 = vld [vmem:[%s6190_s1 + $0x1098] sm:$0xff] }
  0xfd   : > { %3379 = vmatprep.subr.bf16.mxu1 %v3378_v3  ;;  %v3524_v3 = vpack.c.bf16 %v2632_v59, %v2628_v57  ;;  %v3398_v4 = vpack.c.bf16 %v2639_v62, %v2635_v61  ;;  %v3526_v8 = vpack.c.bf16 %v2641_v0, %v2637_v63  ;;  %v2671_v49 = vld [vmem:[%s6190_s1 + $0x11a8] sm:$0xff]  ;;  %v2668_v57 = vld [vmem:[%s6190_s1 + $0x1190] sm:$0xff]  ;;  %v2677_v63 = vld [vmem:[%s6190_s1 + $0x11d8] sm:$0xff] }
  0xfe   : > { %v2672_v59 = vld [vmem:[%s6190_s1 + $0x11b0] sm:$0xff]  ;;  %v2675_v61 = vld [vmem:[%s6190_s1 + $0x11c8] sm:$0xff]  ;;  %v2681_v0 = vld [vmem:[%s6190_s1 + $0x11f8] sm:$0xff] }
  0xff   : > { %3253 = vmatpush1.bf16.msra.mxu0 %v3252_v9  ;;  %v2640_v9 = vld [vmem:[%s6190_s1 + $0x10b0] sm:$0xff]  ;;  %v2679_v62 = vld [vmem:[%s6190_s1 + $0x11e8] sm:$0xff] }
 0x100   : > { %3381 = vmatpush1.bf16.msra.mxu1 %v3380_v10  ;;  %3255 = vmatprep.subr.bf16.mxu0 %v3254_v11  ;;  %v2643_v10 = vld [vmem:[%s6190_s1 + $0x10c8] sm:$0xff] }
 0x101   : > { %3383 = vmatprep.subr.bf16.mxu1 %v3382_v14  ;;  %v2647_v11 = vld [vmem:[%s6190_s1 + $0x10e8] sm:$0xff]  ;;  %v3528_v14 = vpack.c.bf16 %v2640_v9, %v2636_v7  ;;  %v3546_v7 = vpack.c.bf16 %v2681_v0, %v2677_v63  ;;  %v2721_v63 = vld [vmem:[%s6190_s1 + $0x1338] sm:$0xff] }
 0x102   : > { %v3402_v25 = vpack.c.bf16 %v2647_v11, %v2643_v10  ;;  %v2683_v9 = vld [vmem:[%s6190_s1 + $0x1208] sm:$0xff]  ;;  %v2685_v11 = vld [vmem:[%s6190_s1 + $0x1218] sm:$0xff] }
 0x103   : > { %3257 = vmatpush1.bf16.msra.mxu0 %v3256_v19  ;;  %v2648_v19 = vld [vmem:[%s6190_s1 + $0x10f0] sm:$0xff]  ;;  %v2687_v10 = vld [vmem:[%s6190_s1 + $0x1228] sm:$0xff] }
 0x104   : > { %3385 = vmatpush1.bf16.msra.mxu1 %v3384_v20  ;;  %3259 = vmatprep.subr.bf16.mxu0 %v3258_v21  ;;  %v2651_v20 = vld [vmem:[%s6190_s1 + $0x1108] sm:$0xff] }
 0x105   : > { %3387 = vmatprep.subr.bf16.mxu1 %v3386_v27  ;;  %v2655_v21 = vld [vmem:[%s6190_s1 + $0x1128] sm:$0xff]  ;;  %v3532_v27 = vpack.c.bf16 %v2648_v19, %v2644_v17  ;;  %v3550_v17 = vpack.c.bf16 %v2689_v24, %v2685_v11  ;;  %v2729_v11 = vld [vmem:[%s6190_s1 + $0x1378] sm:$0xff] }
 0x106   : > { %v3406_v29 = vpack.c.bf16 %v2655_v21, %v2651_v20  ;;  %v2691_v19 = vld [vmem:[%s6190_s1 + $0x1248] sm:$0xff]  ;;  %v2693_v21 = vld [vmem:[%s6190_s1 + $0x1258] sm:$0xff] }
 0x107   : > { %3261 = vmatpush1.bf16.msra.mxu0 %v3260_v34  ;;  %v2656_v34 = vld [vmem:[%s6190_s1 + $0x1130] sm:$0xff]  ;;  %v2695_v20 = vld [vmem:[%s6190_s1 + $0x1268] sm:$0xff] }
 0x108   : > { %3389 = vmatpush1.bf16.msra.mxu1 %v3388_v37  ;;  %3391 = vmatprep.subr.bf16.mxu0 %v3390_v38  ;;  %v2661_v37 = vld [vmem:[%s6190_s1 + $0x1158] sm:$0xff]  ;;  %v3536_v40 = vpack.c.bf16 %v2656_v34, %v2652_v32  ;;  %v3554_v32 = vpack.c.bf16 %v2697_v22, %v2693_v21  ;;  %v2699_v34 = vld [vmem:[%s6190_s1 + $0x1288] sm:$0xff] }
 0x109   : > { %3519 = vmatprep.subr.bf16.mxu1 %v3518_v42  ;;  %v2665_v38 = vld [vmem:[%s6190_s1 + $0x1178] sm:$0xff]  ;;  %v2658_v42 = vld [vmem:[%s6190_s1 + $0x1140] sm:$0xff]  ;;  %v2703_v35 = vld [vmem:[%s6190_s1 + $0x12a8] sm:$0xff] }
 0x10a   : > { %1354 = vmatmul.mubr.f32.vlgmr.msra.gmra.mrb[0].mxu0 %v386_v51  ;;  %v3538_v45 = vpack.c.bf16 %v2665_v38, %v2661_v37  ;;  %v2705_v37 = vld [vmem:[%s6190_s1 + $0x12b8] sm:$0xff] }
 0x10b   : > { %1496 = vmatmul.mubr.f32.vlgmr.msra.gmra.mrb[0].mxu1 %v386_v51  ;;  %3393 = vmatpush1.bf16.msra.mxu0 %v3392_v52  ;;  %v2673_v51 = vld [vmem:[%s6190_s1 + $0x11b8] sm:$0xff]  ;;  %v3412_v52 = vpack.c.bf16 %v2662_v43, %v2658_v42  ;;  %v2702_v42 = vld [vmem:[%s6190_s1 + $0x12a0] sm:$0xff]  ;;  %v2700_v43 = vld [vmem:[%s6190_s1 + $0x1290] sm:$0xff] }
 0x10c   : > { %3521 = vmatpush1.bf16.msra.mxu1 %v3520_v53  ;;  %3395 = vmatprep.subr.bf16.mxu0 %v3394_v54  ;;  %v3540_v53 = vpack.c.bf16 %v2664_v46, %v2660_v44  ;;  %v3414_v54 = vpack.c.bf16 %v2671_v49, %v2667_v48  ;;  %v3558_v44 = vpack.c.bf16 %v2705_v37, %v2701_v36  ;;  %v2707_v46 = vld [vmem:[%s6190_s1 + $0x12c8] sm:$0xff]  ;;  %v2709_v49 = vld [vmem:[%s6190_s1 + $0x12d8] sm:$0xff] }
 0x10d   : > { %3523 = vmatprep.subr.bf16.mxu1 %v3522_v58  ;;  %1856 = vmatprep.mubr.f32.mxu0 %v1781_v1  ;;  %v3542_v58 = vpack.c.bf16 %v2673_v51, %v2669_v50  ;;  %v2711_v48 = vld [vmem:[%s6190_s1 + $0x12e8] sm:$0xff]  ;;  %v2713_v50 = vld [vmem:[%s6190_s1 + $0x12f8] sm:$0xff] }
 0x10e   : > { %1998 = vmatprep.mubr.f32.mxu1 %v1781_v1  ;;  %v3416_v1 = vpack.c.bf16 %v2670_v56, %v2666_v55  ;;  %v2710_v55 = vld [vmem:[%s6190_s1 + $0x12e0] sm:$0xff]  ;;  %v2708_v56 = vld [vmem:[%s6190_s1 + $0x12d0] sm:$0xff]  ;;  %v2737_v21 = vld [vmem:[%s6190_s1 + $0x13b8] sm:$0xff] }
 0x10f   : > { %3397 = vmatpush1.bf16.msra.mxu0 %v3396_v2  ;;  %v3544_v2 = vpack.c.bf16 %v2672_v59, %v2668_v57  ;;  %v3562_v57 = vpack.c.bf16 %v2713_v50, %v2709_v49  ;;  %v2715_v59 = vld [vmem:[%s6190_s1 + $0x1308] sm:$0xff]  ;;  %v2745_v36 = vld [vmem:[%s6190_s1 + $0x13f8] sm:$0xff] }
 0x110   : > { %3525 = vmatpush1.bf16.msra.mxu1 %v3524_v3  ;;  %3399 = vmatprep.subr.bf16.mxu0 %v3398_v4  ;;  %v3418_v3 = vpack.c.bf16 %v2679_v62, %v2675_v61  ;;  %v2674_v4 = vld [vmem:[%s6190_s1 + $0x11c0] sm:$0xff]  ;;  %v2719_v61 = vld [vmem:[%s6190_s1 + $0x1328] sm:$0xff]  ;;  %v2717_v62 = vld [vmem:[%s6190_s1 + $0x1318] sm:$0xff] }
 0x111   : > { %3527 = vmatprep.subr.bf16.mxu1 %v3526_v8  ;;  %v2680_v8 = vld [vmem:[%s6190_s1 + $0x11f0] sm:$0xff]  ;;  %v3420_v12 = vpack.c.bf16 %v2678_v5, %v2674_v4  ;;  %v2718_v4 = vld [vmem:[%s6190_s1 + $0x1320] sm:$0xff]  ;;  %v2751_v49 = vld [vmem:[%s6190_s1 + $0x1428] sm:$0xff] }
 0x112   : > { %v2716_v5 = vld [vmem:[%s6190_s1 + $0x1310] sm:$0xff]  ;;  %v2749_v50 = vld [vmem:[%s6190_s1 + $0x1418] sm:$0xff] }
 0x113   : > { %3401 = vmatpush1.bf16.msra.mxu0 %v3400_v13  ;;  %v3548_v13 = vpack.c.bf16 %v2680_v8, %v2676_v6  ;;  %v3566_v6 = vpack.c.bf16 %v2721_v63, %v2717_v62  ;;  %v2723_v8 = vld [vmem:[%s6190_s1 + $0x1348] sm:$0xff]  ;;  %v2748_v62 = vld [vmem:[%s6190_s1 + $0x1410] sm:$0xff] }
 0x114   : > { %3529 = vmatpush1.bf16.msra.mxu1 %v3528_v14  ;;  %3403 = vmatprep.subr.bf16.mxu0 %v3402_v25  ;;  %v3422_v14 = vpack.c.bf16 %v2687_v10, %v2683_v9  ;;  %v2682_v25 = vld [vmem:[%s6190_s1 + $0x1200] sm:$0xff]  ;;  %v2727_v9 = vld [vmem:[%s6190_s1 + $0x1368] sm:$0xff]  ;;  %v2725_v10 = vld [vmem:[%s6190_s1 + $0x1358] sm:$0xff] }
 0x115   : > { %3531 = vmatprep.subr.bf16.mxu1 %v3530_v18  ;;  %v2688_v18 = vld [vmem:[%s6190_s1 + $0x1230] sm:$0xff]  ;;  %v3424_v23 = vpack.c.bf16 %v2686_v15, %v2682_v25  ;;  %v2726_v25 = vld [vmem:[%s6190_s1 + $0x1360] sm:$0xff] }
 0x116   : > { %v2724_v15 = vld [vmem:[%s6190_s1 + $0x1350] sm:$0xff] }
 0x117   : > { %3405 = vmatpush1.bf16.msra.mxu0 %v3404_v26  ;;  %v3552_v26 = vpack.c.bf16 %v2688_v18, %v2684_v16  ;;  %v3570_v16 = vpack.c.bf16 %v2729_v11, %v2725_v10  ;;  %v2731_v18 = vld [vmem:[%s6190_s1 + $0x1388] sm:$0xff]  ;;  %v2754_v11 = vld [vmem:[%s6190_s1 + $0x1440] sm:$0xff] }
 0x118   : > { %3533 = vmatpush1.bf16.msra.mxu1 %v3532_v27  ;;  %3407 = vmatprep.subr.bf16.mxu0 %v3406_v29  ;;  %v3426_v27 = vpack.c.bf16 %v2695_v20, %v2691_v19  ;;  %v2690_v29 = vld [vmem:[%s6190_s1 + $0x1240] sm:$0xff]  ;;  %v2735_v19 = vld [vmem:[%s6190_s1 + $0x13a8] sm:$0xff]  ;;  %v2733_v20 = vld [vmem:[%s6190_s1 + $0x1398] sm:$0xff] }
 0x119   : > { %3535 = vmatprep.subr.bf16.mxu1 %v3534_v47  ;;  %v2696_v47 = vld [vmem:[%s6190_s1 + $0x1270] sm:$0xff]  ;;  %v3428_v38 = vpack.c.bf16 %v2694_v30, %v2690_v29  ;;  %v2734_v29 = vld [vmem:[%s6190_s1 + $0x13a0] sm:$0xff] }
 0x11a   : > { %v2732_v30 = vld [vmem:[%s6190_s1 + $0x1390] sm:$0xff] }
 0x11b   : > { %3409 = vmatpush1.bf16.msra.mxu0 %v3408_v39  ;;  %v3556_v39 = vpack.c.bf16 %v2696_v47, %v2692_v31  ;;  %v3574_v31 = vpack.c.bf16 %v2737_v21, %v2733_v20  ;;  %v2739_v47 = vld [vmem:[%s6190_s1 + $0x13c8] sm:$0xff] }
 0x11c   : > { %3537 = vmatpush1.bf16.msra.mxu1 %v3536_v40  ;;  %3411 = vmatprep.subr.bf16.mxu0 %v3410_v41  ;;  %v3430_v40 = vpack.c.bf16 %v2703_v35, %v2699_v34  ;;  %v2698_v41 = vld [vmem:[%s6190_s1 + $0x1280] sm:$0xff]  ;;  %v2743_v34 = vld [vmem:[%s6190_s1 + $0x13e8] sm:$0xff]  ;;  %v2741_v35 = vld [vmem:[%s6190_s1 + $0x13d8] sm:$0xff] }
 0x11d   : > { %3539 = vmatprep.subr.bf16.mxu1 %v3538_v45  ;;  %v2704_v45 = vld [vmem:[%s6190_s1 + $0x12b0] sm:$0xff]  ;;  %v3432_v51 = vpack.c.bf16 %v2702_v42, %v2698_v41  ;;  %v3450_v41 = vpack.c.bf16 %v2743_v34, %v2739_v47  ;;  %v2777_v47 = vld [vmem:[%s6190_s1 + $0x14f8] sm:$0xff] }
 0x11e   : > { %v2740_v42 = vld [vmem:[%s6190_s1 + $0x13d0] sm:$0xff] }
 0x11f   : > { %3413 = vmatpush1.bf16.msra.mxu0 %v3412_v52  ;;  %v3560_v52 = vpack.c.bf16 %v2704_v45, %v2700_v43  ;;  %v1502_v43 = vld [vmem:[#allocation2] sm:$0xfc]  ;;  %v3578_v45 = vpack.c.bf16 %v2745_v36, %v2741_v35 }
 0x120   : > { %3541 = vmatpush1.bf16.msra.mxu1 %v3540_v53  ;;  %3415 = vmatprep.subr.bf16.mxu0 %v3414_v54  ;;  %v3434_v53 = vpack.c.bf16 %v2711_v48, %v2707_v46  ;;  %v2706_v54 = vld [vmem:[%s6190_s1 + $0x12c0] sm:$0xff]  ;;  %v2744_v46 = vld [vmem:[%s6190_s1 + $0x13f0] sm:$0xff]  ;;  %v2747_v48 = vld [vmem:[%s6190_s1 + $0x1408] sm:$0xff] }
 0x121   : > { %3543 = vmatprep.subr.bf16.mxu1 %v3542_v58  ;;  %v2712_v58 = vld [vmem:[%s6190_s1 + $0x12f0] sm:$0xff]  ;;  %v3436_v0 = vpack.c.bf16 %v2710_v55, %v2706_v54  ;;  %v1505_v55 = vld [vmem:[#allocation2 + $0x18] sm:$0xfc] }
 0x123   : > { %3417 = vmatpush1.bf16.msra.mxu0 %v3416_v1  ;;  %v3564_v1 = vpack.c.bf16 %v2712_v58, %v2708_v56  ;;  %v1509_v56 = vld [vmem:[#allocation2 + $0x38] sm:$0x3]  ;;  %v3454_v58 = vpack.c.bf16 %v2751_v49, %v2747_v48 }
 0x124   : > { %3545 = vmatpush1.bf16.msra.mxu1 %v3544_v2  ;;  %3419 = vmatprep.subr.bf16.mxu0 %v3418_v3  ;;  %v3438_v2 = vpack.c.bf16 %v2719_v61, %v2715_v59  ;;  %v2714_v3 = vld [vmem:[%s6190_s1 + $0x1300] sm:$0xff] }
 0x125   : > { %3547 = vmatprep.subr.bf16.mxu1 %v3546_v7  ;;  %v2720_v7 = vld [vmem:[%s6190_s1 + $0x1330] sm:$0xff]  ;;  %v3440_v24 = vpack.c.bf16 %v2718_v4, %v2714_v3  ;;  %v2746_v59 = vld [vmem:[%s6190_s1 + $0x1400] sm:$0xff]  ;;  %v2757_v3 = vld [vmem:[%s6190_s1 + $0x1458] sm:$0xff] }
 0x126   : > { %v2750_v61 = vld [vmem:[%s6190_s1 + $0x1420] sm:$0xff]  ;;  %v2761_v4 = vld [vmem:[%s6190_s1 + $0x1478] sm:$0xff] }
 0x127   : > { %3421 = vmatpush1.bf16.msra.mxu0 %v3420_v12  ;;  %v3568_v12 = vpack.c.bf16 %v2720_v7, %v2716_v5  ;;  %v1785_v5 = vrot.slane %v1505_v55, 2  ;;  %v2787_v55 = vld [vmem:[%s6190_s1 + $0x1548] sm:$0xff] }
 0x128   : > { %3549 = vmatpush1.bf16.msra.mxu1 %v3548_v13  ;;  %3423 = vmatprep.subr.bf16.mxu0 %v3422_v14  ;;  %v3442_v13 = vpack.c.bf16 %v2727_v9, %v2723_v8  ;;  %v2722_v14 = vld [vmem:[%s6190_s1 + $0x1340] sm:$0xff]  ;;  %v3456_v8 = vpack.c.bf16 %v2750_v61, %v2746_v59 }
 0x129   : > { %3551 = vmatprep.subr.bf16.mxu1 %v3550_v17  ;;  %v2728_v17 = vld [vmem:[%s6190_s1 + $0x1370] sm:$0xff]  ;;  %v3444_v22 = vpack.c.bf16 %v2726_v25, %v2722_v14  ;;  %v2763_v25 = vld [vmem:[%s6190_s1 + $0x1488] sm:$0xff] }
 0x12a   : > { %v2760_v14 = vld [vmem:[%s6190_s1 + $0x1470] sm:$0xff] }
 0x12b   : > { %3425 = vmatpush1.bf16.msra.mxu0 %v3424_v23  ;;  %v3572_v23 = vpack.c.bf16 %v2728_v17, %v2724_v15  ;;  %v2767_v15 = vld [vmem:[%s6190_s1 + $0x14a8] sm:$0xff]  ;;  %v2769_v17 = vld [vmem:[%s6190_s1 + $0x14b8] sm:$0xff] }
 0x12c   : > { %3553 = vmatpush1.bf16.msra.mxu1 %v3552_v26  ;;  %3427 = vmatprep.subr.bf16.mxu0 %v3426_v27  ;;  %v3446_v26 = vpack.c.bf16 %v2735_v19, %v2731_v18  ;;  %v2730_v27 = vld [vmem:[%s6190_s1 + $0x1380] sm:$0xff]  ;;  %v3462_v21 = vpack.c.bf16 %v2767_v15, %v2763_v25  ;;  %v2803_v25 = vld [vmem:[%s6190_s1 + $0x15c8] sm:$0xff] }
 0x12d   : > { %3555 = vmatprep.subr.bf16.mxu1 %v3554_v32  ;;  %v2736_v32 = vld [vmem:[%s6190_s1 + $0x13b0] sm:$0xff]  ;;  %v3448_v37 = vpack.c.bf16 %v2734_v29, %v2730_v27  ;;  %v2807_v15 = vld [vmem:[%s6190_s1 + $0x15e8] sm:$0xff] }
 0x12e   : > { %v2768_v29 = vld [vmem:[%s6190_s1 + $0x14b0] sm:$0xff] }
 0x12f   : > { %3429 = vmatpush1.bf16.msra.mxu0 %v3428_v38  ;;  %v2738_v38 = vld [vmem:[%s6190_s1 + $0x13c0] sm:$0xff] }
 0x130   : > { %3557 = vmatpush1.bf16.msra.mxu1 %v3556_v39  ;;  %3431 = vmatprep.subr.bf16.mxu0 %v3430_v40  ;;  %v2742_v39 = vld [vmem:[%s6190_s1 + $0x13e0] sm:$0xff]  ;;  %v3576_v40 = vpack.c.bf16 %v2736_v32, %v2732_v30  ;;  %v2771_v30 = vld [vmem:[%s6190_s1 + $0x14c8] sm:$0xff]  ;;  %v2773_v32 = vld [vmem:[%s6190_s1 + $0x14d8] sm:$0xff] }
 0x131   : > { %3559 = vmatprep.subr.bf16.mxu1 %v3558_v44  ;;  %v1506_v44 = vld [vmem:[#allocation2 + $0x20] sm:$0x3] }
 0x132   : > { %v1777_v54 = vrot.slane %v1506_v44, 2  ;;  %v2781_v44 = vld [vmem:[%s6190_s1 + $0x1518] sm:$0xff] }
 0x133   : > { %3433 = vmatpush1.bf16.msra.mxu0 %v3432_v51  ;;  %v2753_v51 = vld [vmem:[%s6190_s1 + $0x1438] sm:$0xff] }
 0x134   : > { %3561 = vmatpush1.bf16.msra.mxu1 %v3560_v52  ;;  %3435 = vmatprep.subr.bf16.mxu0 %v3434_v53  ;;  %v3452_v52 = vpack.c.bf16 %v2742_v39, %v2738_v38  ;;  %v1776_v53 = vrot.slane %v1502_v43, 2  ;;  %v3582_v63 = vpack.c.bf16 %v2753_v51, %v2749_v50  ;;  %v2774_v38 = vld [vmem:[%s6190_s1 + $0x14e0] sm:$0xff]  ;;  %v2772_v39 = vld [vmem:[%s6190_s1 + $0x14d0] sm:$0xff]  ;;  %v2783_v43 = vld [vmem:[%s6190_s1 + $0x1528] sm:$0xff] }
 0x135   : > { %3563 = vmatprep.subr.bf16.mxu1 %v3562_v57  ;;  %v3580_v57 = vpack.c.bf16 %v2744_v46, %v2740_v42  ;;  %v2779_v42 = vld [vmem:[%s6190_s1 + $0x1508] sm:$0xff]  ;;  %v2778_v50 = vld [vmem:[%s6190_s1 + $0x1500] sm:$0xff] }
 0x136   : > { %v1778_v7 = vsel %vm1775_vm2, %v1776_v53, %v1777_v54  ;;  %v3470_v49 = vpack.c.bf16 %v2783_v43, %v2779_v42  ;;  %v2782_v51 = vld [vmem:[%s6190_s1 + $0x1520] sm:$0xff]  ;;  %v2784_v54 = vld [vmem:[%s6190_s1 + $0x1530] sm:$0xff]  ;;  %v2823_v42 = vld [vmem:[%s6190_s1 + $0x1668] sm:$0xff] }
 0x137   : > { %3437 = vmatpush1.bf16.msra.mxu0 %v3436_v0  ;;  %v2752_v0 = vld [vmem:[%s6190_s1 + $0x1430] sm:$0xff]  ;;  %v3472_v59 = vpack.c.bf16 %v2782_v51, %v2778_v50  ;;  %v2821_v43 = vld [vmem:[%s6190_s1 + $0x1658] sm:$0xff]  ;;  %v2822_v50 = vld [vmem:[%s6190_s1 + $0x1660] sm:$0xff] }
 0x138   : > { %3565 = vmatpush1.bf16.msra.mxu1 %v3564_v1  ;;  %3439 = vmatprep.subr.bf16.mxu0 %v3438_v2  ;;  %v2755_v1 = vld [vmem:[%s6190_s1 + $0x1448] sm:$0xff]  ;;  %v3584_v9 = vpack.c.bf16 %v2752_v0, %v2748_v62  ;;  %v2790_v0 = vld [vmem:[%s6190_s1 + $0x1560] sm:$0xff]  ;;  %v2820_v51 = vld [vmem:[%s6190_s1 + $0x1650] sm:$0xff] }
 0x139   : > { %3567 = vmatprep.subr.bf16.mxu1 %v3566_v6  ;;  %v2759_v2 = vld [vmem:[%s6190_s1 + $0x1468] sm:$0xff]  ;;  %v1786_v6 = vrot.slane %v1509_v56, 2 }
 0x13a   : > { %v3458_v10 = vpack.c.bf16 %v2759_v2, %v2755_v1  ;;  %v2791_v56 = vld [vmem:[%s6190_s1 + $0x1568] sm:$0xff]  ;;  %v2788_v1 = vld [vmem:[%s6190_s1 + $0x1550] sm:$0xff] }
 0x13b   : > { %3441 = vmatpush1.bf16.msra.mxu0 %v3440_v24  ;;  %v2758_v24 = vld [vmem:[%s6190_s1 + $0x1460] sm:$0xff]  ;;  %v1787_v18 = vsel %vm1775_vm2, %v1785_v5, %v1786_v6  ;;  %v3474_v62 = vpack.c.bf16 %v2791_v56, %v2787_v55  ;;  %v2799_v5 = vld [vmem:[%s6190_s1 + $0x15a8] sm:$0xff]  ;;  %v2797_v6 = vld [vmem:[%s6190_s1 + $0x1598] sm:$0xff] }
 0x13c   : > { %3569 = vmatpush1.bf16.msra.mxu1 %v3568_v12  ;;  %3443 = vmatprep.subr.bf16.mxu0 %v3442_v13  ;;  %v2756_v12 = vld [vmem:[%s6190_s1 + $0x1450] sm:$0xff]  ;;  %v3586_v13 = vpack.c.bf16 %v2761_v4, %v2757_v3  ;;  %v3460_v19 = vpack.c.bf16 %v2758_v24, %v2754_v11  ;;  %v2795_v4 = vld [vmem:[%s6190_s1 + $0x1588] sm:$0xff]  ;;  %v2794_v11 = vld [vmem:[%s6190_s1 + $0x1580] sm:$0xff] }
 0x13d   : > { %3571 = vmatprep.subr.bf16.mxu1 %v3570_v16  ;;  %v2765_v16 = vld [vmem:[%s6190_s1 + $0x1498] sm:$0xff]  ;;  %v3588_v20 = vpack.c.bf16 %v2760_v14, %v2756_v12  ;;  %v2792_v3 = vld [vmem:[%s6190_s1 + $0x1570] sm:$0xff]  ;;  %v2798_v24 = vld [vmem:[%s6190_s1 + $0x15a0] sm:$0xff] }
 0x13e   : > { %v3590_v27 = vpack.c.bf16 %v2769_v17, %v2765_v16  ;;  %v2796_v12 = vld [vmem:[%s6190_s1 + $0x1590] sm:$0xff]  ;;  %v2805_v16 = vld [vmem:[%s6190_s1 + $0x15d8] sm:$0xff]  ;;  %v2831_v55 = vld [vmem:[%s6190_s1 + $0x16a8] sm:$0xff] }
 0x13f   : > { %3445 = vmatpush1.bf16.msra.mxu0 %v3444_v22  ;;  %v2762_v22 = vld [vmem:[%s6190_s1 + $0x1480] sm:$0xff]  ;;  %v2800_v14 = vld [vmem:[%s6190_s1 + $0x15b0] sm:$0xff]  ;;  %v2809_v17 = vld [vmem:[%s6190_s1 + $0x15f8] sm:$0xff] }
 0x140   : > { %3573 = vmatpush1.bf16.msra.mxu1 %v3572_v23  ;;  %3447 = vmatprep.subr.bf16.mxu0 %v3446_v26  ;;  %v2766_v23 = vld [vmem:[%s6190_s1 + $0x14a0] sm:$0xff]  ;;  %v2764_v26 = vld [vmem:[%s6190_s1 + $0x1490] sm:$0xff]  ;;  %v2829_v56 = vld [vmem:[%s6190_s1 + $0x1698] sm:$0xff] }
 0x141   : > { %3575 = vmatprep.subr.bf16.mxu1 %v3574_v31  ;;  %v2775_v31 = vld [vmem:[%s6190_s1 + $0x14e8] sm:$0xff]  ;;  %v3464_v34 = vpack.c.bf16 %v2766_v23, %v2762_v22  ;;  %v3592_v35 = vpack.c.bf16 %v2768_v29, %v2764_v26  ;;  %v2806_v22 = vld [vmem:[%s6190_s1 + $0x15e0] sm:$0xff]  ;;  %v2804_v23 = vld [vmem:[%s6190_s1 + $0x15d0] sm:$0xff]  ;;  %v3610_v26 = vpack.c.bf16 %v2809_v17, %v2805_v16 }
 0x142   : > { %v3466_v36 = vpack.c.bf16 %v2775_v31, %v2771_v30  ;;  %v2811_v29 = vld [vmem:[%s6190_s1 + $0x1608] sm:$0xff]  ;;  %v2813_v31 = vld [vmem:[%s6190_s1 + $0x1618] sm:$0xff] }
 0x143   : > { %3449 = vmatpush1.bf16.msra.mxu0 %v3448_v37  ;;  %v2770_v37 = vld [vmem:[%s6190_s1 + $0x14c0] sm:$0xff]  ;;  %v2815_v30 = vld [vmem:[%s6190_s1 + $0x1628] sm:$0xff]  ;;  %v2849_v16 = vld [vmem:[%s6190_s1 + $0x1738] sm:$0xff] }
 0x144   : > { %3577 = vmatpush1.bf16.msra.mxu1 %v3576_v40  ;;  %3451 = vmatprep.subr.bf16.mxu0 %v3450_v41  ;;  %v3594_v40 = vpack.c.bf16 %v2777_v47, %v2773_v32  ;;  %v2776_v41 = vld [vmem:[%s6190_s1 + $0x14f0] sm:$0xff]  ;;  %v3468_v46 = vpack.c.bf16 %v2774_v38, %v2770_v37  ;;  %v2817_v32 = vld [vmem:[%s6190_s1 + $0x1638] sm:$0xff]  ;;  %v2814_v37 = vld [vmem:[%s6190_s1 + $0x1620] sm:$0xff] }
 0x145   : > { %3579 = vmatprep.subr.bf16.mxu1 %v3578_v45  ;;  %v2785_v45 = vld [vmem:[%s6190_s1 + $0x1538] sm:$0xff]  ;;  %v3596_v48 = vpack.c.bf16 %v2776_v41, %v2772_v39  ;;  %v2812_v38 = vld [vmem:[%s6190_s1 + $0x1610] sm:$0xff]  ;;  %v3614_v39 = vpack.c.bf16 %v2817_v32, %v2813_v31  ;;  %v2819_v41 = vld [vmem:[%s6190_s1 + $0x1648] sm:$0xff] }
 0x146   : > { %v3598_v53 = vpack.c.bf16 %v2785_v45, %v2781_v44  ;;  %v2825_v44 = vld [vmem:[%s6190_s1 + $0x1678] sm:$0xff] }
 0x147   : > { %3453 = vmatpush1.bf16.msra.mxu0 %v3452_v52  ;;  %v2780_v52 = vld [vmem:[%s6190_s1 + $0x1510] sm:$0xff]  ;;  %v2857_v31 = vld [vmem:[%s6190_s1 + $0x1778] sm:$0xff] }
 0x148   : > { %3581 = vmatpush1.bf16.msra.mxu1 %v3580_v57  ;;  %3455 = vmatprep.subr.bf16.mxu0 %v3454_v58  ;;  %v2789_v57 = vld [vmem:[%s6190_s1 + $0x1558] sm:$0xff]  ;;  %v3600_v61 = vpack.c.bf16 %v2784_v54, %v2780_v52  ;;  %v3618_v52 = vpack.c.bf16 %v2825_v44, %v2821_v43  ;;  %v2827_v54 = vld [vmem:[%s6190_s1 + $0x1688] sm:$0xff] }
 0x149   : > { %3583 = vmatprep.subr.bf16.mxu1 %v3582_v63  ;;  %v2793_v58 = vld [vmem:[%s6190_s1 + $0x1578] sm:$0xff]  ;;  %v2786_v63 = vld [vmem:[%s6190_s1 + $0x1540] sm:$0xff] }
 0x14a   : > { %1857 = vmatmul.mubr.f32.vlgmr.msra.gmra.mrb[0].mxu0 %v1778_v7  ;;  %v3602_v2 = vpack.c.bf16 %v2793_v58, %v2789_v57  ;;  %v2833_v57 = vld [vmem:[%s6190_s1 + $0x16b8] sm:$0xff] }
 0x14b   : > { %3457 = vmatpush1.bf16.msra.mxu0 %v3456_v8  ;;  %1999 = vmatmul.mubr.f32.vlgmr.msra.gmra.mrb[0].mxu1 %v1778_v7  ;;  %v2801_v7 = vld [vmem:[%s6190_s1 + $0x15b8] sm:$0xff]  ;;  %v3476_v8 = vpack.c.bf16 %v2790_v0, %v2786_v63  ;;  %v2830_v63 = vld [vmem:[%s6190_s1 + $0x16a0] sm:$0xff]  ;;  %v2828_v0 = vld [vmem:[%s6190_s1 + $0x1690] sm:$0xff] }
 0x14c   : > { %3585 = vmatpush1.bf16.msra.mxu1 %v3584_v9  ;;  %3459 = vmatprep.subr.bf16.mxu0 %v3458_v10  ;;  %v3604_v9 = vpack.c.bf16 %v2792_v3, %v2788_v1  ;;  %v3478_v10 = vpack.c.bf16 %v2799_v5, %v2795_v4  ;;  %v3622_v1 = vpack.c.bf16 %v2833_v57, %v2829_v56  ;;  %v2835_v3 = vld [vmem:[%s6190_s1 + $0x16c8] sm:$0xff]  ;;  %v2837_v5 = vld [vmem:[%s6190_s1 + $0x16d8] sm:$0xff] }
 0x14d   : > { %3587 = vmatprep.subr.bf16.mxu1 %v3586_v13  ;;  %1927 = vmatprep.mubr.f32.mxu0 %v1787_v18  ;;  %v3606_v13 = vpack.c.bf16 %v2801_v7, %v2797_v6  ;;  %v2839_v4 = vld [vmem:[%s6190_s1 + $0x16e8] sm:$0xff]  ;;  %v2841_v6 = vld [vmem:[%s6190_s1 + $0x16f8] sm:$0xff] }
 0x14e   : > { %2069 = vmatprep.mubr.f32.mxu1 %v1787_v18  ;;  %v3480_v18 = vpack.c.bf16 %v2798_v24, %v2794_v11  ;;  %v2838_v11 = vld [vmem:[%s6190_s1 + $0x16e0] sm:$0xff]  ;;  %v2836_v24 = vld [vmem:[%s6190_s1 + $0x16d0] sm:$0xff]  ;;  %v2865_v43 = vld [vmem:[%s6190_s1 + $0x17b8] sm:$0xff] }
 0x14f   : > { %3461 = vmatpush1.bf16.msra.mxu0 %v3460_v19  ;;  %v3608_v19 = vpack.c.bf16 %v2800_v14, %v2796_v12  ;;  %v3626_v12 = vpack.c.bf16 %v2841_v6, %v2837_v5  ;;  %v2843_v14 = vld [vmem:[%s6190_s1 + $0x1708] sm:$0xff]  ;;  %v2873_v56 = vld [vmem:[%s6190_s1 + $0x17f8] sm:$0xff] }
 0x150   : > { %3589 = vmatpush1.bf16.msra.mxu1 %v3588_v20  ;;  %3463 = vmatprep.subr.bf16.mxu0 %v3462_v21  ;;  %v3482_v20 = vpack.c.bf16 %v2807_v15, %v2803_v25  ;;  %v2802_v21 = vld [vmem:[%s6190_s1 + $0x15c0] sm:$0xff]  ;;  %v2847_v25 = vld [vmem:[%s6190_s1 + $0x1728] sm:$0xff]  ;;  %v2845_v15 = vld [vmem:[%s6190_s1 + $0x1718] sm:$0xff] }
 0x151   : > { %3591 = vmatprep.subr.bf16.mxu1 %v3590_v27  ;;  %v2808_v27 = vld [vmem:[%s6190_s1 + $0x15f0] sm:$0xff]  ;;  %v3484_v47 = vpack.c.bf16 %v2806_v22, %v2802_v21  ;;  %v2846_v21 = vld [vmem:[%s6190_s1 + $0x1720] sm:$0xff] }
 0x152   : > { %v2844_v22 = vld [vmem:[%s6190_s1 + $0x1710] sm:$0xff] }
 0x153   : > { %3465 = vmatpush1.bf16.msra.mxu0 %v3464_v34  ;;  %v3612_v34 = vpack.c.bf16 %v2808_v27, %v2804_v23  ;;  %v3630_v23 = vpack.c.bf16 %v2849_v16, %v2845_v15  ;;  %v2851_v27 = vld [vmem:[%s6190_s1 + $0x1748] sm:$0xff] }
 0x154   : > { %3593 = vmatpush1.bf16.msra.mxu1 %v3592_v35  ;;  %3467 = vmatprep.subr.bf16.mxu0 %v3466_v36  ;;  %v3486_v35 = vpack.c.bf16 %v2815_v30, %v2811_v29  ;;  %v2810_v36 = vld [vmem:[%s6190_s1 + $0x1600] sm:$0xff]  ;;  %v2855_v29 = vld [vmem:[%s6190_s1 + $0x1768] sm:$0xff]  ;;  %v2853_v30 = vld [vmem:[%s6190_s1 + $0x1758] sm:$0xff] }
 0x155   : > { %3595 = vmatprep.subr.bf16.mxu1 %v3594_v40  ;;  %v2816_v40 = vld [vmem:[%s6190_s1 + $0x1630] sm:$0xff]  ;;  %v3488_v45 = vpack.c.bf16 %v2814_v37, %v2810_v36  ;;  %v2854_v36 = vld [vmem:[%s6190_s1 + $0x1760] sm:$0xff] }
 0x156   : > { %v2852_v37 = vld [vmem:[%s6190_s1 + $0x1750] sm:$0xff] }
 0x157   : > { %3469 = vmatpush1.bf16.msra.mxu0 %v3468_v46  ;;  %v3616_v46 = vpack.c.bf16 %v2816_v40, %v2812_v38  ;;  %v3634_v38 = vpack.c.bf16 %v2857_v31, %v2853_v30  ;;  %v2859_v40 = vld [vmem:[%s6190_s1 + $0x1788] sm:$0xff] }
 0x158   : > { %3597 = vmatpush1.bf16.msra.mxu1 %v3596_v48  ;;  %3471 = vmatprep.subr.bf16.mxu0 %v3470_v49  ;;  %v3490_v48 = vpack.c.bf16 %v2823_v42, %v2819_v41  ;;  %v2818_v49 = vld [vmem:[%s6190_s1 + $0x1640] sm:$0xff]  ;;  %v2863_v41 = vld [vmem:[%s6190_s1 + $0x17a8] sm:$0xff]  ;;  %v2861_v42 = vld [vmem:[%s6190_s1 + $0x1798] sm:$0xff] }
 0x159   : > { %3599 = vmatprep.subr.bf16.mxu1 %v3598_v53  ;;  %v2824_v53 = vld [vmem:[%s6190_s1 + $0x1670] sm:$0xff]  ;;  %v3492_v58 = vpack.c.bf16 %v2822_v50, %v2818_v49  ;;  %v2862_v49 = vld [vmem:[%s6190_s1 + $0x17a0] sm:$0xff] }
 0x15a   : > { %v2860_v50 = vld [vmem:[%s6190_s1 + $0x1790] sm:$0xff] }
 0x15b   : > { %3473 = vmatpush1.bf16.msra.mxu0 %v3472_v59  ;;  %v3620_v59 = vpack.c.bf16 %v2824_v53, %v2820_v51  ;;  %v3638_v51 = vpack.c.bf16 %v2865_v43, %v2861_v42  ;;  %v2867_v53 = vld [vmem:[%s6190_s1 + $0x17c8] sm:$0xff] }
 0x15c   : > { %3601 = vmatpush1.bf16.msra.mxu1 %v3600_v61  ;;  %3475 = vmatprep.subr.bf16.mxu0 %v3474_v62  ;;  %v3494_v61 = vpack.c.bf16 %v2831_v55, %v2827_v54  ;;  %v2826_v62 = vld [vmem:[%s6190_s1 + $0x1680] sm:$0xff]  ;;  %v2871_v54 = vld [vmem:[%s6190_s1 + $0x17e8] sm:$0xff]  ;;  %v2869_v55 = vld [vmem:[%s6190_s1 + $0x17d8] sm:$0xff] }
 0x15d   : > { %3603 = vmatprep.subr.bf16.mxu1 %v3602_v2  ;;  %v2832_v2 = vld [vmem:[%s6190_s1 + $0x16b0] sm:$0xff]  ;;  %v3496_v7 = vpack.c.bf16 %v2830_v63, %v2826_v62  ;;  %v2870_v62 = vld [vmem:[%s6190_s1 + $0x17e0] sm:$0xff] }
 0x15e   : > { %v1504_v63 = vld [vmem:[#allocation2 + $0x10] sm:$0xfc] }
 0x15f   : > { %3477 = vmatpush1.bf16.msra.mxu0 %v3476_v8  ;;  %v3624_v8 = vpack.c.bf16 %v2832_v2, %v2828_v0  ;;  %v1508_v0 = vld [vmem:[#allocation2 + $0x30] sm:$0x3]  ;;  %v1782_v5 = vrot.slane %v1504_v63, 2 }
 0x160   : > { %3605 = vmatpush1.bf16.msra.mxu1 %v3604_v9  ;;  %3479 = vmatprep.subr.bf16.mxu0 %v3478_v10  ;;  %v3498_v9 = vpack.c.bf16 %v2839_v4, %v2835_v3  ;;  %v2834_v10 = vld [vmem:[%s6190_s1 + $0x16c0] sm:$0xff]  ;;  %v2868_v2 = vld [vmem:[%s6190_s1 + $0x17d0] sm:$0xff]  ;;  %v1783_v6 = vrot.slane %v1508_v0, 2 }
 0x161   : > { %3607 = vmatprep.subr.bf16.mxu1 %v3606_v13  ;;  %v2840_v13 = vld [vmem:[%s6190_s1 + $0x16f0] sm:$0xff]  ;;  %v3500_v17 = vpack.c.bf16 %v2838_v11, %v2834_v10 }
 0x162   : > { %v2872_v3 = vld [vmem:[%s6190_s1 + $0x17f0] sm:$0xff] }
 0x163   : > { %3481 = vmatpush1.bf16.msra.mxu0 %v3480_v18  ;;  %v3628_v18 = vpack.c.bf16 %v2840_v13, %v2836_v24 }
 0x164   : > { %3609 = vmatpush1.bf16.msra.mxu1 %v3608_v19  ;;  %3483 = vmatprep.subr.bf16.mxu0 %v3482_v20  ;;  %v3502_v19 = vpack.c.bf16 %v2847_v25, %v2843_v14  ;;  %v2842_v20 = vld [vmem:[%s6190_s1 + $0x1700] sm:$0xff] }
 0x165   : > { %3611 = vmatprep.subr.bf16.mxu1 %v3610_v26  ;;  %v2848_v26 = vld [vmem:[%s6190_s1 + $0x1730] sm:$0xff]  ;;  %v3504_v32 = vpack.c.bf16 %v2846_v21, %v2842_v20 }
 0x167   : > { %3485 = vmatpush1.bf16.msra.mxu0 %v3484_v47  ;;  %v3632_v47 = vpack.c.bf16 %v2848_v26, %v2844_v22 }
 0x168   : > { %3613 = vmatpush1.bf16.msra.mxu1 %v3612_v34  ;;  %3487 = vmatprep.subr.bf16.mxu0 %v3486_v35  ;;  %v3506_v34 = vpack.c.bf16 %v2855_v29, %v2851_v27  ;;  %v2850_v35 = vld [vmem:[%s6190_s1 + $0x1740] sm:$0xff] }
 0x169   : > { %3615 = vmatprep.subr.bf16.mxu1 %v3614_v39  ;;  %v2856_v39 = vld [vmem:[%s6190_s1 + $0x1770] sm:$0xff]  ;;  %v3508_v44 = vpack.c.bf16 %v2854_v36, %v2850_v35 }
 0x16b   : > { %3489 = vmatpush1.bf16.msra.mxu0 %v3488_v45  ;;  %v3636_v45 = vpack.c.bf16 %v2856_v39, %v2852_v37 }
 0x16c   : > { %3617 = vmatpush1.bf16.msra.mxu1 %v3616_v46  ;;  %3491 = vmatprep.subr.bf16.mxu0 %v3490_v48  ;;  %v3510_v46 = vpack.c.bf16 %v2863_v41, %v2859_v40  ;;  %v2858_v48 = vld [vmem:[%s6190_s1 + $0x1780] sm:$0xff] }
 0x16d   : > { %3619 = vmatprep.subr.bf16.mxu1 %v3618_v52  ;;  %v2864_v52 = vld [vmem:[%s6190_s1 + $0x17b0] sm:$0xff]  ;;  %v3512_v57 = vpack.c.bf16 %v2862_v49, %v2858_v48 }
 0x16f   : > { %3493 = vmatpush1.bf16.msra.mxu0 %v3492_v58  ;;  %v2866_v58 = vld [vmem:[%s6190_s1 + $0x17c0] sm:$0xff] }
 0x170   : > { %3621 = vmatpush1.bf16.msra.mxu1 %v3620_v59  ;;  %3495 = vmatprep.subr.bf16.mxu0 %v3494_v61  ;;  %v3640_v59 = vpack.c.bf16 %v2864_v52, %v2860_v50  ;;  %v3514_v61 = vpack.c.bf16 %v2871_v54, %v2867_v53  ;;  %v3516_v4 = vpack.c.bf16 %v2870_v62, %v2866_v58 }
 0x171   : > { %3623 = vmatprep.subr.bf16.mxu1 %v3622_v1  ;;  %v3642_v1 = vpack.c.bf16 %v2873_v56, %v2869_v55 }
 0x173   : > { %3497 = vmatpush1.bf16.msra.mxu0 %v3496_v7  ;;  %v3644_v7 = vpack.c.bf16 %v2872_v3, %v2868_v2 }
 0x174   : > { %3625 = vmatpush1.bf16.msra.mxu1 %v3624_v8  ;;  %3499 = vmatprep.subr.bf16.mxu0 %v3498_v9  ;;  %v1784_v8 = vsel %vm1775_vm2, %v1782_v5, %v1783_v6  ;;  %v3717_v9 = vmov 1966171168  }
 0x175   : > { %3627 = vmatprep.subr.bf16.mxu1 %v3626_v12  ;;  %v2122_v10 = vunpack.c.l.s4 %v3717_v9 }
 0x177   : > { %3501 = vmatpush1.bf16.msra.mxu0 %v3500_v17  ;;  %v2123_v11 = vunpack.c.0.s8 %v2122_v10 }
 0x178   : > { %3629 = vmatpush1.bf16.msra.mxu1 %v3628_v18  ;;  %3503 = vmatprep.subr.bf16.mxu0 %v3502_v19 }
 0x179   : > { %3631 = vmatprep.subr.bf16.mxu1 %v3630_v23  ;;  %v6164_v15 = vsub.s32 %v2123_v11, %v4032_v60 }
 0x17b   : > { %3505 = vmatpush1.bf16.msra.mxu0 %v3504_v32 }
 0x17c   : > { %3633 = vmatpush1.bf16.msra.mxu1 %v3632_v47  ;;  %3507 = vmatprep.subr.bf16.mxu0 %v3506_v34 }
 0x17d   : > { %3635 = vmatprep.subr.bf16.mxu1 %v3634_v38 }
 0x17f   : > { %3509 = vmatpush1.bf16.msra.mxu0 %v3508_v44 }
 0x180   : > { %3637 = vmatpush1.bf16.msra.mxu1 %v3636_v45  ;;  %3511 = vmatprep.subr.bf16.mxu0 %v3510_v46 }
 0x181   : > { %3639 = vmatprep.subr.bf16.mxu1 %v3638_v51 }
 0x183   : > { %3513 = vmatpush1.bf16.msra.mxu0 %v3512_v57 }
 0x184   : > { %3641 = vmatpush1.bf16.msra.mxu1 %v3640_v59  ;;  %3515 = vmatprep.subr.bf16.mxu0 %v3514_v61 }
 0x185   : > { %3643 = vmatprep.subr.bf16.mxu1 %v3642_v1 }
 0x187   : > { %3517 = vmatpush1.bf16.msra.mxu0 %v3516_v4 }
 0x188   : > { %3645 = vmatpush1.bf16.msra.mxu1 %v3644_v7 }
 0x18a   : > { %1928 = vmatmul.mubr.f32.vlgmr.msra.gmra.mrb[0].mxu0 %v1784_v8 }
 0x18b   : > { %2070 = vmatmul.mubr.f32.vlgmr.msra.gmra.mrb[0].mxu1 %v1784_v8 }
 0x25d   : > { %v1929_v24 = vpop.f32.mrb[0].mxu0 }
 0x25e   : > { %2080 = vst [vmem:[%s286_s18] sm:$0xff] %v1929_v24  ;;  %v2091_v12 = vrot.slane %v1929_v24, 4  ;;  %v2147_v13 = vmul.f32 %v1929_v24, %v1929_v24  ;;  %v2071_v14 = vpop.f32.mrb[0].mxu1  ;;  %v1931_v25 = vpop.f32.mrb[1].mxu0 }
 0x25f   : > { %2082 = vst [vmem:[%s286_s18 + $0x10] sm:$0xff] %v2071_v14  ;;  %v2103_v16 = vrot.slane %v2071_v14, 4  ;;  %v2149_v33 = vmul.f32 %v2071_v14, %v2071_v14  ;;  %2081 = vst [vmem:[%s286_s18 + $0x8] sm:$0xff] %v1931_v25  ;;  %v2097_v17 = vrot.slane %v1931_v25, 4  ;;  %v2148_v18 = vmul.f32 %v1931_v25, %v1931_v25  ;;  %v2073_v19 = vpop.f32.mrb[1].mxu1 }
 0x260   : > { %v2092_v20 = vadd.f32 %v2091_v12, %v1929_v24  ;;  %v2151_v21 = vrot.slane %v2147_v13, 4  ;;  %2083 = vst [vmem:[%s286_s18 + $0x18] sm:$0xff] %v2073_v19  ;;  %v2109_v22 = vrot.slane %v2073_v19, 4  ;;  %v2150_v23 = vmul.f32 %v2073_v19, %v2073_v19 }
 0x261   : > { %v2104_v26 = vadd.f32 %v2103_v16, %v2071_v14  ;;  %v2163_v27 = vrot.slane %v2149_v33, 4  ;;  %v2098_v29 = vadd.f32 %v2097_v17, %v1931_v25  ;;  %v2157_v30 = vrot.slane %v2148_v18, 4  ;;  %v2090_v14 = vld [vmem:[%s6143_s10] sm:$0xf] }
 0x262   : > { %v2093_v31 = vrot.slane %v2092_v20, 2  ;;  %v2152_v32 = vadd.f32 %v2151_v21, %v2147_v13  ;;  %v2110_v60 = vadd.f32 %v2109_v22, %v2073_v19  ;;  %v2169_v47 = vrot.slane %v2150_v23, 4 }
 0x263   : > { %v2105_v34 = vrot.slane %v2104_v26, 2  ;;  %v2164_v35 = vadd.f32 %v2163_v27, %v2149_v33  ;;  %v2099_v36 = vrot.slane %v2098_v29, 2  ;;  %v2158_v37 = vadd.f32 %v2157_v30, %v2148_v18  ;;  %v2146_v33 = vld [vmem:[%s6152_s14] sm:$0xf] }
 0x264   : > { %v2094_v38 = vadd.f32 %v2093_v31, %v2092_v20  ;;  %v2153_v39 = vrot.slane %v2152_v32, 2  ;;  %v2111_v40 = vrot.slane %v2110_v60, 2  ;;  %v2170_v41 = vadd.f32 %v2169_v47, %v2150_v23 }
 0x265   : > { %v2106_v42 = vadd.f32 %v2105_v34, %v2104_v26  ;;  %v2165_v43 = vrot.slane %v2164_v35, 2  ;;  %v2100_v44 = vadd.f32 %v2099_v36, %v2098_v29  ;;  %v2159_v45 = vrot.slane %v2158_v37, 2 }
 0x266   : > { %v2095_v46 = vrot.slane %v2094_v38, 1  ;;  %v2154_v48 = vadd.f32 %v2153_v39, %v2152_v32  ;;  %v2112_v49 = vadd.f32 %v2111_v40, %v2110_v60  ;;  %v2171_v50 = vrot.slane %v2170_v41, 2 }
 0x267   : > { %v2107_v51 = vrot.slane %v2106_v42, 1  ;;  %v2166_v52 = vadd.f32 %v2165_v43, %v2164_v35  ;;  %v2101_v53 = vrot.slane %v2100_v44, 1  ;;  %v2160_v54 = vadd.f32 %v2159_v45, %v2158_v37 }
 0x268   : > { %v2096_v55 = vadd.f32 %v2095_v46, %v2094_v38  ;;  %v2155_v56 = vrot.slane %v2154_v48, 1  ;;  %v2113_v57 = vrot.slane %v2112_v49, 1  ;;  %v2172_v58 = vadd.f32 %v2171_v50, %v2170_v41 }
 0x269   : > { %v2108_v59 = vadd.f32 %v2107_v51, %v2106_v42  ;;  %v2167_v61 = vrot.slane %v2166_v52, 1  ;;  %v2102_v62 = vadd.f32 %v2101_v53, %v2100_v44  ;;  %v2161_v63 = vrot.slane %v2160_v54, 1 }
 0x26a   : > { %v2156_v0 = vadd.f32 %v2155_v56, %v2154_v48  ;;  %v2114_v1 = vadd.f32 %v2113_v57, %v2112_v49  ;;  %v2173_v2 = vrot.slane %v2172_v58, 1 }
 0x26b   : > { %v2168_v3 = vadd.f32 %v2167_v61, %v2166_v52  ;;  %v2119_v4 = vcombine.low %v2096_v55, %v2102_v62  ;;  %v2162_v5 = vadd.f32 %v2161_v63, %v2160_v54 }
 0x26c   : > { %v2120_v6 = vcombine.low %v2108_v59, %v2114_v1  ;;  %v2174_v7 = vadd.f32 %v2173_v2, %v2172_v58 }
 0x26d   : > { %v2127_v8 = vrot.slane %v2119_v4, %v6164_v15  ;;  %v2179_v9 = vcombine.low %v2156_v0, %v2162_v5 }
 0x26e   : > { %v2134_v10 = vrot.slane %v2120_v6, %v6164_v15  ;;  %v2180_v11 = vcombine.low %v2168_v3, %v2174_v7 }
 0x26f   : > { %v2187_v24 = vrot.slane %v2179_v9, %v6164_v15 }
 0x270   : > { %v2135_v12 = vcombine.low %v2127_v8, %v2134_v10  ;;  %v2194_v13 = vrot.slane %v2180_v11, %v6164_v15 }
 0x272   : > { %v2142_v25 = vrot.slane %v2135_v12, %v6164_v15  ;;  %v2195_v16 = vcombine.low %v2187_v24, %v2194_v13 }
 0x274   : > { %v2144_v17 = vadd.f32 %v2142_v25, %v2090_v14  ;;  %v2202_v18 = vrot.slane %v2195_v16, %v6164_v15 }
 0x276   : > { %2145 = vst.msk [vmem:[%s6143_s10] sm:$0xf] %vm4211_vm0, %v2144_v17  ;;  %v2204_v19 = vadd.f32 %v2202_v18, %v2146_v33 }
 0x278   : > { %2205 = vst.msk [vmem:[%s6152_s14] sm:$0xf] %vm4211_vm0, %v2204_v19 }
 0x279 PF: > { %s17_s23 = sadd.s32 1, %s3714_s23   ;;  %s6198_s21 = smov %s3710_s22 }
 0x27a   : > { %p14_p5 = scmp.ge.s32.totalorder %s17_s23, 4   ;;  %s6199_s22 = smov %s6201_s24 }
 0x27c   :  { %16 = sbr.rel (!%p14_p5) target bundleno = 2 (0x2), region = 97 }

</bundles_post_ra>
